<compile_context>
chip_gen: v5e
topology: v5e:2x2
jax: 0.10.0
libtpu: 0.0.40
codegen_flags: <defaults>
</compile_context>

<pallas_src>
import functools

import jax
import jax.numpy as jnp
from jax import lax
from jax.experimental import pallas as pl
from jax.experimental.pallas import tpu as pltpu

# dtype fed to the MXU (accumulation is always float32).  Set to jnp.float32
# for bit-exact f32 numerics (e.g. if you prefer pure f32 on v5e).
MATMUL_DTYPE = jnp.bfloat16


# ----------------------------------------------------------------------------
# Fused Pallas kernel
# ----------------------------------------------------------------------------
def _mxu_dot(a, b):
    """2-D matmul on the MXU with f32 accumulation."""
    return jnp.dot(a.astype(MATMUL_DTYPE), b.astype(MATMUL_DTYPE),
                   preferred_element_type=jnp.float32)


def _net_kernel(x_ref, a0_ref, a1_ref, b1_ref, p0_ref, p1_ref, s_ref,
                c0_ref, c1_ref, b2_ref, q0_ref, q1_ref, r_ref,
                w1h_ref, fb1_ref, w2t_ref, fb2_ref, o_ref, *, tb):
    f32 = jnp.float32
    x = x_ref[...]                                           # (TB, 28, 28) f32

    # ---- conv1 (banded matmuls; 2x2 W-pool folded into even/odd columns) ----
    # u[b*24+i, pj*10+o] = conv1[b, o, i, 2*pj]   (pre-bias),  v: column 2*pj+1
    u = jnp.zeros((tb * 24, 120), f32)
    v = jnp.zeros((tb * 24, 120), f32)
    for ki in range(5):
        xs = x[:, ki:ki + 24, :].reshape(tb * 24, 28)        # rows (b, i+ki)
        u = u + _mxu_dot(xs, a0_ref[ki])
        v = v + _mxu_dot(xs, a1_ref[ki])
    zw = jnp.maximum(u, v) + b1_ref[...]                     # (TB*24, 120)

    # ---- 2x2 H-pool (even/odd row gather via 0/1 matmuls) + ReLU -----------
    pool1 = jnp.maximum(
        jnp.maximum(_mxu_dot(p0_ref[...], zw), _mxu_dot(p1_ref[...], zw)), 0.0)
    pool1 = pool1.astype(MATMUL_DTYPE)
    # pool1[b*12+h, w*10+c] = relu(maxpool(conv1))[b, c, h, w]    (TB*12, 120)

    # ---- conv2 (row-shift selection + banded matmuls; W-pool folded) -------
    u2 = jnp.zeros((tb * 8, 80), f32)
    v2 = jnp.zeros((tb * 8, 80), f32)
    for ki in range(5):
        xs = _mxu_dot(s_ref[ki], pool1)                      # rows (b, i+ki): (TB*8, 120)
        u2 = u2 + _mxu_dot(xs, c0_ref[ki])
        v2 = v2 + _mxu_dot(xs, c1_ref[ki])
    zw2 = jnp.maximum(u2, v2) + b2_ref[...]                  # (TB*8, 80)
    # TODO(synk): Dropout2d is identity in eval mode; training-mode channel
    # dropout is not implemented.

    pool2 = jnp.maximum(
        jnp.maximum(_mxu_dot(q0_ref[...], zw2), _mxu_dot(q1_ref[...], zw2)), 0.0)
    pool2 = pool2.astype(MATMUL_DTYPE)
    # pool2[b*4+h, w*20+c] = relu(maxpool(conv2))[b, c, h, w]     (TB*4, 80)

    # ---- fc1 + ReLU (NCHW flatten permutation folded into the weights) -----
    h = jnp.zeros((tb, 50), f32)
    for hh in range(4):
        rows = _mxu_dot(r_ref[hh], pool2)                    # (TB, 80): row hh of each image
        h = h + _mxu_dot(rows, w1h_ref[hh])
    h = jnp.maximum(h + fb1_ref[...], 0.0)                   # (TB, 50)
    # TODO(synk): F.dropout is identity in eval mode; not implemented for training.

    # ---- fc2 + log_softmax --------------------------------------------------
    logits = _mxu_dot(h, w2t_ref[...]) + fb2_ref[...]        # (TB, 10)
    m = jnp.max(logits, axis=-1, keepdims=True)
    s = logits - m
    lse = jnp.log(jnp.sum(jnp.exp(s), axis=-1, keepdims=True))
    o_ref[...] = (s - lse).astype(o_ref.dtype)


# ----------------------------------------------------------------------------
# Wrapper-side weight repacking (runs once under jit, tiny matrices)
# ----------------------------------------------------------------------------
def _conv1_band_matrices(w1):
    """A0/A1 (5, 28, 120): A[ki][c, pj*10+o] = w1[o, 0, ki, c-(2pj+parity)]."""
    w = w1[:, 0]                                   # (10, 5, 5)  [o, ki, kj]
    c = jnp.arange(28)[:, None]                    # input column
    pj = jnp.arange(12)[None, :]                   # pooled output column

    def build(parity):
        kj = c - (2 * pj + parity)                 # (28, 12)
        valid = (kj >= 0) & (kj <= 4)
        kjc = jnp.clip(kj, 0, 4)
        mats = []
        for ki in range(5):
            wk = w[:, ki, :].T                     # (5, 10)  [kj, o]
            vals = jnp.where(valid[..., None], wk[kjc], 0.0)   # (28, 12, 10)
            mats.append(vals.reshape(28, 120))
        return jnp.stack(mats)

    return build(0), build(1)


def _conv2_band_matrices(w2):
    """B0/B1 (5, 120, 80): B[ki][wj*10+c, pj*20+o] = w2[o, c, ki, wj-(2pj+parity)]."""
    wj = jnp.arange(12)[:, None]
    pj = jnp.arange(4)[None, :]

    def build(parity):
        kj = wj - (2 * pj + parity)                # (12, 4)
        valid = (kj >= 0) & (kj <= 4)
        kjc = jnp.clip(kj, 0, 4)
        mats = []
        for ki in range(5):
            wk = jnp.transpose(w2[:, :, ki, :], (2, 1, 0))     # (5, 10, 20) [kj, c, o]
            vals = jnp.where(valid[..., None, None], wk[kjc], 0.0)  # (12, 4, 10, 20)
            vals = jnp.transpose(vals, (0, 2, 1, 3))           # (12, 10, 4, 20)
            mats.append(vals.reshape(120, 80))
        return jnp.stack(mats)

    return build(0), build(1)


def _fc1_folded(fc1_w):
    """(4, 80, 50): W1h[h][w*20+c, n] = fc1_w[n, c*16 + h*4 + w]."""
    fw = fc1_w.reshape(50, 20, 4, 4)               # [n, c, h, w]
    return jnp.transpose(fw, (2, 3, 1, 0)).reshape(4, 80, 50)


def _row_parity_selectors(rows):
    r = jnp.arange(rows)[None, :]
    pr = jnp.arange(rows // 2)[:, None]
    return ((r == 2 * pr).astype(jnp.float32),
            (r == 2 * pr + 1).astype(jnp.float32))


def _conv2_row_shift_selectors(tb):
    """(5, tb*8, tb*12): S[ki][b*8+i, b*12+ki+i] = 1."""
    base = jnp.arange(tb)[:, None] * 12 + jnp.arange(8)[None, :]   # (tb, 8)
    src = jnp.arange(tb * 12)[None, None, :]
    mats = [(src == (base + ki)[..., None]).astype(jnp.float32).reshape(tb * 8, tb * 12)
            for ki in range(5)]
    return jnp.stack(mats)


def _fc1_row_selectors(tb):
    """(4, tb, tb*4): R[h][b, b*4+h] = 1."""
    src = jnp.arange(tb * 4)[None, :]
    mats = [(src == (jnp.arange(tb) * 4 + h)[:, None]).astype(jnp.float32)
            for h in range(4)]
    return jnp.stack(mats)


def _const_spec(a):
    nd = a.ndim
    return pl.BlockSpec(a.shape, lambda i, _nd=nd: (0,) * _nd)


# ----------------------------------------------------------------------------
# Forward pass
# ----------------------------------------------------------------------------
def net_forward(params, x_nchw, *, batch_tile=8):
    assert batch_tile % 8 == 0, "batch_tile must be a multiple of 8"
    tb = batch_tile
    batch = x_nchw.shape[0]
    bp = ((batch + tb - 1) // tb) * tb

    x = x_nchw[:, 0, :, :].astype(jnp.float32)               # (B, 28, 28)
    if bp != batch:
        x = jnp.pad(x, ((0, bp - batch), (0, 0), (0, 0)))

    cdt = MATMUL_DTYPE
    a0, a1 = _conv1_band_matrices(params["w1"])              # (5, 28, 120) x2
    c0, c1 = _conv2_band_matrices(params["w2"])              # (5, 120, 80) x2
    w1h = _fc1_folded(params["fc1_w"])                       # (4, 80, 50)
    w2t = params["fc2_w"].T                                  # (50, 10)
    p0, p1 = _row_parity_selectors(tb * 24)                  # (tb*12, tb*24)
    q0, q1 = _row_parity_selectors(tb * 8)                   # (tb*4,  tb*8)
    ssel = _conv2_row_shift_selectors(tb)                    # (5, tb*8, tb*12)
    rsel = _fc1_row_selectors(tb)                            # (4, tb, tb*4)

    # matmul operands go to the MXU in bf16; biases stay f32 (VPU epilogue)
    a0, a1, c0, c1, w1h, w2t = (t.astype(cdt) for t in (a0, a1, c0, c1, w1h, w2t))
    p0, p1, q0, q1, ssel, rsel = (t.astype(cdt) for t in (p0, p1, q0, q1, ssel, rsel))
    b1r = jnp.tile(params["b1"], 12)[None, :].astype(jnp.float32)   # (1, 120)
    b2r = jnp.tile(params["b2"], 4)[None, :].astype(jnp.float32)    # (1, 80)
    fb1 = params["fc1_b"][None, :].astype(jnp.float32)              # (1, 50)
    fb2 = params["fc2_b"][None, :].astype(jnp.float32)              # (1, 10)

    operands = (x, a0, a1, b1r, p0, p1, ssel, c0, c1, b2r, q0, q1, rsel,
                w1h, fb1, w2t, fb2)
    in_specs = [pl.BlockSpec((tb, 28, 28), lambda i: (i, 0, 0))]
    in_specs += [_const_spec(t) for t in operands[1:]]

    out = pl.pallas_call(
        functools.partial(_net_kernel, tb=tb),
        grid=(bp // tb,),
        in_specs=in_specs,
        out_specs=pl.BlockSpec((tb, 10), lambda i: (i, 0)),
        out_shape=jax.ShapeDtypeStruct((bp, 10), jnp.float32),
        compiler_params=pltpu.CompilerParams(dimension_semantics=("parallel",)),
    )(*operands)
    return out[:batch]


# ----------------------------------------------------------------------------
# Parameters (PyTorch-style init) and pure-JAX reference for verification
# ----------------------------------------------------------------------------
def init_params(key):
    ks = jax.random.split(key, 8)

    def u(k, shape, fan_in):
        bound = 1.0 / jnp.sqrt(jnp.float32(fan_in))
        return jax.random.uniform(k, shape, jnp.float32, -bound, bound)

    return {
        "w1": u(ks[0], (10, 1, 5, 5), 1 * 5 * 5),
        "b1": u(ks[1], (10,), 1 * 5 * 5),
        "w2": u(ks[2], (20, 10, 5, 5), 10 * 5 * 5),
        "b2": u(ks[3], (20,), 10 * 5 * 5),
        "fc1_w": u(ks[4], (50, 320), 320),
        "fc1_b": u(ks[5], (50,), 320),
        "fc2_w": u(ks[6], (10, 50), 50),
        "fc2_b": u(ks[7], (10,), 50),
    }


def net_forward_reference(params, x_nchw):
    def conv(x, w, b):
        y = lax.conv_general_dilated(x, w, (1, 1), "VALID",
                                     dimension_numbers=("NCHW", "OIHW", "NCHW"))
        return y + b[None, :, None, None]

    def maxpool2x2(y):
        return jnp.maximum(jnp.maximum(y[:, :, 0::2, 0::2], y[:, :, 0::2, 1::2]),
                           jnp.maximum(y[:, :, 1::2, 0::2], y[:, :, 1::2, 1::2]))

    x = x_nchw.astype(jnp.float32)
    y = jax.nn.relu(maxpool2x2(conv(x, params["w1"], params["b1"])))
    y = jax.nn.relu(maxpool2x2(conv(y, params["w2"], params["b2"])))
    flat = y.reshape(y.shape[0], -1)
    h = jax.nn.relu(flat @ params["fc1_w"].T + params["fc1_b"])
    logits = h @ params["fc2_w"].T + params["fc2_b"]
    return jax.nn.log_softmax(logits, axis=-1)


if __name__ == "__main__":
    key = jax.random.PRNGKey(0)
    pkey, xkey = jax.random.split(key)
    params = init_params(pkey)
    x = jax.random.normal(xkey, (2, 1, 28, 28), jnp.float32)   # batch=2, MNIST-sized

    out = jax.jit(net_forward)(params, x)
    jax.block_until_ready(out)
    assert out.shape == (2, 10)

    ref = jax.jit(net_forward_reference)(params, x)
    err = float(jnp.max(jnp.abs(out - ref)))
    assert err < 0.15, f"Pallas kernel mismatch vs reference (max abs err {err})"
    print("KERNEL_OK")
</pallas_src>

<mosaic_0001>
module attributes {stable_mosaic.version = 11 : i64} {
  func.func @_net_kernel(%arg0: i32, %arg1: memref<8x28x28xf32, #tpu.memory_space<vmem>>, %arg2: memref<5x28x120xbf16, #tpu.memory_space<vmem>>, %arg3: memref<5x28x120xbf16, #tpu.memory_space<vmem>>, %arg4: memref<1x120xf32, #tpu.memory_space<vmem>>, %arg5: memref<96x192xbf16, #tpu.memory_space<vmem>>, %arg6: memref<96x192xbf16, #tpu.memory_space<vmem>>, %arg7: memref<5x64x96xbf16, #tpu.memory_space<vmem>>, %arg8: memref<5x120x80xbf16, #tpu.memory_space<vmem>>, %arg9: memref<5x120x80xbf16, #tpu.memory_space<vmem>>, %arg10: memref<1x80xf32, #tpu.memory_space<vmem>>, %arg11: memref<32x64xbf16, #tpu.memory_space<vmem>>, %arg12: memref<32x64xbf16, #tpu.memory_space<vmem>>, %arg13: memref<4x8x32xbf16, #tpu.memory_space<vmem>>, %arg14: memref<4x80x50xbf16, #tpu.memory_space<vmem>>, %arg15: memref<1x50xf32, #tpu.memory_space<vmem>>, %arg16: memref<50x10xbf16, #tpu.memory_space<vmem>>, %arg17: memref<1x10xf32, #tpu.memory_space<vmem>>, %arg18: memref<8x10xf32, #tpu.memory_space<vmem>>) attributes {dimension_semantics = [#tpu.dimension_semantics<parallel>], iteration_bounds = array<i64: 1>, scalar_prefetch = 0 : i64, scratch_operands = 0 : i64, tpu.core_type = #tpu.core_type<tc>, window_params = [{transform_indices = @transform_0, window_bounds = array<i64: 8, 28, 28>}, {pipeline_mode = #tpu.pipeline_mode<synchronous>, transform_indices = @transform_1, window_bounds = array<i64: 5, 28, 120>}, {pipeline_mode = #tpu.pipeline_mode<synchronous>, transform_indices = @transform_2, window_bounds = array<i64: 5, 28, 120>}, {pipeline_mode = #tpu.pipeline_mode<synchronous>, transform_indices = @transform_3, window_bounds = array<i64: 1, 120>}, {pipeline_mode = #tpu.pipeline_mode<synchronous>, transform_indices = @transform_4, window_bounds = array<i64: 96, 192>}, {pipeline_mode = #tpu.pipeline_mode<synchronous>, transform_indices = @transform_5, window_bounds = array<i64: 96, 192>}, {pipeline_mode = #tpu.pipeline_mode<synchronous>, transform_indices = @transform_6, window_bounds = array<i64: 5, 64, 96>}, {pipeline_mode = #tpu.pipeline_mode<synchronous>, transform_indices = @transform_7, window_bounds = array<i64: 5, 120, 80>}, {pipeline_mode = #tpu.pipeline_mode<synchronous>, transform_indices = @transform_8, window_bounds = array<i64: 5, 120, 80>}, {pipeline_mode = #tpu.pipeline_mode<synchronous>, transform_indices = @transform_9, window_bounds = array<i64: 1, 80>}, {pipeline_mode = #tpu.pipeline_mode<synchronous>, transform_indices = @transform_10, window_bounds = array<i64: 32, 64>}, {pipeline_mode = #tpu.pipeline_mode<synchronous>, transform_indices = @transform_11, window_bounds = array<i64: 32, 64>}, {pipeline_mode = #tpu.pipeline_mode<synchronous>, transform_indices = @transform_12, window_bounds = array<i64: 4, 8, 32>}, {pipeline_mode = #tpu.pipeline_mode<synchronous>, transform_indices = @transform_13, window_bounds = array<i64: 4, 80, 50>}, {pipeline_mode = #tpu.pipeline_mode<synchronous>, transform_indices = @transform_14, window_bounds = array<i64: 1, 50>}, {pipeline_mode = #tpu.pipeline_mode<synchronous>, transform_indices = @transform_15, window_bounds = array<i64: 50, 10>}, {pipeline_mode = #tpu.pipeline_mode<synchronous>, transform_indices = @transform_16, window_bounds = array<i64: 1, 10>}, {transform_indices = @transform_17, window_bounds = array<i64: 8, 10>}]} {
    %c0 = arith.constant 0 : index
    %c0_0 = arith.constant 0 : index
    %c0_1 = arith.constant 0 : index
    %0 = vector.load %arg1[%c0, %c0_0, %c0_1] : memref<8x28x28xf32, #tpu.memory_space<vmem>>, vector<8x28x28xf32>
    %cst = arith.constant 0.000000e+00 : f32
    %1 = vector.broadcast %cst : f32 to vector<192x120xf32>
    %cst_2 = arith.constant 0.000000e+00 : f32
    %2 = vector.broadcast %cst_2 : f32 to vector<192x120xf32>
    %3 = vector.extract_strided_slice %0 {offsets = [0, 0, 0], sizes = [8, 24, 28], strides = [1, 1, 1]} : vector<8x28x28xf32> to vector<8x24x28xf32>
    %4 = vector.shape_cast %3 : vector<8x24x28xf32> to vector<192x28xf32>
    %c0_3 = arith.constant 0 : index
    %c0_4 = arith.constant 0 : index
    %c0_5 = arith.constant 0 : index
    %5 = vector.load %arg2[%c0_3, %c0_4, %c0_5] : memref<5x28x120xbf16, #tpu.memory_space<vmem>>, vector<1x28x120xbf16>
    %6 = vector.shape_cast %5 : vector<1x28x120xbf16> to vector<28x120xbf16>
    %7 = arith.truncf %4 : vector<192x28xf32> to vector<192x28xbf16>
    %cst_6 = arith.constant dense<0.000000e+00> : vector<192x120xf32>
    %8 = tpu.matmul %7, %6, %cst_6 {dimension_numbers = #tpu.dot_dimension_numbers<[1], [0], [0], [1], [0, 0, 1, 1], [], []>} : vector<192x28xbf16>, vector<28x120xbf16>, vector<192x120xf32> -> vector<192x120xf32>
    %9 = arith.addf %1, %8 : vector<192x120xf32>
    %c0_7 = arith.constant 0 : index
    %c0_8 = arith.constant 0 : index
    %c0_9 = arith.constant 0 : index
    %10 = vector.load %arg3[%c0_7, %c0_8, %c0_9] : memref<5x28x120xbf16, #tpu.memory_space<vmem>>, vector<1x28x120xbf16>
    %11 = vector.shape_cast %10 : vector<1x28x120xbf16> to vector<28x120xbf16>
    %12 = arith.truncf %4 : vector<192x28xf32> to vector<192x28xbf16>
    %cst_10 = arith.constant dense<0.000000e+00> : vector<192x120xf32>
    %13 = tpu.matmul %12, %11, %cst_10 {dimension_numbers = #tpu.dot_dimension_numbers<[1], [0], [0], [1], [0, 0, 1, 1], [], []>} : vector<192x28xbf16>, vector<28x120xbf16>, vector<192x120xf32> -> vector<192x120xf32>
    %14 = arith.addf %2, %13 : vector<192x120xf32>
    %15 = vector.extract_strided_slice %0 {offsets = [0, 1, 0], sizes = [8, 24, 28], strides = [1, 1, 1]} : vector<8x28x28xf32> to vector<8x24x28xf32>
    %16 = vector.shape_cast %15 : vector<8x24x28xf32> to vector<192x28xf32>
    %c1 = arith.constant 1 : index
    %c0_11 = arith.constant 0 : index
    %c0_12 = arith.constant 0 : index
    %17 = vector.load %arg2[%c1, %c0_11, %c0_12] : memref<5x28x120xbf16, #tpu.memory_space<vmem>>, vector<1x28x120xbf16>
    %18 = vector.shape_cast %17 : vector<1x28x120xbf16> to vector<28x120xbf16>
    %19 = arith.truncf %16 : vector<192x28xf32> to vector<192x28xbf16>
    %cst_13 = arith.constant dense<0.000000e+00> : vector<192x120xf32>
    %20 = tpu.matmul %19, %18, %cst_13 {dimension_numbers = #tpu.dot_dimension_numbers<[1], [0], [0], [1], [0, 0, 1, 1], [], []>} : vector<192x28xbf16>, vector<28x120xbf16>, vector<192x120xf32> -> vector<192x120xf32>
    %21 = arith.addf %9, %20 : vector<192x120xf32>
    %c1_14 = arith.constant 1 : index
    %c0_15 = arith.constant 0 : index
    %c0_16 = arith.constant 0 : index
    %22 = vector.load %arg3[%c1_14, %c0_15, %c0_16] : memref<5x28x120xbf16, #tpu.memory_space<vmem>>, vector<1x28x120xbf16>
    %23 = vector.shape_cast %22 : vector<1x28x120xbf16> to vector<28x120xbf16>
    %24 = arith.truncf %16 : vector<192x28xf32> to vector<192x28xbf16>
    %cst_17 = arith.constant dense<0.000000e+00> : vector<192x120xf32>
    %25 = tpu.matmul %24, %23, %cst_17 {dimension_numbers = #tpu.dot_dimension_numbers<[1], [0], [0], [1], [0, 0, 1, 1], [], []>} : vector<192x28xbf16>, vector<28x120xbf16>, vector<192x120xf32> -> vector<192x120xf32>
    %26 = arith.addf %14, %25 : vector<192x120xf32>
    %27 = vector.extract_strided_slice %0 {offsets = [0, 2, 0], sizes = [8, 24, 28], strides = [1, 1, 1]} : vector<8x28x28xf32> to vector<8x24x28xf32>
    %28 = vector.shape_cast %27 : vector<8x24x28xf32> to vector<192x28xf32>
    %c2 = arith.constant 2 : index
    %c0_18 = arith.constant 0 : index
    %c0_19 = arith.constant 0 : index
    %29 = vector.load %arg2[%c2, %c0_18, %c0_19] : memref<5x28x120xbf16, #tpu.memory_space<vmem>>, vector<1x28x120xbf16>
    %30 = vector.shape_cast %29 : vector<1x28x120xbf16> to vector<28x120xbf16>
    %31 = arith.truncf %28 : vector<192x28xf32> to vector<192x28xbf16>
    %cst_20 = arith.constant dense<0.000000e+00> : vector<192x120xf32>
    %32 = tpu.matmul %31, %30, %cst_20 {dimension_numbers = #tpu.dot_dimension_numbers<[1], [0], [0], [1], [0, 0, 1, 1], [], []>} : vector<192x28xbf16>, vector<28x120xbf16>, vector<192x120xf32> -> vector<192x120xf32>
    %33 = arith.addf %21, %32 : vector<192x120xf32>
    %c2_21 = arith.constant 2 : index
    %c0_22 = arith.constant 0 : index
    %c0_23 = arith.constant 0 : index
    %34 = vector.load %arg3[%c2_21, %c0_22, %c0_23] : memref<5x28x120xbf16, #tpu.memory_space<vmem>>, vector<1x28x120xbf16>
    %35 = vector.shape_cast %34 : vector<1x28x120xbf16> to vector<28x120xbf16>
    %36 = arith.truncf %28 : vector<192x28xf32> to vector<192x28xbf16>
    %cst_24 = arith.constant dense<0.000000e+00> : vector<192x120xf32>
    %37 = tpu.matmul %36, %35, %cst_24 {dimension_numbers = #tpu.dot_dimension_numbers<[1], [0], [0], [1], [0, 0, 1, 1], [], []>} : vector<192x28xbf16>, vector<28x120xbf16>, vector<192x120xf32> -> vector<192x120xf32>
    %38 = arith.addf %26, %37 : vector<192x120xf32>
    %39 = vector.extract_strided_slice %0 {offsets = [0, 3, 0], sizes = [8, 24, 28], strides = [1, 1, 1]} : vector<8x28x28xf32> to vector<8x24x28xf32>
    %40 = vector.shape_cast %39 : vector<8x24x28xf32> to vector<192x28xf32>
    %c3 = arith.constant 3 : index
    %c0_25 = arith.constant 0 : index
    %c0_26 = arith.constant 0 : index
    %41 = vector.load %arg2[%c3, %c0_25, %c0_26] : memref<5x28x120xbf16, #tpu.memory_space<vmem>>, vector<1x28x120xbf16>
    %42 = vector.shape_cast %41 : vector<1x28x120xbf16> to vector<28x120xbf16>
    %43 = arith.truncf %40 : vector<192x28xf32> to vector<192x28xbf16>
    %cst_27 = arith.constant dense<0.000000e+00> : vector<192x120xf32>
    %44 = tpu.matmul %43, %42, %cst_27 {dimension_numbers = #tpu.dot_dimension_numbers<[1], [0], [0], [1], [0, 0, 1, 1], [], []>} : vector<192x28xbf16>, vector<28x120xbf16>, vector<192x120xf32> -> vector<192x120xf32>
    %45 = arith.addf %33, %44 : vector<192x120xf32>
    %c3_28 = arith.constant 3 : index
    %c0_29 = arith.constant 0 : index
    %c0_30 = arith.constant 0 : index
    %46 = vector.load %arg3[%c3_28, %c0_29, %c0_30] : memref<5x28x120xbf16, #tpu.memory_space<vmem>>, vector<1x28x120xbf16>
    %47 = vector.shape_cast %46 : vector<1x28x120xbf16> to vector<28x120xbf16>
    %48 = arith.truncf %40 : vector<192x28xf32> to vector<192x28xbf16>
    %cst_31 = arith.constant dense<0.000000e+00> : vector<192x120xf32>
    %49 = tpu.matmul %48, %47, %cst_31 {dimension_numbers = #tpu.dot_dimension_numbers<[1], [0], [0], [1], [0, 0, 1, 1], [], []>} : vector<192x28xbf16>, vector<28x120xbf16>, vector<192x120xf32> -> vector<192x120xf32>
    %50 = arith.addf %38, %49 : vector<192x120xf32>
    %51 = vector.extract_strided_slice %0 {offsets = [0, 4, 0], sizes = [8, 24, 28], strides = [1, 1, 1]} : vector<8x28x28xf32> to vector<8x24x28xf32>
    %52 = vector.shape_cast %51 : vector<8x24x28xf32> to vector<192x28xf32>
    %c4 = arith.constant 4 : index
    %c0_32 = arith.constant 0 : index
    %c0_33 = arith.constant 0 : index
    %53 = vector.load %arg2[%c4, %c0_32, %c0_33] : memref<5x28x120xbf16, #tpu.memory_space<vmem>>, vector<1x28x120xbf16>
    %54 = vector.shape_cast %53 : vector<1x28x120xbf16> to vector<28x120xbf16>
    %55 = arith.truncf %52 : vector<192x28xf32> to vector<192x28xbf16>
    %cst_34 = arith.constant dense<0.000000e+00> : vector<192x120xf32>
    %56 = tpu.matmul %55, %54, %cst_34 {dimension_numbers = #tpu.dot_dimension_numbers<[1], [0], [0], [1], [0, 0, 1, 1], [], []>} : vector<192x28xbf16>, vector<28x120xbf16>, vector<192x120xf32> -> vector<192x120xf32>
    %57 = arith.addf %45, %56 : vector<192x120xf32>
    %c4_35 = arith.constant 4 : index
    %c0_36 = arith.constant 0 : index
    %c0_37 = arith.constant 0 : index
    %58 = vector.load %arg3[%c4_35, %c0_36, %c0_37] : memref<5x28x120xbf16, #tpu.memory_space<vmem>>, vector<1x28x120xbf16>
    %59 = vector.shape_cast %58 : vector<1x28x120xbf16> to vector<28x120xbf16>
    %60 = arith.truncf %52 : vector<192x28xf32> to vector<192x28xbf16>
    %cst_38 = arith.constant dense<0.000000e+00> : vector<192x120xf32>
    %61 = tpu.matmul %60, %59, %cst_38 {dimension_numbers = #tpu.dot_dimension_numbers<[1], [0], [0], [1], [0, 0, 1, 1], [], []>} : vector<192x28xbf16>, vector<28x120xbf16>, vector<192x120xf32> -> vector<192x120xf32>
    %62 = arith.addf %50, %61 : vector<192x120xf32>
    %63 = arith.maximumf %57, %62 : vector<192x120xf32>
    %c0_39 = arith.constant 0 : index
    %c0_40 = arith.constant 0 : index
    %64 = vector.load %arg4[%c0_39, %c0_40] : memref<1x120xf32, #tpu.memory_space<vmem>>, vector<1x120xf32>
    %65 = vector.broadcast %64 : vector<1x120xf32> to vector<192x120xf32>
    %66 = arith.addf %63, %65 : vector<192x120xf32>
    %c0_41 = arith.constant 0 : index
    %c0_42 = arith.constant 0 : index
    %67 = vector.load %arg5[%c0_41, %c0_42] : memref<96x192xbf16, #tpu.memory_space<vmem>>, vector<96x192xbf16>
    %68 = arith.truncf %66 : vector<192x120xf32> to vector<192x120xbf16>
    %cst_43 = arith.constant dense<0.000000e+00> : vector<96x120xf32>
    %69 = tpu.matmul %67, %68, %cst_43 {dimension_numbers = #tpu.dot_dimension_numbers<[1], [0], [0], [1], [0, 0, 1, 1], [], []>} : vector<96x192xbf16>, vector<192x120xbf16>, vector<96x120xf32> -> vector<96x120xf32>
    %c0_44 = arith.constant 0 : index
    %c0_45 = arith.constant 0 : index
    %70 = vector.load %arg6[%c0_44, %c0_45] : memref<96x192xbf16, #tpu.memory_space<vmem>>, vector<96x192xbf16>
    %71 = arith.truncf %66 : vector<192x120xf32> to vector<192x120xbf16>
    %cst_46 = arith.constant dense<0.000000e+00> : vector<96x120xf32>
    %72 = tpu.matmul %70, %71, %cst_46 {dimension_numbers = #tpu.dot_dimension_numbers<[1], [0], [0], [1], [0, 0, 1, 1], [], []>} : vector<96x192xbf16>, vector<192x120xbf16>, vector<96x120xf32> -> vector<96x120xf32>
    %73 = arith.maximumf %69, %72 : vector<96x120xf32>
    %cst_47 = arith.constant 0.000000e+00 : f32
    %74 = vector.broadcast %cst_47 : f32 to vector<96x120xf32>
    %75 = arith.maximumf %73, %74 : vector<96x120xf32>
    %76 = arith.truncf %75 : vector<96x120xf32> to vector<96x120xbf16>
    %cst_48 = arith.constant 0.000000e+00 : f32
    %77 = vector.broadcast %cst_48 : f32 to vector<64x80xf32>
    %cst_49 = arith.constant 0.000000e+00 : f32
    %78 = vector.broadcast %cst_49 : f32 to vector<64x80xf32>
    %c0_50 = arith.constant 0 : index
    %c0_51 = arith.constant 0 : index
    %c0_52 = arith.constant 0 : index
    %79 = vector.load %arg7[%c0_50, %c0_51, %c0_52] : memref<5x64x96xbf16, #tpu.memory_space<vmem>>, vector<1x64x96xbf16>
    %80 = vector.shape_cast %79 : vector<1x64x96xbf16> to vector<64x96xbf16>
    %cst_53 = arith.constant dense<0.000000e+00> : vector<64x120xf32>
    %81 = tpu.matmul %80, %76, %cst_53 {dimension_numbers = #tpu.dot_dimension_numbers<[1], [0], [0], [1], [0, 0, 1, 1], [], []>} : vector<64x96xbf16>, vector<96x120xbf16>, vector<64x120xf32> -> vector<64x120xf32>
    %c0_54 = arith.constant 0 : index
    %c0_55 = arith.constant 0 : index
    %c0_56 = arith.constant 0 : index
    %82 = vector.load %arg8[%c0_54, %c0_55, %c0_56] : memref<5x120x80xbf16, #tpu.memory_space<vmem>>, vector<1x120x80xbf16>
    %83 = vector.shape_cast %82 : vector<1x120x80xbf16> to vector<120x80xbf16>
    %84 = arith.truncf %81 : vector<64x120xf32> to vector<64x120xbf16>
    %cst_57 = arith.constant dense<0.000000e+00> : vector<64x80xf32>
    %85 = tpu.matmul %84, %83, %cst_57 {dimension_numbers = #tpu.dot_dimension_numbers<[1], [0], [0], [1], [0, 0, 1, 1], [], []>} : vector<64x120xbf16>, vector<120x80xbf16>, vector<64x80xf32> -> vector<64x80xf32>
    %86 = arith.addf %77, %85 : vector<64x80xf32>
    %c0_58 = arith.constant 0 : index
    %c0_59 = arith.constant 0 : index
    %c0_60 = arith.constant 0 : index
    %87 = vector.load %arg9[%c0_58, %c0_59, %c0_60] : memref<5x120x80xbf16, #tpu.memory_space<vmem>>, vector<1x120x80xbf16>
    %88 = vector.shape_cast %87 : vector<1x120x80xbf16> to vector<120x80xbf16>
    %89 = arith.truncf %81 : vector<64x120xf32> to vector<64x120xbf16>
    %cst_61 = arith.constant dense<0.000000e+00> : vector<64x80xf32>
    %90 = tpu.matmul %89, %88, %cst_61 {dimension_numbers = #tpu.dot_dimension_numbers<[1], [0], [0], [1], [0, 0, 1, 1], [], []>} : vector<64x120xbf16>, vector<120x80xbf16>, vector<64x80xf32> -> vector<64x80xf32>
    %91 = arith.addf %78, %90 : vector<64x80xf32>
    %c1_62 = arith.constant 1 : index
    %c0_63 = arith.constant 0 : index
    %c0_64 = arith.constant 0 : index
    %92 = vector.load %arg7[%c1_62, %c0_63, %c0_64] : memref<5x64x96xbf16, #tpu.memory_space<vmem>>, vector<1x64x96xbf16>
    %93 = vector.shape_cast %92 : vector<1x64x96xbf16> to vector<64x96xbf16>
    %cst_65 = arith.constant dense<0.000000e+00> : vector<64x120xf32>
    %94 = tpu.matmul %93, %76, %cst_65 {dimension_numbers = #tpu.dot_dimension_numbers<[1], [0], [0], [1], [0, 0, 1, 1], [], []>} : vector<64x96xbf16>, vector<96x120xbf16>, vector<64x120xf32> -> vector<64x120xf32>
    %c1_66 = arith.constant 1 : index
    %c0_67 = arith.constant 0 : index
    %c0_68 = arith.constant 0 : index
    %95 = vector.load %arg8[%c1_66, %c0_67, %c0_68] : memref<5x120x80xbf16, #tpu.memory_space<vmem>>, vector<1x120x80xbf16>
    %96 = vector.shape_cast %95 : vector<1x120x80xbf16> to vector<120x80xbf16>
    %97 = arith.truncf %94 : vector<64x120xf32> to vector<64x120xbf16>
    %cst_69 = arith.constant dense<0.000000e+00> : vector<64x80xf32>
    %98 = tpu.matmul %97, %96, %cst_69 {dimension_numbers = #tpu.dot_dimension_numbers<[1], [0], [0], [1], [0, 0, 1, 1], [], []>} : vector<64x120xbf16>, vector<120x80xbf16>, vector<64x80xf32> -> vector<64x80xf32>
    %99 = arith.addf %86, %98 : vector<64x80xf32>
    %c1_70 = arith.constant 1 : index
    %c0_71 = arith.constant 0 : index
    %c0_72 = arith.constant 0 : index
    %100 = vector.load %arg9[%c1_70, %c0_71, %c0_72] : memref<5x120x80xbf16, #tpu.memory_space<vmem>>, vector<1x120x80xbf16>
    %101 = vector.shape_cast %100 : vector<1x120x80xbf16> to vector<120x80xbf16>
    %102 = arith.truncf %94 : vector<64x120xf32> to vector<64x120xbf16>
    %cst_73 = arith.constant dense<0.000000e+00> : vector<64x80xf32>
    %103 = tpu.matmul %102, %101, %cst_73 {dimension_numbers = #tpu.dot_dimension_numbers<[1], [0], [0], [1], [0, 0, 1, 1], [], []>} : vector<64x120xbf16>, vector<120x80xbf16>, vector<64x80xf32> -> vector<64x80xf32>
    %104 = arith.addf %91, %103 : vector<64x80xf32>
    %c2_74 = arith.constant 2 : index
    %c0_75 = arith.constant 0 : index
    %c0_76 = arith.constant 0 : index
    %105 = vector.load %arg7[%c2_74, %c0_75, %c0_76] : memref<5x64x96xbf16, #tpu.memory_space<vmem>>, vector<1x64x96xbf16>
    %106 = vector.shape_cast %105 : vector<1x64x96xbf16> to vector<64x96xbf16>
    %cst_77 = arith.constant dense<0.000000e+00> : vector<64x120xf32>
    %107 = tpu.matmul %106, %76, %cst_77 {dimension_numbers = #tpu.dot_dimension_numbers<[1], [0], [0], [1], [0, 0, 1, 1], [], []>} : vector<64x96xbf16>, vector<96x120xbf16>, vector<64x120xf32> -> vector<64x120xf32>
    %c2_78 = arith.constant 2 : index
    %c0_79 = arith.constant 0 : index
    %c0_80 = arith.constant 0 : index
    %108 = vector.load %arg8[%c2_78, %c0_79, %c0_80] : memref<5x120x80xbf16, #tpu.memory_space<vmem>>, vector<1x120x80xbf16>
    %109 = vector.shape_cast %108 : vector<1x120x80xbf16> to vector<120x80xbf16>
    %110 = arith.truncf %107 : vector<64x120xf32> to vector<64x120xbf16>
    %cst_81 = arith.constant dense<0.000000e+00> : vector<64x80xf32>
    %111 = tpu.matmul %110, %109, %cst_81 {dimension_numbers = #tpu.dot_dimension_numbers<[1], [0], [0], [1], [0, 0, 1, 1], [], []>} : vector<64x120xbf16>, vector<120x80xbf16>, vector<64x80xf32> -> vector<64x80xf32>
    %112 = arith.addf %99, %111 : vector<64x80xf32>
    %c2_82 = arith.constant 2 : index
    %c0_83 = arith.constant 0 : index
    %c0_84 = arith.constant 0 : index
    %113 = vector.load %arg9[%c2_82, %c0_83, %c0_84] : memref<5x120x80xbf16, #tpu.memory_space<vmem>>, vector<1x120x80xbf16>
    %114 = vector.shape_cast %113 : vector<1x120x80xbf16> to vector<120x80xbf16>
    %115 = arith.truncf %107 : vector<64x120xf32> to vector<64x120xbf16>
    %cst_85 = arith.constant dense<0.000000e+00> : vector<64x80xf32>
    %116 = tpu.matmul %115, %114, %cst_85 {dimension_numbers = #tpu.dot_dimension_numbers<[1], [0], [0], [1], [0, 0, 1, 1], [], []>} : vector<64x120xbf16>, vector<120x80xbf16>, vector<64x80xf32> -> vector<64x80xf32>
    %117 = arith.addf %104, %116 : vector<64x80xf32>
    %c3_86 = arith.constant 3 : index
    %c0_87 = arith.constant 0 : index
    %c0_88 = arith.constant 0 : index
    %118 = vector.load %arg7[%c3_86, %c0_87, %c0_88] : memref<5x64x96xbf16, #tpu.memory_space<vmem>>, vector<1x64x96xbf16>
    %119 = vector.shape_cast %118 : vector<1x64x96xbf16> to vector<64x96xbf16>
    %cst_89 = arith.constant dense<0.000000e+00> : vector<64x120xf32>
    %120 = tpu.matmul %119, %76, %cst_89 {dimension_numbers = #tpu.dot_dimension_numbers<[1], [0], [0], [1], [0, 0, 1, 1], [], []>} : vector<64x96xbf16>, vector<96x120xbf16>, vector<64x120xf32> -> vector<64x120xf32>
    %c3_90 = arith.constant 3 : index
    %c0_91 = arith.constant 0 : index
    %c0_92 = arith.constant 0 : index
    %121 = vector.load %arg8[%c3_90, %c0_91, %c0_92] : memref<5x120x80xbf16, #tpu.memory_space<vmem>>, vector<1x120x80xbf16>
    %122 = vector.shape_cast %121 : vector<1x120x80xbf16> to vector<120x80xbf16>
    %123 = arith.truncf %120 : vector<64x120xf32> to vector<64x120xbf16>
    %cst_93 = arith.constant dense<0.000000e+00> : vector<64x80xf32>
    %124 = tpu.matmul %123, %122, %cst_93 {dimension_numbers = #tpu.dot_dimension_numbers<[1], [0], [0], [1], [0, 0, 1, 1], [], []>} : vector<64x120xbf16>, vector<120x80xbf16>, vector<64x80xf32> -> vector<64x80xf32>
    %125 = arith.addf %112, %124 : vector<64x80xf32>
    %c3_94 = arith.constant 3 : index
    %c0_95 = arith.constant 0 : index
    %c0_96 = arith.constant 0 : index
    %126 = vector.load %arg9[%c3_94, %c0_95, %c0_96] : memref<5x120x80xbf16, #tpu.memory_space<vmem>>, vector<1x120x80xbf16>
    %127 = vector.shape_cast %126 : vector<1x120x80xbf16> to vector<120x80xbf16>
    %128 = arith.truncf %120 : vector<64x120xf32> to vector<64x120xbf16>
    %cst_97 = arith.constant dense<0.000000e+00> : vector<64x80xf32>
    %129 = tpu.matmul %128, %127, %cst_97 {dimension_numbers = #tpu.dot_dimension_numbers<[1], [0], [0], [1], [0, 0, 1, 1], [], []>} : vector<64x120xbf16>, vector<120x80xbf16>, vector<64x80xf32> -> vector<64x80xf32>
    %130 = arith.addf %117, %129 : vector<64x80xf32>
    %c4_98 = arith.constant 4 : index
    %c0_99 = arith.constant 0 : index
    %c0_100 = arith.constant 0 : index
    %131 = vector.load %arg7[%c4_98, %c0_99, %c0_100] : memref<5x64x96xbf16, #tpu.memory_space<vmem>>, vector<1x64x96xbf16>
    %132 = vector.shape_cast %131 : vector<1x64x96xbf16> to vector<64x96xbf16>
    %cst_101 = arith.constant dense<0.000000e+00> : vector<64x120xf32>
    %133 = tpu.matmul %132, %76, %cst_101 {dimension_numbers = #tpu.dot_dimension_numbers<[1], [0], [0], [1], [0, 0, 1, 1], [], []>} : vector<64x96xbf16>, vector<96x120xbf16>, vector<64x120xf32> -> vector<64x120xf32>
    %c4_102 = arith.constant 4 : index
    %c0_103 = arith.constant 0 : index
    %c0_104 = arith.constant 0 : index
    %134 = vector.load %arg8[%c4_102, %c0_103, %c0_104] : memref<5x120x80xbf16, #tpu.memory_space<vmem>>, vector<1x120x80xbf16>
    %135 = vector.shape_cast %134 : vector<1x120x80xbf16> to vector<120x80xbf16>
    %136 = arith.truncf %133 : vector<64x120xf32> to vector<64x120xbf16>
    %cst_105 = arith.constant dense<0.000000e+00> : vector<64x80xf32>
    %137 = tpu.matmul %136, %135, %cst_105 {dimension_numbers = #tpu.dot_dimension_numbers<[1], [0], [0], [1], [0, 0, 1, 1], [], []>} : vector<64x120xbf16>, vector<120x80xbf16>, vector<64x80xf32> -> vector<64x80xf32>
    %138 = arith.addf %125, %137 : vector<64x80xf32>
    %c4_106 = arith.constant 4 : index
    %c0_107 = arith.constant 0 : index
    %c0_108 = arith.constant 0 : index
    %139 = vector.load %arg9[%c4_106, %c0_107, %c0_108] : memref<5x120x80xbf16, #tpu.memory_space<vmem>>, vector<1x120x80xbf16>
    %140 = vector.shape_cast %139 : vector<1x120x80xbf16> to vector<120x80xbf16>
    %141 = arith.truncf %133 : vector<64x120xf32> to vector<64x120xbf16>
    %cst_109 = arith.constant dense<0.000000e+00> : vector<64x80xf32>
    %142 = tpu.matmul %141, %140, %cst_109 {dimension_numbers = #tpu.dot_dimension_numbers<[1], [0], [0], [1], [0, 0, 1, 1], [], []>} : vector<64x120xbf16>, vector<120x80xbf16>, vector<64x80xf32> -> vector<64x80xf32>
    %143 = arith.addf %130, %142 : vector<64x80xf32>
    %144 = arith.maximumf %138, %143 : vector<64x80xf32>
    %c0_110 = arith.constant 0 : index
    %c0_111 = arith.constant 0 : index
    %145 = vector.load %arg10[%c0_110, %c0_111] : memref<1x80xf32, #tpu.memory_space<vmem>>, vector<1x80xf32>
    %146 = vector.broadcast %145 : vector<1x80xf32> to vector<64x80xf32>
    %147 = arith.addf %144, %146 : vector<64x80xf32>
    %c0_112 = arith.constant 0 : index
    %c0_113 = arith.constant 0 : index
    %148 = vector.load %arg11[%c0_112, %c0_113] : memref<32x64xbf16, #tpu.memory_space<vmem>>, vector<32x64xbf16>
    %149 = arith.truncf %147 : vector<64x80xf32> to vector<64x80xbf16>
    %cst_114 = arith.constant dense<0.000000e+00> : vector<32x80xf32>
    %150 = tpu.matmul %148, %149, %cst_114 {dimension_numbers = #tpu.dot_dimension_numbers<[1], [0], [0], [1], [0, 0, 1, 1], [], []>} : vector<32x64xbf16>, vector<64x80xbf16>, vector<32x80xf32> -> vector<32x80xf32>
    %c0_115 = arith.constant 0 : index
    %c0_116 = arith.constant 0 : index
    %151 = vector.load %arg12[%c0_115, %c0_116] : memref<32x64xbf16, #tpu.memory_space<vmem>>, vector<32x64xbf16>
    %152 = arith.truncf %147 : vector<64x80xf32> to vector<64x80xbf16>
    %cst_117 = arith.constant dense<0.000000e+00> : vector<32x80xf32>
    %153 = tpu.matmul %151, %152, %cst_117 {dimension_numbers = #tpu.dot_dimension_numbers<[1], [0], [0], [1], [0, 0, 1, 1], [], []>} : vector<32x64xbf16>, vector<64x80xbf16>, vector<32x80xf32> -> vector<32x80xf32>
    %154 = arith.maximumf %150, %153 : vector<32x80xf32>
    %cst_118 = arith.constant 0.000000e+00 : f32
    %155 = vector.broadcast %cst_118 : f32 to vector<32x80xf32>
    %156 = arith.maximumf %154, %155 : vector<32x80xf32>
    %157 = arith.truncf %156 : vector<32x80xf32> to vector<32x80xbf16>
    %cst_119 = arith.constant 0.000000e+00 : f32
    %158 = vector.broadcast %cst_119 : f32 to vector<8x50xf32>
    %c0_120 = arith.constant 0 : index
    %c0_121 = arith.constant 0 : index
    %c0_122 = arith.constant 0 : index
    %159 = vector.load %arg13[%c0_120, %c0_121, %c0_122] : memref<4x8x32xbf16, #tpu.memory_space<vmem>>, vector<1x8x32xbf16>
    %160 = vector.shape_cast %159 : vector<1x8x32xbf16> to vector<8x32xbf16>
    %cst_123 = arith.constant dense<0.000000e+00> : vector<8x80xf32>
    %161 = tpu.matmul %160, %157, %cst_123 {dimension_numbers = #tpu.dot_dimension_numbers<[1], [0], [0], [1], [0, 0, 1, 1], [], []>} : vector<8x32xbf16>, vector<32x80xbf16>, vector<8x80xf32> -> vector<8x80xf32>
    %c0_124 = arith.constant 0 : index
    %c0_125 = arith.constant 0 : index
    %c0_126 = arith.constant 0 : index
    %162 = vector.load %arg14[%c0_124, %c0_125, %c0_126] : memref<4x80x50xbf16, #tpu.memory_space<vmem>>, vector<1x80x50xbf16>
    %163 = vector.shape_cast %162 : vector<1x80x50xbf16> to vector<80x50xbf16>
    %164 = arith.truncf %161 : vector<8x80xf32> to vector<8x80xbf16>
    %cst_127 = arith.constant dense<0.000000e+00> : vector<8x50xf32>
    %165 = tpu.matmul %164, %163, %cst_127 {dimension_numbers = #tpu.dot_dimension_numbers<[1], [0], [0], [1], [0, 0, 1, 1], [], []>} : vector<8x80xbf16>, vector<80x50xbf16>, vector<8x50xf32> -> vector<8x50xf32>
    %166 = arith.addf %158, %165 : vector<8x50xf32>
    %c1_128 = arith.constant 1 : index
    %c0_129 = arith.constant 0 : index
    %c0_130 = arith.constant 0 : index
    %167 = vector.load %arg13[%c1_128, %c0_129, %c0_130] : memref<4x8x32xbf16, #tpu.memory_space<vmem>>, vector<1x8x32xbf16>
    %168 = vector.shape_cast %167 : vector<1x8x32xbf16> to vector<8x32xbf16>
    %cst_131 = arith.constant dense<0.000000e+00> : vector<8x80xf32>
    %169 = tpu.matmul %168, %157, %cst_131 {dimension_numbers = #tpu.dot_dimension_numbers<[1], [0], [0], [1], [0, 0, 1, 1], [], []>} : vector<8x32xbf16>, vector<32x80xbf16>, vector<8x80xf32> -> vector<8x80xf32>
    %c1_132 = arith.constant 1 : index
    %c0_133 = arith.constant 0 : index
    %c0_134 = arith.constant 0 : index
    %170 = vector.load %arg14[%c1_132, %c0_133, %c0_134] : memref<4x80x50xbf16, #tpu.memory_space<vmem>>, vector<1x80x50xbf16>
    %171 = vector.shape_cast %170 : vector<1x80x50xbf16> to vector<80x50xbf16>
    %172 = arith.truncf %169 : vector<8x80xf32> to vector<8x80xbf16>
    %cst_135 = arith.constant dense<0.000000e+00> : vector<8x50xf32>
    %173 = tpu.matmul %172, %171, %cst_135 {dimension_numbers = #tpu.dot_dimension_numbers<[1], [0], [0], [1], [0, 0, 1, 1], [], []>} : vector<8x80xbf16>, vector<80x50xbf16>, vector<8x50xf32> -> vector<8x50xf32>
    %174 = arith.addf %166, %173 : vector<8x50xf32>
    %c2_136 = arith.constant 2 : index
    %c0_137 = arith.constant 0 : index
    %c0_138 = arith.constant 0 : index
    %175 = vector.load %arg13[%c2_136, %c0_137, %c0_138] : memref<4x8x32xbf16, #tpu.memory_space<vmem>>, vector<1x8x32xbf16>
    %176 = vector.shape_cast %175 : vector<1x8x32xbf16> to vector<8x32xbf16>
    %cst_139 = arith.constant dense<0.000000e+00> : vector<8x80xf32>
    %177 = tpu.matmul %176, %157, %cst_139 {dimension_numbers = #tpu.dot_dimension_numbers<[1], [0], [0], [1], [0, 0, 1, 1], [], []>} : vector<8x32xbf16>, vector<32x80xbf16>, vector<8x80xf32> -> vector<8x80xf32>
    %c2_140 = arith.constant 2 : index
    %c0_141 = arith.constant 0 : index
    %c0_142 = arith.constant 0 : index
    %178 = vector.load %arg14[%c2_140, %c0_141, %c0_142] : memref<4x80x50xbf16, #tpu.memory_space<vmem>>, vector<1x80x50xbf16>
    %179 = vector.shape_cast %178 : vector<1x80x50xbf16> to vector<80x50xbf16>
    %180 = arith.truncf %177 : vector<8x80xf32> to vector<8x80xbf16>
    %cst_143 = arith.constant dense<0.000000e+00> : vector<8x50xf32>
    %181 = tpu.matmul %180, %179, %cst_143 {dimension_numbers = #tpu.dot_dimension_numbers<[1], [0], [0], [1], [0, 0, 1, 1], [], []>} : vector<8x80xbf16>, vector<80x50xbf16>, vector<8x50xf32> -> vector<8x50xf32>
    %182 = arith.addf %174, %181 : vector<8x50xf32>
    %c3_144 = arith.constant 3 : index
    %c0_145 = arith.constant 0 : index
    %c0_146 = arith.constant 0 : index
    %183 = vector.load %arg13[%c3_144, %c0_145, %c0_146] : memref<4x8x32xbf16, #tpu.memory_space<vmem>>, vector<1x8x32xbf16>
    %184 = vector.shape_cast %183 : vector<1x8x32xbf16> to vector<8x32xbf16>
    %cst_147 = arith.constant dense<0.000000e+00> : vector<8x80xf32>
    %185 = tpu.matmul %184, %157, %cst_147 {dimension_numbers = #tpu.dot_dimension_numbers<[1], [0], [0], [1], [0, 0, 1, 1], [], []>} : vector<8x32xbf16>, vector<32x80xbf16>, vector<8x80xf32> -> vector<8x80xf32>
    %c3_148 = arith.constant 3 : index
    %c0_149 = arith.constant 0 : index
    %c0_150 = arith.constant 0 : index
    %186 = vector.load %arg14[%c3_148, %c0_149, %c0_150] : memref<4x80x50xbf16, #tpu.memory_space<vmem>>, vector<1x80x50xbf16>
    %187 = vector.shape_cast %186 : vector<1x80x50xbf16> to vector<80x50xbf16>
    %188 = arith.truncf %185 : vector<8x80xf32> to vector<8x80xbf16>
    %cst_151 = arith.constant dense<0.000000e+00> : vector<8x50xf32>
    %189 = tpu.matmul %188, %187, %cst_151 {dimension_numbers = #tpu.dot_dimension_numbers<[1], [0], [0], [1], [0, 0, 1, 1], [], []>} : vector<8x80xbf16>, vector<80x50xbf16>, vector<8x50xf32> -> vector<8x50xf32>
    %190 = arith.addf %182, %189 : vector<8x50xf32>
    %c0_152 = arith.constant 0 : index
    %c0_153 = arith.constant 0 : index
    %191 = vector.load %arg15[%c0_152, %c0_153] : memref<1x50xf32, #tpu.memory_space<vmem>>, vector<1x50xf32>
    %192 = vector.broadcast %191 : vector<1x50xf32> to vector<8x50xf32>
    %193 = arith.addf %190, %192 : vector<8x50xf32>
    %cst_154 = arith.constant 0.000000e+00 : f32
    %194 = vector.broadcast %cst_154 : f32 to vector<8x50xf32>
    %195 = arith.maximumf %193, %194 : vector<8x50xf32>
    %c0_155 = arith.constant 0 : index
    %c0_156 = arith.constant 0 : index
    %196 = vector.load %arg16[%c0_155, %c0_156] : memref<50x10xbf16, #tpu.memory_space<vmem>>, vector<50x10xbf16>
    %197 = arith.truncf %195 : vector<8x50xf32> to vector<8x50xbf16>
    %cst_157 = arith.constant dense<0.000000e+00> : vector<8x10xf32>
    %198 = tpu.matmul %197, %196, %cst_157 {dimension_numbers = #tpu.dot_dimension_numbers<[1], [0], [0], [1], [0, 0, 1, 1], [], []>} : vector<8x50xbf16>, vector<50x10xbf16>, vector<8x10xf32> -> vector<8x10xf32>
    %c0_158 = arith.constant 0 : index
    %c0_159 = arith.constant 0 : index
    %199 = vector.load %arg17[%c0_158, %c0_159] : memref<1x10xf32, #tpu.memory_space<vmem>>, vector<1x10xf32>
    %200 = vector.broadcast %199 : vector<1x10xf32> to vector<8x10xf32>
    %201 = arith.addf %198, %200 : vector<8x10xf32>
    %cst_160 = arith.constant dense<0xFF800000> : vector<8xf32>
    %202 = vector.multi_reduction <maximumf>, %201, %cst_160 [1] : vector<8x10xf32> to vector<8xf32>
    %203 = vector.shape_cast %202 : vector<8xf32> to vector<8x1xf32>
    %204 = vector.broadcast %203 : vector<8x1xf32> to vector<8x10xf32>
    %205 = arith.subf %201, %204 : vector<8x10xf32>
    %206 = math.exp %205 : vector<8x10xf32>
    %cst_161 = arith.constant dense<0.000000e+00> : vector<8xf32>
    %207 = vector.multi_reduction <add>, %206, %cst_161 [1] : vector<8x10xf32> to vector<8xf32>
    %208 = vector.shape_cast %207 : vector<8xf32> to vector<8x1xf32>
    %209 = math.log %208 : vector<8x1xf32>
    %210 = vector.broadcast %209 : vector<8x1xf32> to vector<8x10xf32>
    %211 = arith.subf %205, %210 : vector<8x10xf32>
    %c0_162 = arith.constant 0 : index
    %c0_163 = arith.constant 0 : index
    %212 = vector.load %arg18[%c0_162, %c0_163] : memref<8x10xf32, #tpu.memory_space<vmem>>, vector<8x10xf32>
    tpu.vector_store %arg18[%c0_162, %c0_163], %211 {strides = array<i32>} : memref<8x10xf32, #tpu.memory_space<vmem>>, vector<8x10xf32>,
    return
  }
  func.func @transform_0(%arg0: i32) -> (i32, i32, i32) {
    %c0_i32 = arith.constant 0 : i32
    %c0_i32_0 = arith.constant 0 : i32
    %c0_i32_1 = arith.constant 0 : i32
    return %arg0, %c0_i32, %c0_i32_0 : i32, i32, i32
  }
  func.func @transform_1(%arg0: i32) -> (i32, i32, i32) {
    %c0_i32 = arith.constant 0 : i32
    %c0_i32_0 = arith.constant 0 : i32
    %c0_i32_1 = arith.constant 0 : i32
    %c0_i32_2 = arith.constant 0 : i32
    return %c0_i32, %c0_i32_0, %c0_i32_1 : i32, i32, i32
  }
  func.func @transform_2(%arg0: i32) -> (i32, i32, i32) {
    %c0_i32 = arith.constant 0 : i32
    %c0_i32_0 = arith.constant 0 : i32
    %c0_i32_1 = arith.constant 0 : i32
    %c0_i32_2 = arith.constant 0 : i32
    return %c0_i32, %c0_i32_0, %c0_i32_1 : i32, i32, i32
  }
  func.func @transform_3(%arg0: i32) -> (i32, i32) {
    %c0_i32 = arith.constant 0 : i32
    %c0_i32_0 = arith.constant 0 : i32
    %c0_i32_1 = arith.constant 0 : i32
    return %c0_i32, %c0_i32_0 : i32, i32
  }
  func.func @transform_4(%arg0: i32) -> (i32, i32) {
    %c0_i32 = arith.constant 0 : i32
    %c0_i32_0 = arith.constant 0 : i32
    %c0_i32_1 = arith.constant 0 : i32
    return %c0_i32, %c0_i32_0 : i32, i32
  }
  func.func @transform_5(%arg0: i32) -> (i32, i32) {
    %c0_i32 = arith.constant 0 : i32
    %c0_i32_0 = arith.constant 0 : i32
    %c0_i32_1 = arith.constant 0 : i32
    return %c0_i32, %c0_i32_0 : i32, i32
  }
  func.func @transform_6(%arg0: i32) -> (i32, i32, i32) {
    %c0_i32 = arith.constant 0 : i32
    %c0_i32_0 = arith.constant 0 : i32
    %c0_i32_1 = arith.constant 0 : i32
    %c0_i32_2 = arith.constant 0 : i32
    return %c0_i32, %c0_i32_0, %c0_i32_1 : i32, i32, i32
  }
  func.func @transform_7(%arg0: i32) -> (i32, i32, i32) {
    %c0_i32 = arith.constant 0 : i32
    %c0_i32_0 = arith.constant 0 : i32
    %c0_i32_1 = arith.constant 0 : i32
    %c0_i32_2 = arith.constant 0 : i32
    return %c0_i32, %c0_i32_0, %c0_i32_1 : i32, i32, i32
  }
  func.func @transform_8(%arg0: i32) -> (i32, i32, i32) {
    %c0_i32 = arith.constant 0 : i32
    %c0_i32_0 = arith.constant 0 : i32
    %c0_i32_1 = arith.constant 0 : i32
    %c0_i32_2 = arith.constant 0 : i32
    return %c0_i32, %c0_i32_0, %c0_i32_1 : i32, i32, i32
  }
  func.func @transform_9(%arg0: i32) -> (i32, i32) {
    %c0_i32 = arith.constant 0 : i32
    %c0_i32_0 = arith.constant 0 : i32
    %c0_i32_1 = arith.constant 0 : i32
    return %c0_i32, %c0_i32_0 : i32, i32
  }
  func.func @transform_10(%arg0: i32) -> (i32, i32) {
    %c0_i32 = arith.constant 0 : i32
    %c0_i32_0 = arith.constant 0 : i32
    %c0_i32_1 = arith.constant 0 : i32
    return %c0_i32, %c0_i32_0 : i32, i32
  }
  func.func @transform_11(%arg0: i32) -> (i32, i32) {
    %c0_i32 = arith.constant 0 : i32
    %c0_i32_0 = arith.constant 0 : i32
    %c0_i32_1 = arith.constant 0 : i32
    return %c0_i32, %c0_i32_0 : i32, i32
  }
  func.func @transform_12(%arg0: i32) -> (i32, i32, i32) {
    %c0_i32 = arith.constant 0 : i32
    %c0_i32_0 = arith.constant 0 : i32
    %c0_i32_1 = arith.constant 0 : i32
    %c0_i32_2 = arith.constant 0 : i32
    return %c0_i32, %c0_i32_0, %c0_i32_1 : i32, i32, i32
  }
  func.func @transform_13(%arg0: i32) -> (i32, i32, i32) {
    %c0_i32 = arith.constant 0 : i32
    %c0_i32_0 = arith.constant 0 : i32
    %c0_i32_1 = arith.constant 0 : i32
    %c0_i32_2 = arith.constant 0 : i32
    return %c0_i32, %c0_i32_0, %c0_i32_1 : i32, i32, i32
  }
  func.func @transform_14(%arg0: i32) -> (i32, i32) {
    %c0_i32 = arith.constant 0 : i32
    %c0_i32_0 = arith.constant 0 : i32
    %c0_i32_1 = arith.constant 0 : i32
    return %c0_i32, %c0_i32_0 : i32, i32
  }
  func.func @transform_15(%arg0: i32) -> (i32, i32) {
    %c0_i32 = arith.constant 0 : i32
    %c0_i32_0 = arith.constant 0 : i32
    %c0_i32_1 = arith.constant 0 : i32
    return %c0_i32, %c0_i32_0 : i32, i32
  }
  func.func @transform_16(%arg0: i32) -> (i32, i32) {
    %c0_i32 = arith.constant 0 : i32
    %c0_i32_0 = arith.constant 0 : i32
    %c0_i32_1 = arith.constant 0 : i32
    return %c0_i32, %c0_i32_0 : i32, i32
  }
  func.func @transform_17(%arg0: i32) -> (i32, i32) {
    %c0_i32 = arith.constant 0 : i32
    %c0_i32_0 = arith.constant 0 : i32
    return %arg0, %c0_i32 : i32, i32
  }
}

</mosaic_0001>

<bundles_post_ra>
// kernel: tile.13
= control target key start
LH: loop header
LB: loop body
LE: loop exit
PB: predicated region body
PF: predicated region fallthrough
CT: control target
= control target key end

     0   :  { %s28_s0 = inlined_call_operand.vmem [shape: f32[10], index: 0, kind: input, shape index: {}]   ;;  %s29_s1 = inlined_call_operand.vmem [shape: f32[12,10], index: 1, kind: output, shape index: {}]  }
   0x1   :  { %v4_v0 = vld [vmem:[%s28_s0] ss:$0 sm:$0xff] }
   0x2   :  { %5 = vst [vmem:[%s29_s1] sm:$0xff] %v4_v0 }
   0x3   :  { %8 = vst [vmem:[%s29_s1 + $0x8] sm:$0xff] %v4_v0 }

// kernel: tile.14
= control target key start
LH: loop header
LB: loop body
LE: loop exit
PB: predicated region body
PF: predicated region fallthrough
CT: control target
= control target key end

     0   :  { %s99_s10 = smov 110   ;;  %s100_s11 = smov 90   ;;  %vm3_vm0 = vcmask 80896   ;;  %vm9_vm1 = vcmask 982896   ;;  %vm15_vm2 = vcmask 900896   ;;  %vm21_vm3 = vcmask 818896   ;;  %s159_s0 = inlined_call_operand.vmem [shape: f32[12,10], index: 0, kind: input, shape index: {}]   ;;  %s160_s1 = inlined_call_operand.vmem [shape: f32[1,120], index: 1, kind: output, shape index: {}]  }
   0x1   :  { %v77_v0 = vld [vmem:[%s159_s0 + $0xb] sm:$0x1]   ;;  %v79_v1 = vld [vmem:[%s159_s0 + $0x9] sm:$0x1]   ;;  %v81_v2 = vld [vmem:[%s159_s0 + $0x7] sm:$0x1]  }
   0x2   :  { %7 = vrot.lane.b32.xlu0 %v77_v0, %s99_s10  ;;  %19 = vrot.lane.b32.xlu1 %v79_v1, %s100_s11  ;;  %s101_s14 = smov 70   ;;  %v78_v3 = vld [vmem:[%s159_s0 + $0xa] sm:$0x1]   ;;  %v80_v4 = vld [vmem:[%s159_s0 + $0x8] sm:$0x1]   ;;  %s102_s19 = smov 100  }
   0x3   :  { %31 = vrot.lane.b32.xlu2 %v81_v2, %s101_s14  ;;  %s103_s20 = smov 80   ;;  %v82_v5 = vld [vmem:[%s159_s0 + $0x6] sm:$0x1]   ;;  %s104_s23 = smov 60   ;;  %v83_v6 = vld [vmem:[%s159_s0 + $0x5] sm:$0x1]  }
   0x4   :  { %v84_v7 = vld [vmem:[%s159_s0 + $0x4] sm:$0x1]   ;;  %s105_s28 = smov 50   ;;  %s106_s29 = smov 40   ;;  %v85_v8 = vld [vmem:[%s159_s0 + $0x3] sm:$0x1]  }
   0x5   :  { %s107_s3 = smov 30   ;;  %v86_v9 = vld [vmem:[%s159_s0 + $0x2] sm:$0x1]   ;;  %v87_v10 = vld [vmem:[%s159_s0 + $0x1] sm:$0x1]   ;;  %s108_s8 = smov 20  }
   0x6   :  { %s109_s9 = smov 10   ;;  %v2_v11 = vld [vmem:[%s159_s0] sm:$0x1]   ;;  %vm27_vm4 = vcmask 736896   ;;  %vm33_vm5 = vcmask 654896   ;;  %vm39_vm6 = vcmask 572896  }
   0x7   :  { %4 = vst.msk [vmem:[#allocation0] sm:$0x1] %vm3_vm0, %v2_v11   ;;  %vm45_vm7 = vcmask 490896   ;;  %vm51_vm8 = vcmask 408896   ;;  %vm57_vm9 = vcmask 326896   ;;  %vm63_vm10 = vcmask 244896  }
   0x8   :  { %vm69_vm11 = vcmask 162896  }
   0xa   :  { %13 = vrot.lane.b32.xlu0 %v78_v3, %s102_s19  ;;  %25 = vrot.lane.b32.xlu1 %v80_v4, %s103_s20 }
   0xb   :  { %37 = vrot.lane.b32.xlu2 %v82_v5, %s104_s23 }
  0x12   :  { %43 = vrot.lane.b32.xlu0 %v83_v6, %s105_s28  ;;  %49 = vrot.lane.b32.xlu1 %v84_v7, %s106_s29 }
  0x13   :  { %55 = vrot.lane.b32.xlu2 %v85_v8, %s107_s3 }
  0x1a   :  { %61 = vrot.lane.b32.xlu0 %v86_v9, %s108_s8  ;;  %67 = vrot.lane.b32.xlu1 %v87_v10, %s109_s9 }
  0x5d   :  { %v32_v12 = vpop.permute.xlu2 %31  }
  0x65   :  { %v38_v13 = vpop.permute.xlu2 %37  }
  0x6d   :  { %v56_v14 = vpop.permute.xlu2 %55  }
  0x74   :  { %v8_v15 = vpop.permute.xlu0 %7   ;;  %v20_v16 = vpop.permute.xlu1 %19  }
  0x75   :  { %10 = vst.msk [vmem:[#allocation0] sm:$0x1] %vm9_vm1, %v8_v15  }
  0x7c   :  { %v14_v17 = vpop.permute.xlu0 %13   ;;  %v26_v18 = vpop.permute.xlu1 %25  }
  0x7d   :  { %16 = vst.msk [vmem:[#allocation0] sm:$0x1] %vm15_vm2, %v14_v17  }
  0x7e   :  { %22 = vst.msk [vmem:[#allocation0] sm:$0x1] %vm21_vm3, %v20_v16  }
  0x7f   :  { %28 = vst.msk [vmem:[#allocation0] sm:$0x1] %vm27_vm4, %v26_v18  }
  0x80   :  { %34 = vst.msk [vmem:[#allocation0] sm:$0x1] %vm33_vm5, %v32_v12  }
  0x81   :  { %40 = vst.msk [vmem:[#allocation0] sm:$0x1] %vm39_vm6, %v38_v13  }
  0x84   :  { %v44_v19 = vpop.permute.xlu0 %43   ;;  %v50_v20 = vpop.permute.xlu1 %49  }
  0x85   :  { %46 = vst.msk [vmem:[#allocation0] sm:$0x1] %vm45_vm7, %v44_v19  }
  0x86   :  { %52 = vst.msk [vmem:[#allocation0] sm:$0x1] %vm51_vm8, %v50_v20  }
  0x87   :  { %58 = vst.msk [vmem:[#allocation0] sm:$0x1] %vm57_vm9, %v56_v14  }
  0x8c   :  { %v62_v21 = vpop.permute.xlu0 %61   ;;  %v68_v22 = vpop.permute.xlu1 %67  }
  0x8d   :  { %64 = vst.msk [vmem:[#allocation0] sm:$0x1] %vm63_vm10, %v62_v21  }
  0x8e   :  { %70 = vst.msk [vmem:[#allocation0] sm:$0x1] %vm69_vm11, %v68_v22  }
  0x95   :  { %v73_v23 = vld [vmem:[#allocation0] sm:$0x1] }
  0x96   :  { %76 = vst [vmem:[%s160_s1] sm:$0x1] %v73_v23 }

// kernel: tile.18
= control target key start
LH: loop header
LB: loop body
LE: loop exit
PB: predicated region body
PF: predicated region fallthrough
CT: control target
= control target key end

     0   :  { %s22_s0 = inlined_call_operand.vmem [shape: f32[20], index: 0, kind: input, shape index: {}]   ;;  %s23_s1 = inlined_call_operand.vmem [shape: f32[4,20], index: 1, kind: output, shape index: {}]  }
   0x1   :  { %v4_v0 = vld [vmem:[%s22_s0] ss:$0 sm:$0xff] }
   0x2   :  { %5 = vst [vmem:[%s23_s1] sm:$0xf] %v4_v0 }

// kernel: tile.19
= control target key start
LH: loop header
LB: loop body
LE: loop exit
PB: predicated region body
PF: predicated region fallthrough
CT: control target
= control target key end

     0   :  { %s37_s8 = smov 20   ;;  %s38_s9 = smov 40   ;;  %vm7_vm0 = vcmask 162816   ;;  %vm13_vm1 = vcmask 654816   ;;  %vm19_vm2 = vcmask 490816   ;;  %vm25_vm3 = vcmask 326816   ;;  %s55_s0 = inlined_call_operand.vmem [shape: f32[4,20], index: 0, kind: input, shape index: {}]   ;;  %s56_s1 = inlined_call_operand.vmem [shape: f32[1,80], index: 1, kind: output, shape index: {}]  }
   0x1   :  { %v4_v0 = vld [vmem:[%s55_s0] sm:$0xf]  ;;  %s36_s0 = smov 60  }
   0x2   :  { %5 = vst [vmem:[#allocation1] sm:$0xf] %v4_v0 }
   0x9   :  { %v10_v1 = vld [vmem:[#allocation1 + $0x3] sm:$0x1]   ;;  %v22_v2 = vld [vmem:[#allocation1 + $0x1] sm:$0x1]   ;;  %v16_v3 = vld [vmem:[#allocation1 + $0x2] sm:$0x1]  }
   0xa   :  { %11 = vrot.lane.b32.xlu0 %v10_v1, %s36_s0  ;;  %23 = vrot.lane.b32.xlu1 %v22_v2, %s37_s8  ;;  %v6_v4 = vld [vmem:[#allocation1] sm:$0x1]  }
   0xb   :  { %8 = vst.msk [vmem:[#allocation0] sm:$0x1] %vm7_vm0, %v6_v4  }
  0x12   :  { %17 = vrot.lane.b32.xlu0 %v16_v3, %s38_s9 }
  0x7c   :  { %v12_v5 = vpop.permute.xlu0 %11   ;;  %v24_v6 = vpop.permute.xlu1 %23  }
  0x7d   :  { %14 = vst.msk [vmem:[#allocation0] sm:$0x1] %vm13_vm1, %v12_v5  }
  0x84   :  { %v18_v7 = vpop.permute.xlu0 %17  }
  0x85   :  { %20 = vst.msk [vmem:[#allocation0] sm:$0x1] %vm19_vm2, %v18_v7  }
  0x86   :  { %26 = vst.msk [vmem:[#allocation0] sm:$0x1] %vm25_vm3, %v24_v6  }
  0x8d   :  { %v29_v8 = vld [vmem:[#allocation0] sm:$0x1] }
  0x8e   :  { %32 = vst [vmem:[%s56_s1] sm:$0x1] %v29_v8 }

// kernel: net_forward.1
= control target key start
LH: loop header
LB: loop body
LE: loop exit
PB: predicated region body
PF: predicated region fallthrough
CT: control target
= control target key end

     0   :  { %vm287_vm0 = vcmask 1045504   ;;  %vm141_vm1 = vcmask 1046528   ;;  %vm250_vm2 = vcmask 228352   ;;  %vm1002_vm3 = vcmask 1044480   ;;  %s7407_s1 = inlined_call_operand.vmem [shape: bf16[5,28,120], index: 1, kind: input, shape index: {}]   ;;  %s7408_s2 = inlined_call_operand.vmem [shape: bf16[5,28,120], index: 2, kind: input, shape index: {}]   ;;  %s7409_s0 = inlined_call_operand.vmem [shape: f32[8,28,28], index: 0, kind: input, shape index: {}]   ;;  %s7410_s3 = inlined_call_operand.vmem [shape: f32[1,120], index: 3, kind: input, shape index: {}]   ;;  %s7411_s4 = inlined_call_operand.vmem [shape: bf16[96,192], index: 4, kind: input, shape index: {}]   ;;  %s7412_s5 = inlined_call_operand.vmem [shape: bf16[96,192], index: 5, kind: input, shape index: {}]   ;;  %s7413_s7 = inlined_call_operand.vmem [shape: bf16[5,120,80], index: 7, kind: input, shape index: {}]   ;;  %s7414_s8 = inlined_call_operand.vmem [shape: bf16[5,120,80], index: 8, kind: input, shape index: {}]   ;;  %s7415_s6 = inlined_call_operand.vmem [shape: bf16[5,64,96], index: 6, kind: input, shape index: {}]   ;;  %s7416_s9 = inlined_call_operand.vmem [shape: f32[1,80], index: 9, kind: input, shape index: {}]   ;;  %s7417_s10 = inlined_call_operand.vmem [shape: bf16[32,64], index: 10, kind: input, shape index: {}]   ;;  %s7418_s11 = inlined_call_operand.vmem [shape: bf16[32,64], index: 11, kind: input, shape index: {}]   ;;  %s7419_s13 = inlined_call_operand.vmem [shape: bf16[4,80,50], index: 13, kind: input, shape index: {}]   ;;  %s7420_s12 = inlined_call_operand.vmem [shape: bf16[4,8,32], index: 12, kind: input, shape index: {}]   ;;  %s7421_s14 = inlined_call_operand.vmem [shape: f32[1,50], index: 14, kind: input, shape index: {}]   ;;  %s7422_s15 = inlined_call_operand.vmem [shape: bf16[50,10], index: 15, kind: input, shape index: {}]   ;;  %s7423_s16 = inlined_call_operand.vmem [shape: f32[1,10], index: 16, kind: input, shape index: {}]   ;;  %s7424_s17 = inlined_call_operand.vmem [shape: f32[8,10], index: 17, kind: output, shape index: {}]  }
   0x1   :  { %7427 = sst [smem:[#allocation26_spill]] %s7407_s1  ;;  %v5420_v16 = vld [vmem:[%s7409_s0] sm:$0xff]  ;;  %v5425_v17 = vld [vmem:[%s7409_s0 + $0x8] sm:$0xff]  ;;  %v5430_v18 = vld [vmem:[%s7409_s0 + $0x10] sm:$0xff]  ;;  %vm1355_vm4 = vcmask 1043456   ;;  %vm1838_vm5 = vcmask 523264  }
   0x2   :  { %7428 = sst [smem:[#allocation27_spill]] %s7408_s2  ;;  %v142_v22 = vrot.slane %v5420_v16, 1  ;;  %v143_v23 = vrot.slane %v5425_v17, 1  ;;  %v145_v24 = vrot.slane %v5430_v18, 1  ;;  %v93_v29 = vpack.c.bf16 %v5425_v17, %v5420_v16  ;;  %v5456_v30 = vld [vmem:[%s7409_s0 + $0x18] sm:$0xf] }
   0x3   :  { %s7429_s26 = sld [smem:[#allocation26_spill]]  ;;  %v5461_v31 = vld [vmem:[%s7409_s0 + $0x20] sm:$0xff]  ;;  %v5466_v32 = vld [vmem:[%s7409_s0 + $0x28] sm:$0xff]  ;;  %v147_v33 = vrot.slane %v5456_v30, 1  ;;  %v5482_v40 = vld [vmem:[%s7409_s0 + $0x30] sm:$0xff]  ;;  %vm2155_vm6 = vcmask 785408  }
   0x4   :  { %s7430_s20 = sld [smem:[#allocation27_spill]]  ;;  %v144_v26 = vsel %vm141_vm1, %v142_v22, %v143_v23  ;;  %v146_v27 = vsel %vm141_vm1, %v143_v23, %v145_v24  ;;  %v149_v34 = vrot.slane %v5461_v31, 1  ;;  %v150_v35 = vrot.slane %v5466_v32, 1  ;;  %v5487_v41 = vld [vmem:[%s7409_s0 + $0x38] sm:$0xf]  ;;  %v5502_v48 = vld [vmem:[%s7409_s0 + $0x40] sm:$0xff] }
   0x5   :  { %v227_v28 = vpack.c.bf16 %v146_v27, %v144_v26  ;;  %v148_v36 = vsel %vm141_vm1, %v145_v24, %v147_v33  ;;  %v94_v39 = vpack.c.bf16 %v5461_v31, %v5430_v18  ;;  %v152_v42 = vrot.slane %v5482_v40, 1  ;;  %v5507_v49 = vld [vmem:[%s7409_s0 + $0x48] sm:$0xff]  ;;  %v5512_v50 = vld [vmem:[%s7409_s0 + $0x50] sm:$0xff]  ;;  %v5528_v58 = vld [vmem:[%s7409_s0 + $0x58] sm:$0xf] }
   0x6   :  { %v151_v37 = vsel %vm141_vm1, %v149_v34, %v150_v35  ;;  %v154_v43 = vrot.slane %v5487_v41, 1  ;;  %v95_v47 = vpack.c.bf16 %v5482_v40, %v5466_v32  ;;  %v156_v51 = vrot.slane %v5502_v48, 1  ;;  %v5533_v59 = vld [vmem:[%s7409_s0 + $0x60] sm:$0xff]  ;;  %v5538_v60 = vld [vmem:[%s7409_s0 + $0x68] sm:$0xff] }
   0x7   :  { %v228_v38 = vpack.c.bf16 %v151_v37, %v148_v36  ;;  %v153_v44 = vsel %vm141_vm1, %v150_v35, %v152_v42  ;;  %v157_v52 = vrot.slane %v5507_v49, 1  ;;  %v159_v53 = vrot.slane %v5512_v50, 1  ;;  %v5605_v26 = vld [vmem:[%s7409_s0 + $0xa0] sm:$0xff]  ;;  %v5610_v27 = vld [vmem:[%s7409_s0 + $0xa8] sm:$0xff] }
   0x8   :  { %v155_v45 = vsel %vm141_vm1, %v152_v42, %v154_v43  ;;  %v96_v57 = vpack.c.bf16 %v5507_v49, %v5502_v48  ;;  %v161_v61 = vrot.slane %v5528_v58, 1  ;;  %v163_v62 = vrot.slane %v5533_v59, 1 }
   0x9   :  { %v4040_v0 = vld [vmem:[%s7429_s26 + $0x18] sm:$0xf]  ;;  %v5101_v1 = vld [vmem:[%s7429_s26 + $0x18] sm:$0x30]  ;;  %v4060_v2 = vld [vmem:[%s7429_s26 + $0x8] sm:$0xf]  ;;  %v229_v46 = vpack.c.bf16 %v155_v45, %v153_v44  ;;  %v158_v54 = vsel %vm141_vm1, %v156_v51, %v157_v52  ;;  %v160_v55 = vsel %vm141_vm1, %v157_v52, %v159_v53 }
   0xa   :  { %v4041_v3 = vor.u32 %v5101_v1, %v4040_v0  ;;  %v5097_v4 = vld [vmem:[%s7429_s26 + $0x8] sm:$0x30]  ;;  %v4084_v5 = vld [vmem:[%s7430_s20 + $0x18] sm:$0xf]  ;;  %v5103_v6 = vld [vmem:[%s7430_s20 + $0x18] sm:$0x30]  ;;  %v230_v56 = vpack.c.bf16 %v160_v55, %v158_v54  ;;  %v162_v0 = vsel %vm141_vm1, %v159_v53, %v161_v61 }
   0xb   :  { %v4061_v7 = vor.u32 %v5097_v4, %v4060_v2  ;;  %v4085_v8 = vor.u32 %v5103_v6, %v4084_v5  ;;  %v4104_v9 = vld [vmem:[%s7430_s20 + $0x8] sm:$0xf]  ;;  %v5099_v10 = vld [vmem:[%s7430_s20 + $0x8] sm:$0x30]  ;;  %v5100_v13 = vld [vmem:[%s7429_s26 + $0x10] sm:$0xff]  ;;  %v164_v63 = vrot.slane %v5538_v60, 1 }
   0xc   :  { %v289_v11 = vsel %vm287_vm0, %v4041_v3, 0  ;;  %v4105_v12 = vor.u32 %v5099_v10, %v4104_v9  ;;  %v5096_v20 = vld [vmem:[%s7429_s26] sm:$0xff]  ;;  %v5102_v21 = vld [vmem:[%s7430_s20 + $0x10] sm:$0xff]  ;;  %v97_v3 = vpack.c.bf16 %v5533_v59, %v5512_v50  ;;  %v5559_v5 = vld [vmem:[%s7409_s0 + $0x78] sm:$0xf]  ;;  %v178_v33 = vrot.slane %v5610_v27, 1 }
   0xd   :  { %297 = vmatpush.bf16.msra.mxu0 %v289_v11  ;;  %v408_v14 = vsel %vm287_vm0, %v4061_v7, 0  ;;  %v496_v15 = vsel %vm287_vm0, %v4085_v8, 0  ;;  %v5098_v25 = vld [vmem:[%s7430_s20] sm:$0xff]  ;;  %v165_v1 = vsel %vm141_vm1, %v163_v62, %v164_v63  ;;  %v5554_v4 = vld [vmem:[%s7409_s0 + $0x70] sm:$0xff]  ;;  %v168_v7 = vrot.slane %v5559_v5, 1  ;;  %v5653_v55 = vld [vmem:[%s7409_s0 + $0xc8] sm:$0xff] }
   0xe   :  { %416 = vmatpush.bf16.msra.mxu1 %v408_v14  ;;  %504 = vmatpush.bf16.msra.mxu2 %v496_v15  ;;  %v579_v19 = vsel %vm287_vm0, %v4105_v12, 0  ;;  %v231_v2 = vpack.c.bf16 %v165_v1, %v162_v0  ;;  %v166_v6 = vrot.slane %v5554_v4, 1  ;;  %v98_v11 = vpack.c.bf16 %v5554_v4, %v5538_v60  ;;  %v5574_v12 = vld [vmem:[%s7409_s0 + $0x80] sm:$0xff]  ;;  %v5584_v14 = vld [vmem:[%s7409_s0 + $0x90] sm:$0xff] }
   0xf   :  { %587 = vmatpush.bf16.msra.mxu3 %v579_v19  ;;  %v170_v15 = vrot.slane %v5574_v12, 1  ;;  %v100_v37 = vpack.c.bf16 %v5605_v26, %v5584_v14  ;;  %v5648_v54 = vld [vmem:[%s7409_s0 + $0xc0] sm:$0xff]  ;;  %v185_v0 = vrot.slane %v5653_v55, 1  ;;  %vm2366_vm7 = vcmask 982016  }
  0x10   :  { %v167_v8 = vsel %vm141_vm1, %v164_v63, %v166_v6  ;;  %v169_v9 = vsel %vm141_vm1, %v166_v6, %v168_v7  ;;  %v184_v63 = vrot.slane %v5648_v54, 1  ;;  %vm3647_vm8 = vcmask 261120  }
  0x11   :  { %298 = vmatpush.bf16.msra.mxu0 %v5100_v13  ;;  %v232_v10 = vpack.c.bf16 %v169_v9, %v167_v8  ;;  %v5579_v13 = vld [vmem:[%s7409_s0 + $0x88] sm:$0xff]  ;;  %vm3735_vm9 = vcmask 654336   ;;  %vm3995_vm10 = vcmask 1040384   ;;  %vm3991_vm11 = vcmask 408576  }
  0x12   :  { %417 = vmatpush.bf16.msra.mxu1 %v5096_v20  ;;  %505 = vmatpush.bf16.msra.mxu2 %v5102_v21  ;;  %v171_v19 = vrot.slane %v5579_v13, 1  ;;  %v173_v20 = vrot.slane %v5584_v14, 1  ;;  %v99_v24 = vpack.c.bf16 %v5579_v13, %v5574_v12  ;;  %v186_v7 = vsel %vm141_vm1, %v184_v63, %v185_v0  ;;  %v4176_v63 = vld [vmem:[%s7429_s26 + $0x38] sm:$0xf] }
  0x13   :  { %588 = vmatpush.bf16.msra.mxu3 %v5098_v25  ;;  %v5600_v25 = vld [vmem:[%s7409_s0 + $0x98] sm:$0xf]  ;;  %vm4012_vm12 = vcmask 80896  }
  0x14   :  { %4042 = vmatmul.msk.bf16.vlgmr.msra.gmra.mxu0 %vm250_vm2, %v227_v28  ;;  %v172_v21 = vsel %vm141_vm1, %v170_v15, %v171_v19  ;;  %v174_v22 = vsel %vm141_vm1, %v171_v19, %v173_v20  ;;  %v102_v19 = vpack.c.bf16 %v5653_v55, %v5648_v54 }
  0x15   :  { %4062 = vmatmul.msk.bf16.vlgmr.msra.gmra.mxu1 %vm250_vm2, %v93_v29  ;;  %4086 = vmatmul.msk.bf16.vlgmr.msra.gmra.mxu2 %vm250_vm2, %v227_v28  ;;  %v233_v23 = vpack.c.bf16 %v174_v22, %v172_v21  ;;  %v175_v28 = vrot.slane %v5600_v25, 1 }
  0x16   :  { %4106 = vmatmul.msk.bf16.vlgmr.msra.gmra.mxu3 %vm250_vm2, %v93_v29  ;;  %v177_v29 = vrot.slane %v5605_v26, 1 }
  0x17   :  { %v176_v34 = vsel %vm141_vm1, %v173_v20, %v175_v28  ;;  %v5691_v28 = vld [vmem:[%s7409_s0 + $0xe8] sm:$0xff] }
  0x18   :  { %v179_v35 = vsel %vm141_vm1, %v177_v29, %v178_v33  ;;  %v4128_v29 = vld [vmem:[%s7429_s26 + $0x28] sm:$0xf] }
  0x19   :  { %v234_v36 = vpack.c.bf16 %v179_v35, %v176_v34  ;;  %v4152_v34 = vld [vmem:[%s7430_s20 + $0x28] sm:$0xf] }
  0x24   :  { %4043 = vmatmul.msk.bf16.gmra.mxu0 %vm250_vm2, %v228_v38 }
  0x25   :  { %4063 = vmatmul.msk.bf16.gmra.mxu1 %vm250_vm2, %v94_v39  ;;  %4087 = vmatmul.msk.bf16.gmra.mxu2 %vm250_vm2, %v228_v38  ;;  %v5626_v38 = vld [vmem:[%s7409_s0 + $0xb0] sm:$0xff] }
  0x26   :  { %4107 = vmatmul.msk.bf16.gmra.mxu3 %vm250_vm2, %v94_v39  ;;  %v5631_v39 = vld [vmem:[%s7409_s0 + $0xb8] sm:$0xf]  ;;  %v180_v42 = vrot.slane %v5626_v38, 1  ;;  %v101_v51 = vpack.c.bf16 %v5626_v38, %v5610_v27 }
  0x27   :  { %v182_v43 = vrot.slane %v5631_v39, 1 }
  0x28   :  { %v181_v44 = vsel %vm141_vm1, %v178_v33, %v180_v42  ;;  %v5105_v33 = vld [vmem:[%s7429_s26 + $0x28] sm:$0x30] }
  0x29   :  { %v183_v45 = vsel %vm141_vm1, %v180_v42, %v182_v43  ;;  %v4129_v35 = vor.u32 %v5105_v33, %v4128_v29 }
  0x34   :  { %4044 = vmatmul.msk.bf16.gmra.mxu0 %vm250_vm2, %v229_v46 }
  0x35   :  { %4064 = vmatmul.msk.bf16.gmra.mxu1 %vm250_vm2, %v95_v47  ;;  %4088 = vmatmul.msk.bf16.gmra.mxu2 %vm250_vm2, %v229_v46  ;;  %v235_v46 = vpack.c.bf16 %v183_v45, %v181_v44 }
  0x36   :  { %4108 = vmatmul.msk.bf16.gmra.mxu3 %vm250_vm2, %v95_v47 }
  0x44   :  { %4045 = vmatmul.msk.bf16.gmra.mxu0 %vm250_vm2, %v230_v56 }
  0x45   :  { %4065 = vmatmul.msk.bf16.gmra.mxu1 %vm250_vm2, %v96_v57  ;;  %4089 = vmatmul.msk.bf16.gmra.mxu2 %vm250_vm2, %v230_v56  ;;  %v5658_v56 = vld [vmem:[%s7409_s0 + $0xd0] sm:$0xff] }
  0x46   :  { %4109 = vmatmul.msk.bf16.gmra.mxu3 %vm250_vm2, %v96_v57  ;;  %v187_v1 = vrot.slane %v5658_v56, 1 }
  0x48   :  { %v188_v8 = vsel %vm141_vm1, %v185_v0, %v187_v1  ;;  %v5109_v0 = vld [vmem:[%s7429_s26 + $0x38] sm:$0x30] }
  0x54   :  { %4046 = vmatmul.msk.bf16.gmra.mxu0 %vm250_vm2, %v231_v2 }
  0x55   :  { %4066 = vmatmul.msk.bf16.gmra.mxu1 %vm250_vm2, %v97_v3  ;;  %4090 = vmatmul.msk.bf16.gmra.mxu2 %vm250_vm2, %v231_v2 }
  0x56   :  { %4110 = vmatmul.msk.bf16.gmra.mxu3 %vm250_vm2, %v97_v3 }
  0x64   :  { %4047 = vmatmul.msk.bf16.gmra.mxu0 %vm250_vm2, %v232_v10 }
  0x65   :  { %4067 = vmatmul.msk.bf16.gmra.mxu1 %vm250_vm2, %v98_v11  ;;  %4091 = vmatmul.msk.bf16.gmra.mxu2 %vm250_vm2, %v232_v10  ;;  %v236_v10 = vpack.c.bf16 %v188_v8, %v186_v7  ;;  %v4177_v7 = vor.u32 %v5109_v0, %v4176_v63  ;;  %v5111_v8 = vld [vmem:[%s7430_s20 + $0x38] sm:$0x30] }
  0x66   :  { %4111 = vmatmul.msk.bf16.gmra.mxu3 %vm250_vm2, %v98_v11 }
  0x74   :  { %4048 = vmatmul.msk.bf16.gmra.mxu0 %vm250_vm2, %v233_v23 }
  0x75   :  { %4068 = vmatmul.msk.bf16.gmra.mxu1 %vm250_vm2, %v99_v24  ;;  %4092 = vmatmul.msk.bf16.gmra.mxu2 %vm250_vm2, %v233_v23  ;;  %v5681_v23 = vld [vmem:[%s7409_s0 + $0xd8] sm:$0xf] }
  0x76   :  { %4112 = vmatmul.msk.bf16.gmra.mxu3 %vm250_vm2, %v99_v24  ;;  %v5686_v24 = vld [vmem:[%s7409_s0 + $0xe0] sm:$0xff]  ;;  %v189_v45 = vrot.slane %v5681_v23, 1 }
  0x84   :  { %4049 = vmatmul.msk.bf16.gmra.mxu0 %vm250_vm2, %v234_v36 }
  0x85   :  { %4069 = vmatmul.msk.bf16.gmra.mxu1 %vm250_vm2, %v100_v37  ;;  %4093 = vmatmul.msk.bf16.gmra.mxu2 %vm250_vm2, %v234_v36  ;;  %v5107_v36 = vld [vmem:[%s7430_s20 + $0x28] sm:$0x30] }
  0x86   :  { %4113 = vmatmul.msk.bf16.gmra.mxu3 %vm250_vm2, %v100_v37  ;;  %v4153_v42 = vor.u32 %v5107_v36, %v4152_v34  ;;  %v5106_v36 = vld [vmem:[%s7430_s20 + $0x20] sm:$0xff] }
  0x91   :  { %v300_v47 = vpop.f32.mrf.mxu0 }
  0x92   :  { %v419_v52 = vpop.f32.mrf.mxu1 }
  0x93   :  { %v5639_v53 = vadd.f32 %v419_v52, %v300_v47  ;;  %v192_v47 = vrot.slane %v5691_v28, 1 }
  0x94   :  { %4050 = vmatmul.msk.bf16.gmra.mxu0 %vm250_vm2, %v235_v46 }
  0x95   :  { %4070 = vmatmul.msk.bf16.gmra.mxu1 %vm250_vm2, %v101_v51  ;;  %4094 = vmatmul.msk.bf16.gmra.mxu2 %vm250_vm2, %v235_v46  ;;  %v191_v46 = vrot.slane %v5686_v24, 1 }
  0x96   :  { %4114 = vmatmul.msk.bf16.gmra.mxu3 %vm250_vm2, %v101_v51  ;;  %v795_v51 = vsel %vm287_vm0, %v4129_v35, 0  ;;  %v103_v35 = vpack.c.bf16 %v5686_v24, %v5658_v56 }
  0x97   :  { %803 = vmatpush.bf16.msrb.mxu0 %v795_v51  ;;  %v5761_v51 = vld [vmem:[%s7409_s0 + $0xf8] sm:$0xf] }
  0x98   :  { %v507_v57 = vpop.f32.mrf.mxu2 }
  0x99   :  { %v590_v61 = vpop.f32.mrf.mxu3  ;;  %v302_v62 = vpop.f32.mrf.mxu0 }
  0x9a   :  { %v5663_v2 = vadd.f32 %v590_v61, %v507_v57  ;;  %v421_v3 = vpop.f32.mrf.mxu1  ;;  %v907_v61 = vsel %vm287_vm0, %v4153_v42, 0 }
  0x9b   :  { %v5665_v6 = vadd.f32 %v421_v3, %v302_v62  ;;  %915 = vmatpush.bf16.msrb.mxu1 %v907_v61  ;;  %v4200_v3 = vld [vmem:[%s7430_s20 + $0x38] sm:$0xf] }
  0x9f   :  { %916 = vmatpush.bf16.msrb.mxu1 %v5106_v36 }
  0xa0   :  { %v509_v9 = vpop.f32.mrf.mxu2 }
  0xa1   :  { %v592_v11 = vpop.f32.mrf.mxu3  ;;  %v305_v15 = vpop.f32.mrf.mxu0 }
  0xa2   :  { %v5671_v20 = vadd.f32 %v592_v11, %v509_v9  ;;  %v424_v21 = vpop.f32.mrf.mxu1  ;;  %v190_v9 = vsel %vm141_vm1, %v187_v1, %v189_v45  ;;  %v4201_v11 = vor.u32 %v5111_v8, %v4200_v3  ;;  %v5104_v1 = vld [vmem:[%s7429_s26 + $0x20] sm:$0xff]  ;;  %v5110_v45 = vld [vmem:[%s7430_s20 + $0x30] sm:$0xff]  ;;  %v196_v3 = vrot.slane %v5761_v51, 1 }
  0xa3   :  { %v5673_v22 = vadd.f32 %v424_v21, %v305_v15  ;;  %v1148_v15 = vsel %vm287_vm0, %v4177_v7, 0  ;;  %804 = vmatpush.bf16.msrb.mxu0 %v5104_v1 }
  0xa4   :  { %4051 = vmatmul.msk.bf16.gmra.mxu0 %vm250_vm2, %v236_v10  ;;  %1156 = vmatpush.bf16.msrb.mxu2 %v1148_v15 }
  0xa5   :  { %4071 = vmatmul.msk.bf16.gmra.mxu1 %vm250_vm2, %v102_v19  ;;  %4095 = vmatmul.msk.bf16.gmra.mxu2 %vm250_vm2, %v236_v10  ;;  %v193_v10 = vsel %vm141_vm1, %v191_v46, %v192_v47  ;;  %v5756_v46 = vld [vmem:[%s7409_s0 + $0xf0] sm:$0xff] }
  0xa6   :  { %4115 = vmatmul.msk.bf16.gmra.mxu3 %vm250_vm2, %v102_v19  ;;  %v1260_v19 = vsel %vm287_vm0, %v4201_v11, 0  ;;  %v237_v29 = vpack.c.bf16 %v193_v10, %v190_v9  ;;  %v194_v0 = vrot.slane %v5756_v46, 1 }
  0xa7   :  { %1268 = vmatpush.bf16.msrb.mxu3 %v1260_v19 }
  0xa8   :  { %v512_v37 = vpop.f32.mrf.mxu2  ;;  %v195_v10 = vsel %vm141_vm1, %v192_v47, %v194_v0  ;;  %v197_v11 = vsel %vm141_vm1, %v194_v0, %v196_v3  ;;  %v1003_v0 = vrot.slane %v5420_v16, 3  ;;  %v1004_v3 = vrot.slane %v5425_v17, 3 }
  0xa9   :  { %v595_v43 = vpop.f32.mrf.mxu3  ;;  %v307_v44 = vpop.f32.mrf.mxu0  ;;  %v238_v19 = vpack.c.bf16 %v197_v11, %v195_v10 }
  0xaa   :  { %v5710_v52 = vadd.f32 %v595_v43, %v512_v37  ;;  %v426_v57 = vpop.f32.mrf.mxu1  ;;  %v5108_v37 = vld [vmem:[%s7429_s26 + $0x30] sm:$0xff] }
  0xab   :  { %v5713_v62 = vadd.f32 %v426_v57, %v307_v44  ;;  %1157 = vmatpush.bf16.msrb.mxu2 %v5108_v37  ;;  %1269 = vmatpush.bf16.msrb.mxu3 %v5110_v45  ;;  %v651_v45 = vrot.slane %v5425_v17, 2 }
  0xb0   :  { %v514_v21 = vpop.f32.mrf.mxu2 }
  0xb1   :  { %v597_v33 = vpop.f32.mrf.mxu3  ;;  %v310_v34 = vpop.f32.mrf.mxu0 }
  0xb2   :  { %v5742_v42 = vadd.f32 %v597_v33, %v514_v21  ;;  %v429_v43 = vpop.f32.mrf.mxu1  ;;  %v104_v33 = vpack.c.bf16 %v5756_v46, %v5691_v28 }
  0xb3   :  { %v5744_v44 = vadd.f32 %v429_v43, %v310_v34  ;;  %v650_v43 = vrot.slane %v5420_v16, 2 }
  0xb4   :  { %4052 = vmatmul.msk.bf16.gmra.mxu0 %vm250_vm2, %v237_v29 }
  0xb5   :  { %4072 = vmatmul.msk.bf16.gmra.mxu1 %vm250_vm2, %v103_v35  ;;  %4096 = vmatmul.msk.bf16.gmra.mxu2 %vm250_vm2, %v237_v29  ;;  %v652_v11 = vsel %vm287_vm0, %v650_v43, %v651_v45 }
  0xb6   :  { %4116 = vmatmul.msk.bf16.gmra.mxu3 %vm250_vm2, %v103_v35 }
  0xb8   :  { %v517_v57 = vpop.f32.mrf.mxu2 }
  0xb9   :  { %v600_v61 = vpop.f32.mrf.mxu3  ;;  %v312_v63 = vpop.f32.mrf.mxu0 }
  0xba   :  { %v5765_v7 = vadd.f32 %v600_v61, %v517_v57  ;;  %v431_v8 = vpop.f32.mrf.mxu1  ;;  %v653_v57 = vrot.slane %v5430_v18, 2 }
  0xbb   :  { %v5767_v9 = vadd.f32 %v431_v8, %v312_v63  ;;  %v1006_v8 = vrot.slane %v5430_v18, 3 }
  0xc0   :  { %v519_v15 = vpop.f32.mrf.mxu2 }
  0xc1   :  { %v602_v21 = vpop.f32.mrf.mxu3  ;;  %v315_v29 = vpop.f32.mrf.mxu0 }
  0xc2   :  { %v5773_v34 = vadd.f32 %v602_v21, %v519_v15  ;;  %v434_v35 = vpop.f32.mrf.mxu1  ;;  %v654_v15 = vsel %vm287_vm0, %v651_v45, %v653_v57  ;;  %v1007_v21 = vsel %vm1002_vm3, %v1004_v3, %v1006_v8 }
  0xc3   :  { %v5775_v1 = vadd.f32 %v434_v35, %v315_v29 }
  0xc4   :  { %4053 = vmatmul.msk.bf16.gmra.mxu0 %vm250_vm2, %v238_v19 }
  0xc5   :  { %4073 = vmatmul.msk.bf16.gmra.mxu1 %vm250_vm2, %v104_v33  ;;  %4097 = vmatmul.msk.bf16.gmra.mxu2 %vm250_vm2, %v238_v19  ;;  %v1005_v19 = vsel %vm1002_vm3, %v1003_v0, %v1004_v3  ;;  %v657_v0 = vrot.slane %v5461_v31, 2  ;;  %v658_v3 = vrot.slane %v5466_v32, 2 }
  0xc6   :  { %4117 = vmatmul.msk.bf16.gmra.mxu3 %vm250_vm2, %v104_v33  ;;  %v735_v33 = vpack.c.bf16 %v654_v15, %v652_v11  ;;  %v1088_v16 = vpack.c.bf16 %v1007_v21, %v1005_v19  ;;  %v1008_v19 = vrot.slane %v5456_v30, 3  ;;  %v1010_v21 = vrot.slane %v5461_v31, 3 }
  0xc8   :  { %v522_v47 = vpop.f32.mrf.mxu2 }
  0xc9   :  { %v605_v36 = vpop.f32.mrf.mxu3  ;;  %v317_v37 = vpop.f32.mrf.mxu0 }
  0xca   :  { %v5784_v61 = vadd.f32 %v605_v36, %v522_v47  ;;  %v436_v63 = vpop.f32.mrf.mxu1 }
  0xcb   :  { %v5789_v10 = vadd.f32 %v436_v63, %v317_v37  ;;  %v655_v63 = vrot.slane %v5456_v30, 2 }
  0xcd   :  { %7431 = vst [vmem:[#allocation2_spill] sm:$0xff] %v5789_v10 }
  0xd0   :  { %v524_v29 = vpop.f32.mrf.mxu2 }
  0xd1   :  { %v607_v35 = vpop.f32.mrf.mxu3  ;;  %v320_v47 = vpop.f32.mrf.mxu0 }
  0xd2   :  { %v5795_v36 = vadd.f32 %v607_v35, %v524_v29  ;;  %v439_v17 = vpop.f32.mrf.mxu1  ;;  %v1011_v29 = vrot.slane %v5466_v32, 3  ;;  %v656_v35 = vsel %vm287_vm0, %v653_v57, %v655_v63  ;;  %v662_v63 = vrot.slane %v5487_v41, 2 }
  0xd3   :  { %v5797_v18 = vadd.f32 %v439_v17, %v320_v47  ;;  %v659_v47 = vsel %vm287_vm0, %v657_v0, %v658_v3 }
  0xd4   :  { %7432 = vst [vmem:[#allocation3_spill] sm:$0xff] %v5795_v36  ;;  %4130 = vmatmul.msk.bf16.vlgmr.msrb.gmra.mxu0 %vm250_vm2, %v735_v33  ;;  %v1012_v17 = vsel %vm1002_vm3, %v1010_v21, %v1011_v29 }
  0xd5   :  { %7433 = vst [vmem:[#allocation4_spill] sm:$0xff] %v5797_v18  ;;  %4154 = vmatmul.msk.bf16.vlgmr.msrb.gmra.mxu1 %vm250_vm2, %v735_v33  ;;  %4178 = vmatmul.msk.bf16.vlgmr.msrb.gmra.mxu2 %vm250_vm2, %v1088_v16 }
  0xd6   :  { %4202 = vmatmul.msk.bf16.vlgmr.msrb.gmra.mxu3 %vm250_vm2, %v1088_v16  ;;  %v1009_v16 = vsel %vm1002_vm3, %v1006_v8, %v1008_v19 }
  0xd7   :  { %v1089_v36 = vpack.c.bf16 %v1012_v17, %v1009_v16 }
  0xd8   :  { %v527_v37 = vpop.f32.mrf.mxu2 }
  0xd9   :  { %v610_v43 = vpop.f32.mrf.mxu3  ;;  %v322_v45 = vpop.f32.mrf.mxu0 }
  0xda   :  { %v5806_v11 = vadd.f32 %v610_v43, %v527_v37  ;;  %v441_v15 = vpop.f32.mrf.mxu1  ;;  %v736_v37 = vpack.c.bf16 %v659_v47, %v656_v35 }
  0xdb   :  { %v5811_v33 = vadd.f32 %v441_v15, %v322_v45  ;;  %v660_v45 = vrot.slane %v5482_v40, 2  ;;  %v1015_v15 = vrot.slane %v5487_v41, 3 }
  0xdc   :  { %7434 = vst [vmem:[#allocation5_spill] sm:$0xff] %v5806_v11 }
  0xdd   :  { %v661_v21 = vsel %vm287_vm0, %v658_v3, %v660_v45 }
  0xe0   :  { %v529_v18 = vpop.f32.mrf.mxu2 }
  0xe1   :  { %v612_v43 = vpop.f32.mrf.mxu3  ;;  %v325_v11 = vpop.f32.mrf.mxu0 }
  0xe2   :  { %v5817_v30 = vadd.f32 %v612_v43, %v529_v18  ;;  %v444_v31 = vpop.f32.mrf.mxu1 }
  0xe3   :  { %v5819_v10 = vadd.f32 %v444_v31, %v325_v11  ;;  %v1013_v11 = vrot.slane %v5482_v40, 3 }
  0xe4   :  { %4131 = vmatmul.msk.bf16.gmra.mxu0 %vm250_vm2, %v736_v37 }
  0xe5   :  { %4155 = vmatmul.msk.bf16.gmra.mxu1 %vm250_vm2, %v736_v37  ;;  %4179 = vmatmul.msk.bf16.gmra.mxu2 %vm250_vm2, %v1089_v36  ;;  %v1014_v35 = vsel %vm1002_vm3, %v1011_v29, %v1013_v11  ;;  %v1016_v47 = vsel %vm1002_vm3, %v1013_v11, %v1015_v15  ;;  %v1017_v15 = vrot.slane %v5502_v48, 3 }
  0xe6   :  { %4203 = vmatmul.msk.bf16.gmra.mxu3 %vm250_vm2, %v1089_v36  ;;  %v663_v36 = vsel %vm287_vm0, %v660_v45, %v662_v63  ;;  %v1090_v31 = vpack.c.bf16 %v1016_v47, %v1014_v35  ;;  %v665_v45 = vrot.slane %v5507_v49, 2  ;;  %v667_v63 = vrot.slane %v5512_v50, 2 }
  0xe7   :  { %v737_v17 = vpack.c.bf16 %v663_v36, %v661_v21  ;;  %v1018_v21 = vrot.slane %v5507_v49, 3  ;;  %v1020_v36 = vrot.slane %v5512_v50, 3 }
  0xe8   :  { %v532_v32 = vpop.f32.mrf.mxu2 }
  0xe9   :  { %v615_v57 = vpop.f32.mrf.mxu3  ;;  %v327_v8 = vpop.f32.mrf.mxu0 }
  0xea   :  { %v5827_v18 = vadd.f32 %v615_v57, %v532_v32  ;;  %v446_v0 = vpop.f32.mrf.mxu1 }
  0xeb   :  { %v5831_v19 = vadd.f32 %v446_v0, %v327_v8  ;;  %v664_v8 = vrot.slane %v5502_v48, 2 }
  0xed   :  { %v666_v47 = vsel %vm287_vm0, %v664_v8, %v665_v45 }
  0xf0   :  { %v534_v16 = vpop.f32.mrf.mxu2 }
  0xf1   :  { %v617_v37 = vpop.f32.mrf.mxu3  ;;  %v330_v43 = vpop.f32.mrf.mxu0 }
  0xf2   :  { %v5837_v32 = vadd.f32 %v617_v37, %v534_v16  ;;  %v449_v40 = vpop.f32.mrf.mxu1  ;;  %v668_v16 = vsel %vm287_vm0, %v665_v45, %v667_v63  ;;  %v1021_v37 = vsel %vm1002_vm3, %v1018_v21, %v1020_v36  ;;  %v669_v45 = vrot.slane %v5528_v58, 2 }
  0xf3   :  { %v5839_v57 = vadd.f32 %v449_v40, %v330_v43 }
  0xf4   :  { %4132 = vmatmul.msk.bf16.gmra.mxu0 %vm250_vm2, %v737_v17 }
  0xf5   :  { %4156 = vmatmul.msk.bf16.gmra.mxu1 %vm250_vm2, %v737_v17  ;;  %4180 = vmatmul.msk.bf16.gmra.mxu2 %vm250_vm2, %v1090_v31  ;;  %v1019_v17 = vsel %vm1002_vm3, %v1017_v15, %v1018_v21  ;;  %v672_v15 = vrot.slane %v5538_v60, 2 }
  0xf6   :  { %4204 = vmatmul.msk.bf16.gmra.mxu3 %vm250_vm2, %v1090_v31  ;;  %v738_v31 = vpack.c.bf16 %v668_v16, %v666_v47  ;;  %v1022_v16 = vrot.slane %v5528_v58, 3 }
  0xf8   :  { %v537_v41 = vpop.f32.mrf.mxu2 }
  0xf9   :  { %v620_v3 = vpop.f32.mrf.mxu3  ;;  %v332_v29 = vpop.f32.mrf.mxu0 }
  0xfa   :  { %v5848_v0 = vadd.f32 %v620_v3, %v537_v41  ;;  %v451_v11 = vpop.f32.mrf.mxu1  ;;  %v1091_v3 = vpack.c.bf16 %v1021_v37, %v1019_v17  ;;  %v1024_v17 = vrot.slane %v5533_v59, 3  ;;  %v1025_v37 = vrot.slane %v5538_v60, 3 }
  0xfb   :  { %v5853_v35 = vadd.f32 %v451_v11, %v332_v29  ;;  %v671_v11 = vrot.slane %v5533_v59, 2 }
  0xfc   :  { %7435 = vst [vmem:[#allocation6_spill] sm:$0xff] %v5848_v0 }
 0x100   :  { %v539_v43 = vpop.f32.mrf.mxu2 }
 0x101   :  { %v622_v40 = vpop.f32.mrf.mxu3  ;;  %v335_v41 = vpop.f32.mrf.mxu0 }
 0x102   :  { %v5859_v48 = vadd.f32 %v622_v40, %v539_v43  ;;  %v454_v49 = vpop.f32.mrf.mxu1  ;;  %v673_v40 = vsel %vm287_vm0, %v671_v11, %v672_v15 }
 0x103   :  { %v5861_v0 = vadd.f32 %v454_v49, %v335_v41  ;;  %v1023_v41 = vsel %vm1002_vm3, %v1020_v36, %v1022_v16  ;;  %v1029_v16 = vrot.slane %v5559_v5, 3 }
 0x104   :  { %7436 = vst [vmem:[#allocation7_spill] sm:$0xff] %v5859_v48  ;;  %4133 = vmatmul.msk.bf16.gmra.mxu0 %vm250_vm2, %v738_v31 }
 0x105   :  { %7437 = vst [vmem:[#allocation8_spill] sm:$0xff] %v5861_v0  ;;  %4157 = vmatmul.msk.bf16.gmra.mxu1 %vm250_vm2, %v738_v31  ;;  %4181 = vmatmul.msk.bf16.gmra.mxu2 %vm250_vm2, %v1091_v3  ;;  %v670_v31 = vsel %vm287_vm0, %v667_v63, %v669_v45  ;;  %v676_v45 = vrot.slane %v5559_v5, 2 }
 0x106   :  { %4205 = vmatmul.msk.bf16.gmra.mxu3 %vm250_vm2, %v1091_v3  ;;  %v1026_v3 = vsel %vm1002_vm3, %v1024_v17, %v1025_v37 }
 0x107   :  { %v1092_v0 = vpack.c.bf16 %v1026_v3, %v1023_v41 }
 0x108   :  { %v542_v50 = vpop.f32.mrf.mxu2 }
 0x109   :  { %v625_v29 = vpop.f32.mrf.mxu3  ;;  %v337_v8 = vpop.f32.mrf.mxu0 }
 0x10a   :  { %v5870_v21 = vadd.f32 %v625_v29, %v542_v50  ;;  %v456_v47 = vpop.f32.mrf.mxu1  ;;  %v739_v50 = vpack.c.bf16 %v673_v40, %v670_v31 }
 0x10b   :  { %v5875_v43 = vadd.f32 %v456_v47, %v337_v8  ;;  %v674_v8 = vrot.slane %v5554_v4, 2 }
 0x10c   :  { %7438 = vst [vmem:[#allocation9_spill] sm:$0xff] %v5870_v21 }
 0x10d   :  { %v675_v31 = vsel %vm287_vm0, %v672_v15, %v674_v8 }
 0x110   :  { %v544_v49 = vpop.f32.mrf.mxu2 }
 0x111   :  { %v627_v29 = vpop.f32.mrf.mxu3  ;;  %v340_v21 = vpop.f32.mrf.mxu0 }
 0x112   :  { %v5881_v58 = vadd.f32 %v627_v29, %v544_v49  ;;  %v459_v59 = vpop.f32.mrf.mxu1 }
 0x113   :  { %v5883_v48 = vadd.f32 %v459_v59, %v340_v21  ;;  %v1027_v21 = vrot.slane %v5554_v4, 3 }
 0x114   :  { %4134 = vmatmul.msk.bf16.gmra.mxu0 %vm250_vm2, %v739_v50 }
 0x115   :  { %4158 = vmatmul.msk.bf16.gmra.mxu1 %vm250_vm2, %v739_v50  ;;  %4182 = vmatmul.msk.bf16.gmra.mxu2 %vm250_vm2, %v1092_v0  ;;  %v1028_v40 = vsel %vm1002_vm3, %v1025_v37, %v1027_v21  ;;  %v1030_v41 = vsel %vm1002_vm3, %v1027_v21, %v1029_v16  ;;  %v1031_v16 = vrot.slane %v5574_v12, 3 }
 0x116   :  { %4206 = vmatmul.msk.bf16.gmra.mxu3 %vm250_vm2, %v1092_v0  ;;  %v677_v0 = vsel %vm287_vm0, %v674_v8, %v676_v45  ;;  %v1093_v59 = vpack.c.bf16 %v1030_v41, %v1028_v40  ;;  %v679_v8 = vrot.slane %v5579_v13, 2  ;;  %v681_v45 = vrot.slane %v5584_v14, 2 }
 0x117   :  { %v740_v49 = vpack.c.bf16 %v677_v0, %v675_v31  ;;  %v1032_v31 = vrot.slane %v5579_v13, 3  ;;  %v1034_v0 = vrot.slane %v5584_v14, 3 }
 0x118   :  { %v547_v60 = vpop.f32.mrf.mxu2 }
 0x119   :  { %v630_v63 = vpop.f32.mrf.mxu3  ;;  %v342_v36 = vpop.f32.mrf.mxu0 }
 0x11a   :  { %v5891_v11 = vadd.f32 %v630_v63, %v547_v60  ;;  %v461_v47 = vpop.f32.mrf.mxu1 }
 0x11b   :  { %v5895_v17 = vadd.f32 %v461_v47, %v342_v36  ;;  %v678_v36 = vrot.slane %v5574_v12, 2 }
 0x11d   :  { %v680_v41 = vsel %vm287_vm0, %v678_v36, %v679_v8 }
 0x120   :  { %v549_v3 = vpop.f32.mrf.mxu2 }
 0x121   :  { %v632_v50 = vpop.f32.mrf.mxu3  ;;  %v345_v29 = vpop.f32.mrf.mxu0 }
 0x122   :  { %v5901_v60 = vadd.f32 %v632_v50, %v549_v3  ;;  %v464_v4 = vpop.f32.mrf.mxu1  ;;  %v682_v3 = vsel %vm287_vm0, %v679_v8, %v681_v45  ;;  %v1035_v50 = vsel %vm1002_vm3, %v1032_v31, %v1034_v0  ;;  %v683_v8 = vrot.slane %v5600_v25, 2 }
 0x123   :  { %v5903_v63 = vadd.f32 %v464_v4, %v345_v29 }
 0x124   :  { %4135 = vmatmul.msk.bf16.gmra.mxu0 %vm250_vm2, %v740_v49 }
 0x125   :  { %4159 = vmatmul.msk.bf16.gmra.mxu1 %vm250_vm2, %v740_v49  ;;  %4183 = vmatmul.msk.bf16.gmra.mxu2 %vm250_vm2, %v1093_v59  ;;  %v1033_v49 = vsel %vm1002_vm3, %v1031_v16, %v1032_v31  ;;  %v686_v16 = vrot.slane %v5610_v27, 2 }
 0x126   :  { %4207 = vmatmul.msk.bf16.gmra.mxu3 %vm250_vm2, %v1093_v59  ;;  %v741_v59 = vpack.c.bf16 %v682_v3, %v680_v41  ;;  %v1036_v3 = vrot.slane %v5600_v25, 3 }
 0x128   :  { %v552_v5 = vpop.f32.mrf.mxu2 }
 0x129   :  { %v635_v15 = vpop.f32.mrf.mxu3  ;;  %v347_v37 = vpop.f32.mrf.mxu0 }
 0x12a   :  { %v5912_v47 = vadd.f32 %v635_v15, %v552_v5  ;;  %v466_v21 = vpop.f32.mrf.mxu1  ;;  %v1094_v15 = vpack.c.bf16 %v1035_v50, %v1033_v49  ;;  %v1038_v49 = vrot.slane %v5605_v26, 3  ;;  %v1039_v50 = vrot.slane %v5610_v27, 3 }
 0x12b   :  { %v5917_v40 = vadd.f32 %v466_v21, %v347_v37  ;;  %v685_v21 = vrot.slane %v5605_v26, 2 }
 0x12c   :  { %7439 = vst [vmem:[#allocation10_spill] sm:$0xff] %v5912_v47 }
 0x130   :  { %v554_v29 = vpop.f32.mrf.mxu2 }
 0x131   :  { %v637_v4 = vpop.f32.mrf.mxu3  ;;  %v350_v5 = vpop.f32.mrf.mxu0 }
 0x132   :  { %v5923_v12 = vadd.f32 %v637_v4, %v554_v29  ;;  %v469_v13 = vpop.f32.mrf.mxu1  ;;  %v687_v4 = vsel %vm287_vm0, %v685_v21, %v686_v16 }
 0x133   :  { %v5925_v47 = vadd.f32 %v469_v13, %v350_v5  ;;  %v1037_v5 = vsel %vm1002_vm3, %v1034_v0, %v1036_v3  ;;  %v1043_v3 = vrot.slane %v5631_v39, 3 }
 0x134   :  { %7440 = vst [vmem:[#allocation11_spill] sm:$0xff] %v5923_v12  ;;  %4136 = vmatmul.msk.bf16.gmra.mxu0 %vm250_vm2, %v741_v59 }
 0x135   :  { %7441 = vst [vmem:[#allocation12_spill] sm:$0xff] %v5925_v47  ;;  %4160 = vmatmul.msk.bf16.gmra.mxu1 %vm250_vm2, %v741_v59  ;;  %4184 = vmatmul.msk.bf16.gmra.mxu2 %vm250_vm2, %v1094_v15  ;;  %v684_v59 = vsel %vm287_vm0, %v681_v45, %v683_v8  ;;  %v690_v8 = vrot.slane %v5631_v39, 2 }
 0x136   :  { %4208 = vmatmul.msk.bf16.gmra.mxu3 %vm250_vm2, %v1094_v15  ;;  %v1040_v15 = vsel %vm1002_vm3, %v1038_v49, %v1039_v50 }
 0x137   :  { %v1095_v47 = vpack.c.bf16 %v1040_v15, %v1037_v5 }
 0x138   :  { %v557_v14 = vpop.f32.mrf.mxu2 }
 0x139   :  { %v640_v37 = vpop.f32.mrf.mxu3  ;;  %v352_v36 = vpop.f32.mrf.mxu0 }
 0x13a   :  { %v5934_v31 = vadd.f32 %v640_v37, %v557_v14  ;;  %v471_v41 = vpop.f32.mrf.mxu1  ;;  %v742_v14 = vpack.c.bf16 %v687_v4, %v684_v59 }
 0x13b   :  { %v5939_v29 = vadd.f32 %v471_v41, %v352_v36  ;;  %v688_v36 = vrot.slane %v5626_v38, 2 }
 0x13c   :  { %7442 = vst [vmem:[#allocation13_spill] sm:$0xff] %v5934_v31 }
 0x13d   :  { %v689_v59 = vsel %vm287_vm0, %v686_v16, %v688_v36 }
 0x140   :  { %v559_v13 = vpop.f32.mrf.mxu2 }
 0x141   :  { %v642_v37 = vpop.f32.mrf.mxu3  ;;  %v355_v31 = vpop.f32.mrf.mxu0 }
 0x142   :  { %v5945_v25 = vadd.f32 %v642_v37, %v559_v13  ;;  %v474_v26 = vpop.f32.mrf.mxu1 }
 0x143   :  { %v5947_v12 = vadd.f32 %v474_v26, %v355_v31  ;;  %v1041_v31 = vrot.slane %v5626_v38, 3 }
 0x144   :  { %4137 = vmatmul.msk.bf16.gmra.mxu0 %vm250_vm2, %v742_v14 }
 0x145   :  { %4161 = vmatmul.msk.bf16.gmra.mxu1 %vm250_vm2, %v742_v14  ;;  %4185 = vmatmul.msk.bf16.gmra.mxu2 %vm250_vm2, %v1095_v47  ;;  %v1042_v4 = vsel %vm1002_vm3, %v1039_v50, %v1041_v31  ;;  %v1044_v5 = vsel %vm1002_vm3, %v1041_v31, %v1043_v3  ;;  %v692_v50 = vrot.slane %v5648_v54, 2 }
 0x146   :  { %4209 = vmatmul.msk.bf16.gmra.mxu3 %vm250_vm2, %v1095_v47  ;;  %v691_v47 = vsel %vm287_vm0, %v688_v36, %v690_v8  ;;  %v1096_v26 = vpack.c.bf16 %v1044_v5, %v1042_v4  ;;  %v1048_v4 = vrot.slane %v5658_v56, 3 }
 0x147   :  { %v743_v13 = vpack.c.bf16 %v691_v47, %v689_v59  ;;  %v1046_v47 = vrot.slane %v5653_v55, 3 }
 0x148   :  { %v562_v27 = vpop.f32.mrf.mxu2 }
 0x149   :  { %v645_v45 = vpop.f32.mrf.mxu3  ;;  %v357_v0 = vpop.f32.mrf.mxu0 }
 0x14a   :  { %v5955_v21 = vadd.f32 %v645_v45, %v562_v27  ;;  %v476_v41 = vpop.f32.mrf.mxu1 }
 0x14b   :  { %v5959_v49 = vadd.f32 %v476_v41, %v357_v0  ;;  %v695_v41 = vrot.slane %v5658_v56, 2 }
 0x150   :  { %v564_v15 = vpop.f32.mrf.mxu2 }
 0x151   :  { %v647_v14 = vpop.f32.mrf.mxu3  ;;  %v806_v37 = vpop.f32.mrf.mxu0 }
 0x152   :  { %v5965_v27 = vadd.f32 %v647_v14, %v564_v15  ;;  %v866_v38 = vadd.f32 %v806_v37, %v5639_v53  ;;  %v918_v39 = vpop.f32.mrf.mxu1  ;;  %v693_v53 = vrot.slane %v5653_v55, 2 }
 0x153   :  { %v978_v45 = vadd.f32 %v918_v39, %v5663_v2  ;;  %v1045_v2 = vrot.slane %v5648_v54, 3  ;;  %v1049_v54 = vsel %vm1002_vm3, %v1046_v47, %v1048_v4 }
 0x154   :  { %4138 = vmatmul.msk.bf16.gmra.mxu0 %vm250_vm2, %v743_v13  ;;  %v694_v15 = vsel %vm287_vm0, %v692_v50, %v693_v53  ;;  %v5115_v50 = vld [vmem:[%s7430_s20 + $0x48] sm:$0x30] }
 0x155   :  { %4162 = vmatmul.msk.bf16.gmra.mxu1 %vm250_vm2, %v743_v13  ;;  %4186 = vmatmul.msk.bf16.gmra.mxu2 %vm250_vm2, %v1096_v26  ;;  %v696_v13 = vsel %vm287_vm0, %v693_v53, %v695_v41  ;;  %v1047_v14 = vsel %vm1002_vm3, %v1045_v2, %v1046_v47  ;;  %v699_v53 = vrot.slane %v5686_v24, 2  ;;  %v700_v2 = vrot.slane %v5691_v28, 2 }
 0x156   :  { %4210 = vmatmul.msk.bf16.gmra.mxu3 %vm250_vm2, %v1096_v26  ;;  %v1097_v55 = vpack.c.bf16 %v1049_v54, %v1047_v14  ;;  %v1050_v14 = vrot.slane %v5681_v23, 3  ;;  %v1052_v54 = vrot.slane %v5686_v24, 3 }
 0x157   :  { %v701_v24 = vsel %vm287_vm0, %v699_v53, %v700_v2 }
 0x158   :  { %v1159_v16 = vpop.f32.mrf.mxu2 }
 0x159   :  { %v5974_v0 = vadd.f32 %v1159_v16, %v866_v38  ;;  %v1271_v36 = vpop.f32.mrf.mxu3  ;;  %v808_v8 = vpop.f32.mrf.mxu0  ;;  %v5113_v16 = vld [vmem:[%s7429_s26 + $0x48] sm:$0x30] }
 0x15a   :  { %v5979_v31 = vadd.f32 %v1271_v36, %v978_v45  ;;  %v5982_v3 = vadd.f32 %v808_v8, %v5665_v6  ;;  %v920_v59 = vpop.f32.mrf.mxu1  ;;  %v744_v6 = vpack.c.bf16 %v696_v13, %v694_v15  ;;  %v4224_v45 = vld [vmem:[%s7429_s26 + $0x48] sm:$0xf]  ;;  %v697_v8 = vrot.slane %v5681_v23, 2 }
 0x15b   :  { %v5987_v5 = vadd.f32 %v920_v59, %v5671_v20 }
 0x15c   :  { %v698_v23 = vsel %vm287_vm0, %v695_v41, %v697_v8  ;;  %v5114_v41 = vld [vmem:[%s7430_s20 + $0x40] sm:$0xff] }
 0x160   :  { %v5993_v37 = vpop.f32.mrf.mxu2 }
 0x161   :  { %v5995_v26 = vpop.f32.mrf.mxu3  ;;  %v811_v38 = vpop.f32.mrf.mxu0 }
 0x162   :  { %v868_v56 = vadd.f32 %v811_v38, %v5673_v22  ;;  %v923_v39 = vpop.f32.mrf.mxu1  ;;  %v4248_v22 = vld [vmem:[%s7430_s20 + $0x48] sm:$0xf] }
 0x163   :  { %v980_v20 = vadd.f32 %v923_v39, %v5710_v52  ;;  %v4225_v52 = vor.u32 %v5113_v16, %v4224_v45  ;;  %v4249_v59 = vor.u32 %v5115_v50, %v4248_v22  ;;  %v1053_v45 = vrot.slane %v5691_v28, 3 }
 0x164   :  { %4139 = vmatmul.msk.bf16.gmra.mxu0 %vm250_vm2, %v744_v6 }
 0x165   :  { %4163 = vmatmul.msk.bf16.gmra.mxu1 %vm250_vm2, %v744_v6  ;;  %4187 = vmatmul.msk.bf16.gmra.mxu2 %vm250_vm2, %v1097_v55  ;;  %v1501_v6 = vsel %vm287_vm0, %v4225_v52, 0  ;;  %v1054_v22 = vsel %vm1002_vm3, %v1052_v54, %v1053_v45  ;;  %v745_v52 = vpack.c.bf16 %v701_v24, %v698_v23  ;;  %v704_v54 = vrot.slane %v5761_v51, 2 }
 0x166   :  { %4211 = vmatmul.msk.bf16.gmra.mxu3 %vm250_vm2, %v1097_v55  ;;  %1509 = vmatpush.bf16.msra.mxu0 %v1501_v6  ;;  %v1057_v23 = vrot.slane %v5761_v51, 3 }
 0x168   :  { %v1164_v36 = vpop.f32.mrf.mxu2 }
 0x169   :  { %v6018_v47 = vadd.f32 %v1164_v36, %v868_v56  ;;  %v1276_v15 = vpop.f32.mrf.mxu3  ;;  %v813_v13 = vpop.f32.mrf.mxu0  ;;  %v1613_v56 = vsel %vm287_vm0, %v4249_v59, 0 }
 0x16a   :  { %v6023_v38 = vadd.f32 %v1276_v15, %v980_v20  ;;  %v6026_v55 = vadd.f32 %v813_v13, %v5713_v62  ;;  %v925_v39 = vpop.f32.mrf.mxu1  ;;  %1621 = vmatpush.bf16.msra.mxu1 %v1613_v56  ;;  %v1051_v20 = vsel %vm1002_vm3, %v1048_v4, %v1050_v14  ;;  %v1055_v56 = vrot.slane %v5756_v46, 3 }
 0x16b   :  { %v6031_v16 = vadd.f32 %v925_v39, %v5742_v42  ;;  %v1098_v36 = vpack.c.bf16 %v1054_v22, %v1051_v20  ;;  %v5112_v42 = vld [vmem:[%s7429_s26 + $0x40] sm:$0xff] }
 0x16c   :  { %1510 = vmatpush.bf16.msra.mxu0 %v5112_v42 }
 0x16e   :  { %1622 = vmatpush.bf16.msra.mxu1 %v5114_v41 }
 0x170   :  { %v6037_v62 = vpop.f32.mrf.mxu2 }
 0x171   :  { %v6039_v50 = vpop.f32.mrf.mxu3  ;;  %v816_v28 = vpop.f32.mrf.mxu0 }
 0x172   :  { %v870_v8 = vadd.f32 %v816_v28, %v5744_v44  ;;  %v928_v4 = vpop.f32.mrf.mxu1  ;;  %v702_v44 = vrot.slane %v5756_v46, 2  ;;  %v1058_v28 = vsel %vm1002_vm3, %v1055_v56, %v1057_v23 }
 0x173   :  { %v982_v53 = vadd.f32 %v928_v4, %v5765_v7 }
 0x174   :  { %4140 = vmatmul.msk.bf16.gmra.mxu0 %vm250_vm2, %v745_v52  ;;  %v703_v20 = vsel %vm287_vm0, %v700_v2, %v702_v44  ;;  %v705_v22 = vsel %vm287_vm0, %v702_v44, %v704_v54 }
 0x175   :  { %4164 = vmatmul.msk.bf16.gmra.mxu1 %vm250_vm2, %v745_v52  ;;  %4188 = vmatmul.msk.bf16.gmra.mxu2 %vm250_vm2, %v1098_v36  ;;  %v1056_v52 = vsel %vm1002_vm3, %v1053_v45, %v1055_v56  ;;  %v5265_v45 = vld [vmem:[%s7409_s0] sm:$0xff] }
 0x176   :  { %4212 = vmatmul.msk.bf16.gmra.mxu3 %vm250_vm2, %v1098_v36  ;;  %v1099_v46 = vpack.c.bf16 %v1058_v28, %v1056_v52  ;;  %v1356_v4 = vrot.slane %v5265_v45, 4  ;;  %v7446_v45 = vld [vmem:[#allocation5_spill] sm:$0xff] }
 0x178   :  { %v1169_v59 = vpop.f32.mrf.mxu2 }
 0x179   :  { %v6053_v15 = vadd.f32 %v1169_v59, %v870_v8  ;;  %v1281_v13 = vpop.f32.mrf.mxu3  ;;  %v818_v14 = vpop.f32.mrf.mxu0 }
 0x17a   :  { %v6057_v7 = vadd.f32 %v1281_v13, %v982_v53  ;;  %v6060_v6 = vadd.f32 %v818_v14, %v5767_v9  ;;  %v930_v39 = vpop.f32.mrf.mxu1  ;;  %v746_v9 = vpack.c.bf16 %v705_v22, %v703_v20  ;;  %v7444_v20 = vld [vmem:[#allocation3_spill] sm:$0xff] }
 0x17b   :  { %v6065_v24 = vadd.f32 %v930_v39, %v5773_v34  ;;  %v7443_v39 = vld [vmem:[#allocation2_spill] sm:$0xff] }
 0x180   :  { %v6071_v36 = vpop.f32.mrf.mxu2 }
 0x181   :  { %v6073_v42 = vpop.f32.mrf.mxu3  ;;  %v821_v41 = vpop.f32.mrf.mxu0 }
 0x182   :  { %v872_v51 = vadd.f32 %v821_v41, %v5775_v1  ;;  %v933_v8 = vpop.f32.mrf.mxu1  ;;  %v5266_v1 = vld [vmem:[%s7409_s0 + $0x8] sm:$0xff] }
 0x183   :  { %v984_v34 = vadd.f32 %v933_v8, %v5784_v61  ;;  %v1357_v53 = vrot.slane %v5266_v1, 4  ;;  %v5267_v61 = vld [vmem:[%s7409_s0 + $0x10] sm:$0xff] }
 0x184   :  { %4141 = vmatmul.msk.bf16.gmra.mxu0 %vm250_vm2, %v746_v9  ;;  %v1359_v59 = vrot.slane %v5267_v61, 4  ;;  %v7445_v8 = vld [vmem:[#allocation4_spill] sm:$0xff] }
 0x185   :  { %4165 = vmatmul.msk.bf16.gmra.mxu1 %vm250_vm2, %v746_v9  ;;  %4189 = vmatmul.msk.bf16.gmra.mxu2 %vm250_vm2, %v1099_v46  ;;  %v1358_v52 = vsel %vm1355_vm4, %v1356_v4, %v1357_v53 }
 0x186   :  { %4213 = vmatmul.msk.bf16.gmra.mxu3 %vm250_vm2, %v1099_v46  ;;  %v1360_v28 = vsel %vm1355_vm4, %v1357_v53, %v1359_v59 }
 0x187   :  { %v1441_v41 = vpack.c.bf16 %v1360_v28, %v1358_v52  ;;  %v5270_v52 = vld [vmem:[%s7409_s0 + $0x28] sm:$0xff] }
 0x188   :  { %v1174_v2 = vpop.f32.mrf.mxu2  ;;  %v1364_v28 = vrot.slane %v5270_v52, 4 }
 0x189   :  { %v6090_v13 = vadd.f32 %v1174_v2, %v872_v51  ;;  %v1286_v14 = vpop.f32.mrf.mxu3  ;;  %v823_v44 = vpop.f32.mrf.mxu0 }
 0x18a   :  { %v6092_v54 = vadd.f32 %v1286_v14, %v984_v34  ;;  %v6095_v56 = vadd.f32 %v823_v44, %v7443_v39  ;;  %v935_v23 = vpop.f32.mrf.mxu1  ;;  %v5268_v44 = vld [vmem:[%s7409_s0 + $0x18] sm:$0xf] }
 0x18b   :  { %v6098_v22 = vadd.f32 %v935_v23, %v7444_v20  ;;  %v1361_v39 = vrot.slane %v5268_v44, 4  ;;  %v5269_v23 = vld [vmem:[%s7409_s0 + $0x20] sm:$0xff] }
 0x18c   :  { %v1363_v20 = vrot.slane %v5269_v23, 4 }
 0x190   :  { %v6102_v9 = vpop.f32.mrf.mxu2 }
 0x191   :  { %v6104_v46 = vpop.f32.mrf.mxu3  ;;  %v826_v51 = vpop.f32.mrf.mxu0 }
 0x192   :  { %v874_v34 = vadd.f32 %v826_v51, %v7445_v8  ;;  %v938_v2 = vpop.f32.mrf.mxu1 }
 0x193   :  { %v986_v1 = vadd.f32 %v938_v2, %v7446_v45  ;;  %v1362_v2 = vsel %vm1355_vm4, %v1359_v59, %v1361_v39  ;;  %v1365_v45 = vsel %vm1355_vm4, %v1363_v20, %v1364_v28  ;;  %v5271_v39 = vld [vmem:[%s7409_s0 + $0x30] sm:$0xff] }
 0x194   :  { %4226 = vmatmul.msk.bf16.vlgmr.msra.gmra.mxu0 %vm250_vm2, %v1441_v41  ;;  %v1442_v44 = vpack.c.bf16 %v1365_v45, %v1362_v2  ;;  %v1366_v20 = vrot.slane %v5271_v39, 4 }
 0x195   :  { %4250 = vmatmul.msk.bf16.vlgmr.msra.gmra.mxu1 %vm250_vm2, %v1441_v41 }
 0x196   :  { %v1367_v2 = vsel %vm1355_vm4, %v1364_v28, %v1366_v20 }
 0x198   :  { %v1179_v61 = vpop.f32.mrf.mxu2 }
 0x199   :  { %v6110_v14 = vadd.f32 %v1179_v61, %v874_v34  ;;  %v1291_v4 = vpop.f32.mrf.mxu3  ;;  %v828_v53 = vpop.f32.mrf.mxu0 }
 0x19a   :  { %v6121_v41 = vadd.f32 %v1291_v4, %v986_v1  ;;  %v6124_v51 = vadd.f32 %v828_v53, %v5811_v33  ;;  %v940_v8 = vpop.f32.mrf.mxu1 }
 0x19b   :  { %7447 = vst [vmem:[#allocation2_spill] sm:$0xff] %v6110_v14  ;;  %v6127_v34 = vadd.f32 %v940_v8, %v5817_v30 }
 0x1a0   :  { %v6131_v61 = vpop.f32.mrf.mxu2 }
 0x1a1   :  { %v6133_v23 = vpop.f32.mrf.mxu3  ;;  %v831_v14 = vpop.f32.mrf.mxu0 }
 0x1a2   :  { %v6136_v1 = vadd.f32 %v831_v14, %v5819_v10  ;;  %v943_v4 = vpop.f32.mrf.mxu1  ;;  %v5272_v10 = vld [vmem:[%s7409_s0 + $0x38] sm:$0xf] }
 0x1a3   :  { %v6139_v33 = vadd.f32 %v943_v4, %v5827_v18  ;;  %v1368_v18 = vrot.slane %v5272_v10, 4 }
 0x1a4   :  { %4227 = vmatmul.msk.bf16.gmra.mxu0 %vm250_vm2, %v1442_v44 }
 0x1a5   :  { %7448 = vst [vmem:[#allocation3_spill] sm:$0xff] %v6139_v33  ;;  %4251 = vmatmul.msk.bf16.gmra.mxu1 %vm250_vm2, %v1442_v44  ;;  %v1369_v45 = vsel %vm1355_vm4, %v1366_v20, %v1368_v18  ;;  %v5273_v18 = vld [vmem:[%s7409_s0 + $0x40] sm:$0xff] }
 0x1a6   :  { %v1443_v4 = vpack.c.bf16 %v1369_v45, %v1367_v2  ;;  %v5275_v2 = vld [vmem:[%s7409_s0 + $0x50] sm:$0xff] }
 0x1a7   :  { %v1373_v45 = vrot.slane %v5275_v2, 4 }
 0x1a8   :  { %v6143_v30 = vpop.f32.mrf.mxu2 }
 0x1a9   :  { %v6145_v59 = vpop.f32.mrf.mxu3  ;;  %v833_v53 = vpop.f32.mrf.mxu0 }
 0x1aa   :  { %7449 = vst [vmem:[#allocation4_spill] sm:$0xff] %v6145_v59  ;;  %v6154_v14 = vadd.f32 %v833_v53, %v5831_v19  ;;  %v945_v52 = vpop.f32.mrf.mxu1  ;;  %v7454_v19 = vld [vmem:[#allocation6_spill] sm:$0xff] }
 0x1ab   :  { %v6157_v8 = vadd.f32 %v945_v52, %v5837_v32  ;;  %v1370_v52 = vrot.slane %v5273_v18, 4 }
 0x1ad   :  { %7450 = vst [vmem:[#allocation5_spill] sm:$0xff] %v6157_v8  ;;  %v7461_v8 = vld [vmem:[#allocation8_spill] sm:$0xff] }
 0x1b0   :  { %v6161_v44 = vpop.f32.mrf.mxu2 }
 0x1b1   :  { %7451 = vst [vmem:[#allocation14_spill] sm:$0xff] %v6161_v44  ;;  %v6163_v39 = vpop.f32.mrf.mxu3  ;;  %v836_v59 = vpop.f32.mrf.mxu0 }
 0x1b2   :  { %7452 = vst [vmem:[#allocation15_spill] sm:$0xff] %v6163_v39  ;;  %v6166_v33 = vadd.f32 %v836_v59, %v5839_v57  ;;  %v948_v10 = vpop.f32.mrf.mxu1  ;;  %v5274_v57 = vld [vmem:[%s7409_s0 + $0x48] sm:$0xff] }
 0x1b3   :  { %v6169_v53 = vadd.f32 %v948_v10, %v7454_v19  ;;  %v1371_v59 = vrot.slane %v5274_v57, 4  ;;  %v7458_v19 = vld [vmem:[#allocation7_spill] sm:$0xff] }
 0x1b4   :  { %7453 = vst [vmem:[#allocation16_spill] sm:$0xff] %v6166_v33  ;;  %4228 = vmatmul.msk.bf16.gmra.mxu0 %vm250_vm2, %v1443_v4 }
 0x1b5   :  { %7455 = vst [vmem:[#allocation6_spill] sm:$0xff] %v6169_v53  ;;  %4252 = vmatmul.msk.bf16.gmra.mxu1 %vm250_vm2, %v1443_v4  ;;  %v1372_v53 = vsel %vm1355_vm4, %v1370_v52, %v1371_v59  ;;  %v1374_v18 = vsel %vm1355_vm4, %v1371_v59, %v1373_v45 }
 0x1b6   :  { %v1444_v33 = vpack.c.bf16 %v1374_v18, %v1372_v53  ;;  %v5276_v53 = vld [vmem:[%s7409_s0 + $0x58] sm:$0xf]  ;;  %v5278_v18 = vld [vmem:[%s7409_s0 + $0x68] sm:$0xff] }
 0x1b8   :  { %v6173_v32 = vpop.f32.mrf.mxu2 }
 0x1b9   :  { %7456 = vst [vmem:[#allocation17_spill] sm:$0xff] %v6173_v32  ;;  %v6175_v28 = vpop.f32.mrf.mxu3  ;;  %v838_v20 = vpop.f32.mrf.mxu0 }
 0x1ba   :  { %7457 = vst [vmem:[#allocation18_spill] sm:$0xff] %v6175_v28  ;;  %v6187_v4 = vadd.f32 %v838_v20, %v5853_v35  ;;  %v950_v10 = vpop.f32.mrf.mxu1  ;;  %v7463_v35 = vld [vmem:[#allocation9_spill] sm:$0xff] }
 0x1bb   :  { %v6190_v28 = vadd.f32 %v950_v10, %v7458_v19  ;;  %v1375_v19 = vrot.slane %v5276_v53, 4 }
 0x1bd   :  { %7459 = vst [vmem:[#allocation7_spill] sm:$0xff] %v6190_v28 }
 0x1c0   :  { %v6194_v32 = vpop.f32.mrf.mxu2 }
 0x1c1   :  { %v6196_v57 = vpop.f32.mrf.mxu3  ;;  %v841_v39 = vpop.f32.mrf.mxu0 }
 0x1c2   :  { %7460 = vst [vmem:[#allocation19_spill] sm:$0xff] %v6196_v57  ;;  %v6199_v44 = vadd.f32 %v841_v39, %v7461_v8  ;;  %v953_v2 = vpop.f32.mrf.mxu1  ;;  %v5277_v8 = vld [vmem:[%s7409_s0 + $0x60] sm:$0xff] }
 0x1c3   :  { %v6202_v20 = vadd.f32 %v953_v2, %v7463_v35  ;;  %v1377_v39 = vrot.slane %v5277_v8, 4 }
 0x1c4   :  { %7462 = vst [vmem:[#allocation8_spill] sm:$0xff] %v6199_v44  ;;  %4229 = vmatmul.msk.bf16.gmra.mxu0 %vm250_vm2, %v1444_v33 }
 0x1c5   :  { %7464 = vst [vmem:[#allocation9_spill] sm:$0xff] %v6202_v20  ;;  %4253 = vmatmul.msk.bf16.gmra.mxu1 %vm250_vm2, %v1444_v33  ;;  %v1378_v33 = vrot.slane %v5278_v18, 4  ;;  %v1376_v20 = vsel %vm1355_vm4, %v1373_v45, %v1375_v19 }
 0x1c7   :  { %v1379_v53 = vsel %vm1355_vm4, %v1377_v39, %v1378_v33 }
 0x1c8   :  { %v6206_v52 = vpop.f32.mrf.mxu2  ;;  %v1445_v44 = vpack.c.bf16 %v1379_v53, %v1376_v20  ;;  %v5279_v20 = vld [vmem:[%s7409_s0 + $0x70] sm:$0xff] }
 0x1c9   :  { %7465 = vst [vmem:[#allocation20_spill] sm:$0xff] %v6206_v52  ;;  %v6208_v59 = vpop.f32.mrf.mxu3  ;;  %v843_v10 = vpop.f32.mrf.mxu0  ;;  %v1380_v39 = vrot.slane %v5279_v20, 4 }
 0x1ca   :  { %7466 = vst [vmem:[#allocation21_spill] sm:$0xff] %v6208_v59  ;;  %v6220_v2 = vadd.f32 %v843_v10, %v5875_v43  ;;  %v955_v35 = vpop.f32.mrf.mxu1 }
 0x1cb   :  { %v6223_v59 = vadd.f32 %v955_v35, %v5881_v58  ;;  %v1381_v53 = vsel %vm1355_vm4, %v1378_v33, %v1380_v39 }
 0x1d0   :  { %v6227_v52 = vpop.f32.mrf.mxu2 }
 0x1d1   :  { %v6229_v8 = vpop.f32.mrf.mxu3  ;;  %v846_v57 = vpop.f32.mrf.mxu0 }
 0x1d2   :  { %7467 = vst [vmem:[#allocation22_spill] sm:$0xff] %v6229_v8  ;;  %v882_v28 = vadd.f32 %v846_v57, %v5883_v48  ;;  %v958_v18 = vpop.f32.mrf.mxu1  ;;  %v5280_v48 = vld [vmem:[%s7409_s0 + $0x78] sm:$0xf] }
 0x1d3   :  { %v994_v43 = vadd.f32 %v958_v18, %v5891_v11  ;;  %v1382_v57 = vrot.slane %v5280_v48, 4  ;;  %v7471_v48 = vld [vmem:[#allocation10_spill] sm:$0xff] }
 0x1d4   :  { %4230 = vmatmul.msk.bf16.gmra.mxu0 %vm250_vm2, %v1445_v44 }
 0x1d5   :  { %4254 = vmatmul.msk.bf16.gmra.mxu1 %vm250_vm2, %v1445_v44  ;;  %v1383_v18 = vsel %vm1355_vm4, %v1380_v39, %v1382_v57 }
 0x1d8   :  { %v1199_v58 = vpop.f32.mrf.mxu2 }
 0x1d9   :  { %v6235_v10 = vadd.f32 %v1199_v58, %v882_v28  ;;  %v1311_v45 = vpop.f32.mrf.mxu3  ;;  %v848_v19 = vpop.f32.mrf.mxu0  ;;  %v1446_v58 = vpack.c.bf16 %v1383_v18, %v1381_v53 }
 0x1da   :  { %v6243_v11 = vadd.f32 %v1311_v45, %v994_v43  ;;  %v6246_v35 = vadd.f32 %v848_v19, %v5895_v17  ;;  %v960_v44 = vpop.f32.mrf.mxu1  ;;  %v5282_v45 = vld [vmem:[%s7409_s0 + $0x88] sm:$0xff] }
 0x1db   :  { %7468 = vst [vmem:[#allocation23_spill] sm:$0xff] %v6235_v10  ;;  %v6249_v28 = vadd.f32 %v960_v44, %v5901_v60  ;;  %v5281_v60 = vld [vmem:[%s7409_s0 + $0x80] sm:$0xff]  ;;  %v7473_v44 = vld [vmem:[#allocation11_spill] sm:$0xff] }
 0x1dc   :  { %v1384_v33 = vrot.slane %v5281_v60, 4  ;;  %v7474_v60 = vld [vmem:[#allocation12_spill] sm:$0xff] }
 0x1dd   :  { %7469 = vst [vmem:[#allocation24_spill] sm:$0xff] %v6249_v28 }
 0x1e1   :  { %v851_v20 = vpop.f32.mrf.mxu0 }
 0x1e2   :  { %v6254_v10 = vadd.f32 %v851_v20, %v5903_v63  ;;  %v963_v8 = vpop.f32.mrf.mxu1  ;;  %v1385_v63 = vrot.slane %v5282_v45, 4 }
 0x1e3   :  { %v6257_v43 = vadd.f32 %v963_v8, %v7471_v48  ;;  %v5283_v8 = vld [vmem:[%s7409_s0 + $0x90] sm:$0xff] }
 0x1e4   :  { %7470 = vst [vmem:[#allocation25_spill] sm:$0xff] %v6254_v10  ;;  %4231 = vmatmul.msk.bf16.gmra.mxu0 %vm250_vm2, %v1446_v58  ;;  %v1387_v19 = vrot.slane %v5283_v8, 4  ;;  %v1386_v18 = vsel %vm1355_vm4, %v1384_v33, %v1385_v63  ;;  %v7475_v10 = vld [vmem:[#allocation13_spill] sm:$0xff] }
 0x1e5   :  { %7472 = vst [vmem:[#allocation10_spill] sm:$0xff] %v6257_v43  ;;  %4255 = vmatmul.msk.bf16.gmra.mxu1 %vm250_vm2, %v1446_v58 }
 0x1e6   :  { %v1388_v58 = vsel %vm1355_vm4, %v1385_v63, %v1387_v19  ;;  %v5285_v63 = vld [vmem:[%s7409_s0 + $0xa0] sm:$0xff] }
 0x1e7   :  { %v1447_v20 = vpack.c.bf16 %v1388_v58, %v1386_v18  ;;  %v1391_v8 = vrot.slane %v5285_v63, 4 }
 0x1e9   :  { %v853_v17 = vpop.f32.mrf.mxu0 }
 0x1ea   :  { %v6271_v39 = vadd.f32 %v853_v17, %v5917_v40  ;;  %v965_v57 = vpop.f32.mrf.mxu1  ;;  %v5284_v17 = vld [vmem:[%s7409_s0 + $0x98] sm:$0xf] }
 0x1eb   :  { %v6274_v53 = vadd.f32 %v965_v57, %v7473_v44  ;;  %v1389_v33 = vrot.slane %v5284_v17, 4 }
 0x1ed   :  { %v1390_v58 = vsel %vm1355_vm4, %v1387_v19, %v1389_v33 }
 0x1f1   :  { %v856_v48 = vpop.f32.mrf.mxu0 }
 0x1f2   :  { %v6279_v45 = vadd.f32 %v856_v48, %v7474_v60  ;;  %v968_v43 = vpop.f32.mrf.mxu1 }
 0x1f3   :  { %v6282_v28 = vadd.f32 %v968_v43, %v7475_v10  ;;  %v5286_v10 = vld [vmem:[%s7409_s0 + $0xa8] sm:$0xff] }
 0x1f4   :  { %4232 = vmatmul.msk.bf16.gmra.mxu0 %vm250_vm2, %v1447_v20  ;;  %v1392_v43 = vrot.slane %v5286_v10, 4 }
 0x1f5   :  { %7476 = vst [vmem:[#allocation11_spill] sm:$0xff] %v6282_v28  ;;  %4256 = vmatmul.msk.bf16.gmra.mxu1 %vm250_vm2, %v1447_v20 }
 0x1f6   :  { %v1393_v20 = vsel %vm1355_vm4, %v1391_v8, %v1392_v43 }
 0x1f7   :  { %v1448_v48 = vpack.c.bf16 %v1393_v20, %v1390_v58 }
 0x1f9   :  { %v858_v40 = vpop.f32.mrf.mxu0 }
 0x1fa   :  { %v6296_v57 = vadd.f32 %v858_v40, %v5939_v29  ;;  %v970_v44 = vpop.f32.mrf.mxu1  ;;  %v5288_v40 = vld [vmem:[%s7409_s0 + $0xb8] sm:$0xf] }
 0x1fb   :  { %v6299_v18 = vadd.f32 %v970_v44, %v5945_v25  ;;  %v5287_v25 = vld [vmem:[%s7409_s0 + $0xb0] sm:$0xff] }
 0x1fc   :  { %v1394_v19 = vrot.slane %v5287_v25, 4 }
 0x1fe   :  { %v1395_v10 = vsel %vm1355_vm4, %v1392_v43, %v1394_v19 }
 0x201   :  { %v861_v60 = vpop.f32.mrf.mxu0 }
 0x202   :  { %v6304_v17 = vadd.f32 %v861_v60, %v5947_v12  ;;  %v973_v63 = vpop.f32.mrf.mxu1  ;;  %v1396_v12 = vrot.slane %v5288_v40, 4  ;;  %v5291_v40 = vld [vmem:[%s7409_s0 + $0xd0] sm:$0xff] }
 0x203   :  { %v6307_v28 = vadd.f32 %v973_v63, %v5955_v21 }
 0x204   :  { %4233 = vmatmul.msk.bf16.gmra.mxu0 %vm250_vm2, %v1448_v48  ;;  %v1397_v44 = vsel %vm1355_vm4, %v1394_v19, %v1396_v12  ;;  %v1401_v12 = vrot.slane %v5291_v40, 4 }
 0x205   :  { %4257 = vmatmul.msk.bf16.gmra.mxu1 %vm250_vm2, %v1448_v48  ;;  %v1449_v58 = vpack.c.bf16 %v1397_v44, %v1395_v10 }
 0x209   :  { %v863_v29 = vpop.f32.mrf.mxu0 }
 0x20a   :  { %v6318_v33 = vadd.f32 %v863_v29, %v5959_v49  ;;  %v975_v21 = vpop.f32.mrf.mxu1  ;;  %v1220_v49 = vadd.f32 %v5993_v37, %v5982_v3  ;;  %v5289_v29 = vld [vmem:[%s7409_s0 + $0xc0] sm:$0xff] }
 0x20b   :  { %v6321_v8 = vadd.f32 %v975_v21, %v5965_v27  ;;  %v1332_v27 = vadd.f32 %v5995_v26, %v5987_v5  ;;  %v6345_v5 = vld [vmem:[%s7410_s3] ss:$0 sm:$0xff] }
 0x211   :  { %v1512_v20 = vpop.f32.mrf.mxu0 }
 0x212   :  { %v1572_v48 = vadd.f32 %v1512_v20, %v5974_v0  ;;  %v1624_v60 = vpop.f32.mrf.mxu1  ;;  %v1398_v0 = vrot.slane %v5289_v29, 4 }
 0x213   :  { %v1684_v63 = vadd.f32 %v1624_v60, %v5979_v31  ;;  %v5290_v31 = vld [vmem:[%s7409_s0 + $0xc8] sm:$0xff] }
 0x214   :  { %4234 = vmatmul.msk.bf16.gmra.mxu0 %vm250_vm2, %v1449_v58  ;;  %v1399_v19 = vrot.slane %v5290_v31, 4 }
 0x215   :  { %v1708_v25 = vmax.f32 %v1572_v48, %v1684_v63  ;;  %4258 = vmatmul.msk.bf16.gmra.mxu1 %vm250_vm2, %v1449_v58 }
 0x216   :  { %v1400_v10 = vsel %vm1355_vm4, %v1398_v0, %v1399_v19  ;;  %v1402_v44 = vsel %vm1355_vm4, %v1399_v19, %v1401_v12  ;;  %v1222_v0 = vadd.f32 %v6037_v62, %v6026_v55  ;;  %v5292_v19 = vld [vmem:[%s7409_s0 + $0xd8] sm:$0xf] }
 0x217   :  { %v1736_v58 = vadd.f32 %v6345_v5, %v1708_v25  ;;  %v1450_v48 = vpack.c.bf16 %v1402_v44, %v1400_v10  ;;  %v1334_v25 = vadd.f32 %v6039_v50, %v6031_v16 }
 0x219   :  { %v1514_v43 = vpop.f32.mrf.mxu0 }
 0x21a   :  { %v1573_v3 = vadd.f32 %v1514_v43, %v1220_v49  ;;  %v1626_v37 = vpop.f32.mrf.mxu1 }
 0x21b   :  { %v1685_v26 = vadd.f32 %v1626_v37, %v1332_v27 }
 0x21d   :  { %v1709_v21 = vmax.f32 %v1573_v3, %v1685_v26  ;;  %v5294_v3 = vld [vmem:[%s7409_s0 + $0xe8] sm:$0xff] }
 0x21e   :  { %v1406_v37 = vrot.slane %v5294_v3, 4 }
 0x21f   :  { %v1737_v20 = vadd.f32 %v6345_v5, %v1709_v21 }
 0x221   :  { %v1517_v60 = vpop.f32.mrf.mxu0  ;;  %v6351_v63 = vpack.c.bf16 %v1737_v20, %v1736_v58 }
 0x222   :  { %v1574_v49 = vadd.f32 %v1517_v60, %v6018_v47  ;;  %v1629_v43 = vpop.f32.mrf.mxu1  ;;  %v1403_v47 = vrot.slane %v5292_v19, 4 }
 0x223   :  { %v1686_v29 = vadd.f32 %v1629_v43, %v6023_v38  ;;  %v5293_v38 = vld [vmem:[%s7409_s0 + $0xe0] sm:$0xff] }
 0x224   :  { %4235 = vmatmul.msk.bf16.gmra.mxu0 %vm250_vm2, %v1450_v48  ;;  %v1405_v40 = vrot.slane %v5293_v38, 4  ;;  %v1404_v50 = vsel %vm1355_vm4, %v1401_v12, %v1403_v47  ;;  %v1224_v12 = vadd.f32 %v6071_v36, %v6060_v6 }
 0x225   :  { %v1710_v27 = vmax.f32 %v1574_v49, %v1686_v29  ;;  %4259 = vmatmul.msk.bf16.gmra.mxu1 %vm250_vm2, %v1450_v48 }
 0x226   :  { %v1407_v21 = vsel %vm1355_vm4, %v1405_v40, %v1406_v37 }
 0x227   :  { %v1738_v10 = vadd.f32 %v6345_v5, %v1710_v27  ;;  %v1451_v58 = vpack.c.bf16 %v1407_v21, %v1404_v50  ;;  %v1336_v27 = vadd.f32 %v6073_v42, %v6065_v24 }
 0x229   :  { %v1519_v31 = vpop.f32.mrf.mxu0 }
 0x22a   :  { %v1575_v55 = vadd.f32 %v1519_v31, %v1222_v0  ;;  %v1631_v62 = vpop.f32.mrf.mxu1 }
 0x22b   :  { %v1687_v26 = vadd.f32 %v1631_v62, %v1334_v25  ;;  %v5295_v25 = vld [vmem:[%s7409_s0 + $0xf0] sm:$0xff] }
 0x22d   :  { %v1711_v16 = vmax.f32 %v1575_v55, %v1687_v26 }
 0x22f   :  { %v1739_v44 = vadd.f32 %v6345_v5, %v1711_v16 }
 0x231   :  { %v1522_v20 = vpop.f32.mrf.mxu0  ;;  %v6374_v48 = vpack.c.bf16 %v1739_v44, %v1738_v10  ;;  %v1338_v10 = vadd.f32 %v6104_v46, %v6098_v22  ;;  %v1228_v22 = vadd.f32 %v6131_v61, %v6124_v51  ;;  %v1340_v46 = vadd.f32 %v6133_v23, %v6127_v34 }
 0x232   :  { %v1576_v60 = vadd.f32 %v1522_v20, %v6053_v15  ;;  %v1634_v49 = vpop.f32.mrf.mxu1  ;;  %v1408_v15 = vrot.slane %v5295_v25, 4 }
 0x233   :  { %v1688_v43 = vadd.f32 %v1634_v49, %v6057_v7  ;;  %v5296_v7 = vld [vmem:[%s7409_s0 + $0xf8] sm:$0xf] }
 0x234   :  { %4236 = vmatmul.msk.bf16.gmra.mxu0 %vm250_vm2, %v1451_v58  ;;  %v1410_v31 = vrot.slane %v5296_v7, 4  ;;  %v1409_v6 = vsel %vm1355_vm4, %v1406_v37, %v1408_v15  ;;  %v1226_v37 = vadd.f32 %v6102_v9, %v6095_v56 }
 0x235   :  { %v1712_v29 = vmax.f32 %v1576_v60, %v1688_v43  ;;  %4260 = vmatmul.msk.bf16.gmra.mxu1 %vm250_vm2, %v1451_v58 }
 0x236   :  { %v1411_v36 = vsel %vm1355_vm4, %v1408_v15, %v1410_v31 }
 0x237   :  { %v1740_v24 = vadd.f32 %v6345_v5, %v1712_v29  ;;  %v1452_v3 = vpack.c.bf16 %v1411_v36, %v1409_v6  ;;  %v7479_v6 = vld [vmem:[#allocation4_spill] sm:$0xff] }
 0x239   :  { %v1524_v0 = vpop.f32.mrf.mxu0 }
 0x23a   :  { %v1577_v19 = vadd.f32 %v1524_v0, %v1224_v12  ;;  %v1636_v47 = vpop.f32.mrf.mxu1  ;;  %v7477_v12 = vld [vmem:[#allocation2_spill] sm:$0xff] }
 0x23b   :  { %v1689_v38 = vadd.f32 %v1636_v47, %v1336_v27 }
 0x23d   :  { %v1713_v40 = vmax.f32 %v1577_v19, %v1689_v38 }
 0x23f   :  { %v1741_v42 = vadd.f32 %v6345_v5, %v1713_v40  ;;  %v1229_v40 = vadd.f32 %v6143_v30, %v6136_v1 }
 0x241   :  { %v1527_v55 = vpop.f32.mrf.mxu0  ;;  %v6394_v62 = vpack.c.bf16 %v1741_v42, %v1740_v24 }
 0x242   :  { %v1578_v26 = vadd.f32 %v1527_v55, %v6090_v13  ;;  %v1639_v16 = vpop.f32.mrf.mxu1 }
 0x243   :  { %v1690_v50 = vadd.f32 %v1639_v16, %v6092_v54  ;;  %v7482_v16 = vld [vmem:[#allocation15_spill] sm:$0xff] }
 0x244   :  { %4237 = vmatmul.msk.bf16.gmra.mxu0 %vm250_vm2, %v1452_v3 }
 0x245   :  { %v1714_v21 = vmax.f32 %v1578_v26, %v1690_v50  ;;  %4261 = vmatmul.msk.bf16.gmra.mxu1 %vm250_vm2, %v1452_v3  ;;  %v7480_v3 = vld [vmem:[#allocation14_spill] sm:$0xff]  ;;  %v7481_v26 = vld [vmem:[#allocation5_spill] sm:$0xff] }
 0x246   :  { %v1230_v55 = vadd.f32 %v7480_v3, %v6154_v14  ;;  %v1342_v50 = vadd.f32 %v7482_v16, %v7481_v26  ;;  %v1234_v16 = vadd.f32 %v6227_v52, %v6220_v2 }
 0x247   :  { %v1742_v13 = vadd.f32 %v6345_v5, %v1714_v21 }
 0x249   :  { %v1529_v44 = vpop.f32.mrf.mxu0 }
 0x24a   :  { %v1579_v58 = vadd.f32 %v1529_v44, %v1226_v37  ;;  %v1641_v20 = vpop.f32.mrf.mxu1 }
 0x24b   :  { %v1691_v60 = vadd.f32 %v1641_v20, %v1338_v10  ;;  %v7483_v20 = vld [vmem:[#allocation16_spill] sm:$0xff] }
 0x24d   :  { %v1715_v49 = vmax.f32 %v1579_v58, %v1691_v60  ;;  %v7484_v60 = vld [vmem:[#allocation17_spill] sm:$0xff] }
 0x24f   :  { %v1743_v54 = vadd.f32 %v6345_v5, %v1715_v49  ;;  %v1231_v49 = vadd.f32 %v7484_v60, %v7483_v20 }
 0x251   :  { %v1532_v43 = vpop.f32.mrf.mxu0  ;;  %v6406_v29 = vpack.c.bf16 %v1743_v54, %v1742_v13  ;;  %v7485_v13 = vld [vmem:[#allocation6_spill] sm:$0xff] }
 0x252   :  { %v1580_v27 = vadd.f32 %v1532_v43, %v7477_v12  ;;  %v1644_v0 = vpop.f32.mrf.mxu1  ;;  %v7486_v54 = vld [vmem:[#allocation18_spill] sm:$0xff] }
 0x253   :  { %v1692_v56 = vadd.f32 %v1644_v0, %v6121_v41  ;;  %v7478_v41 = vld [vmem:[#allocation3_spill] sm:$0xff]  ;;  %v1343_v43 = vadd.f32 %v7486_v54, %v7485_v13 }
 0x254   :  { %v1341_v36 = vadd.f32 %v7479_v6, %v7478_v41  ;;  %v7489_v6 = vld [vmem:[#allocation8_spill] sm:$0xff] }
 0x255   :  { %v1716_v9 = vmax.f32 %v1580_v27, %v1692_v56 }
 0x257   :  { %v1744_v47 = vadd.f32 %v6345_v5, %v1716_v9 }
 0x259   :  { %v1534_v25 = vpop.f32.mrf.mxu0 }
 0x25a   :  { %v1581_v15 = vadd.f32 %v1534_v25, %v1228_v22  ;;  %v1646_v7 = vpop.f32.mrf.mxu1  ;;  %v1232_v22 = vadd.f32 %v6194_v32, %v6187_v4  ;;  %v7488_v25 = vld [vmem:[#allocation19_spill] sm:$0xff] }
 0x25b   :  { %v1693_v31 = vadd.f32 %v1646_v7, %v1340_v46  ;;  %v7487_v46 = vld [vmem:[#allocation7_spill] sm:$0xff] }
 0x25d   :  { %v1717_v19 = vmax.f32 %v1581_v15, %v1693_v31  ;;  %v1344_v15 = vadd.f32 %v7488_v25, %v7487_v46 }
 0x25f   :  { %v1745_v38 = vadd.f32 %v6345_v5, %v1717_v19 }
 0x261   :  { %v1537_v24 = vpop.f32.mrf.mxu0  ;;  %v6420_v51 = vpack.c.bf16 %v1745_v38, %v1744_v47 }
 0x262   :  { %v1582_v61 = vadd.f32 %v1537_v24, %v1229_v40  ;;  %v1649_v34 = vpop.f32.mrf.mxu1 }
 0x263   :  { %v1694_v23 = vadd.f32 %v1649_v34, %v1341_v36  ;;  %v7490_v36 = vld [vmem:[#allocation20_spill] sm:$0xff]  ;;  %v7492_v34 = vld [vmem:[#allocation21_spill] sm:$0xff] }
 0x264   :  { %v1233_v24 = vadd.f32 %v7490_v36, %v7489_v6 }
 0x265   :  { %v1718_v42 = vmax.f32 %v1582_v61, %v1694_v23  ;;  %v7491_v61 = vld [vmem:[#allocation9_spill] sm:$0xff] }
 0x266   :  { %v1345_v23 = vadd.f32 %v7492_v34, %v7491_v61 }
 0x267   :  { %v1746_v44 = vadd.f32 %v6345_v5, %v1718_v42 }
 0x269   :  { %v1539_v21 = vpop.f32.mrf.mxu0 }
 0x26a   :  { %v1583_v37 = vadd.f32 %v1539_v21, %v1230_v55  ;;  %v1651_v10 = vpop.f32.mrf.mxu1 }
 0x26b   :  { %v1695_v1 = vadd.f32 %v1651_v10, %v1342_v50  ;;  %v7493_v50 = vld [vmem:[#allocation22_spill] sm:$0xff] }
 0x26c   :  { %v1346_v21 = vadd.f32 %v7493_v50, %v6223_v59 }
 0x26d   :  { %v1719_v30 = vmax.f32 %v1583_v37, %v1695_v1  ;;  %v1201_v37 = vpop.f32.mrf.mxu2  ;;  %v1313_v1 = vpop.f32.mrf.mxu3 }
 0x26f   :  { %v1747_v58 = vadd.f32 %v6345_v5, %v1719_v30 }
 0x271   :  { %v1542_v12 = vpop.f32.mrf.mxu0  ;;  %v6432_v14 = vpack.c.bf16 %v1747_v58, %v1746_v44 }
 0x272   :  { %v1584_v27 = vadd.f32 %v1542_v12, %v1231_v49  ;;  %v1654_v0 = vpop.f32.mrf.mxu1 }
 0x273   :  { %v1696_v56 = vadd.f32 %v1654_v0, %v1343_v43  ;;  %v7494_v43 = vld [vmem:[#allocation23_spill] sm:$0xff] }
 0x275   :  { %v1720_v9 = vmax.f32 %v1584_v27, %v1696_v56  ;;  %v1204_v52 = vpop.f32.mrf.mxu2  ;;  %v1316_v59 = vpop.f32.mrf.mxu3  ;;  %v1236_v56 = vadd.f32 %v1201_v37, %v6246_v35  ;;  %v7497_v35 = vld [vmem:[#allocation10_spill] sm:$0xff] }
 0x276   :  { %v1349_v6 = vadd.f32 %v1316_v59, %v7497_v35 }
 0x277   :  { %v1748_v40 = vadd.f32 %v6345_v5, %v1720_v9  ;;  %v7495_v9 = vld [vmem:[#allocation24_spill] sm:$0xff] }
 0x279   :  { %v1544_v7 = vpop.f32.mrf.mxu0 }
 0x27a   :  { %v1585_v31 = vadd.f32 %v1544_v7, %v1232_v22  ;;  %v1656_v19 = vpop.f32.mrf.mxu1  ;;  %v1348_v22 = vadd.f32 %v1313_v1, %v7495_v9 }
 0x27b   :  { %v1697_v47 = vadd.f32 %v1656_v19, %v1344_v15 }
 0x27d   :  { %v1721_v38 = vmax.f32 %v1585_v31, %v1697_v47  ;;  %v1206_v31 = vpop.f32.mrf.mxu2  ;;  %v1318_v47 = vpop.f32.mrf.mxu3 }
 0x27f   :  { %v1749_v41 = vadd.f32 %v6345_v5, %v1721_v38 }
 0x281   :  { %v1547_v42 = vpop.f32.mrf.mxu0  ;;  %v6444_v32 = vpack.c.bf16 %v1749_v41, %v1748_v40  ;;  %v7496_v40 = vld [vmem:[#allocation25_spill] sm:$0xff] }
 0x282   :  { %v1586_v4 = vadd.f32 %v1547_v42, %v1233_v24  ;;  %v1659_v3 = vpop.f32.mrf.mxu1  ;;  %v1237_v41 = vadd.f32 %v1204_v52, %v7496_v40 }
 0x283   :  { %v1698_v55 = vadd.f32 %v1659_v3, %v1345_v23  ;;  %v1238_v3 = vadd.f32 %v1206_v31, %v6271_v39  ;;  %v7498_v39 = vld [vmem:[#allocation11_spill] sm:$0xff] }
 0x285   :  { %v1722_v26 = vmax.f32 %v1586_v4, %v1698_v55  ;;  %v1209_v4 = vpop.f32.mrf.mxu2  ;;  %v1321_v55 = vpop.f32.mrf.mxu3 }
 0x287   :  { %v1750_v60 = vadd.f32 %v6345_v5, %v1722_v26  ;;  %v1350_v26 = vadd.f32 %v1318_v47, %v6274_v53 }
 0x289   :  { %v1549_v10 = vpop.f32.mrf.mxu0 }
 0x28a   :  { %v1587_v30 = vadd.f32 %v1549_v10, %v1234_v16  ;;  %v1661_v44 = vpop.f32.mrf.mxu1 }
 0x28b   :  { %v1699_v58 = vadd.f32 %v1661_v44, %v1346_v21  ;;  %v1239_v44 = vadd.f32 %v1209_v4, %v6279_v45  ;;  %v4264_v45 = vld [vmem:[%s7411_s4] sm:$0xf] }
 0x28d   :  { %v1723_v20 = vmax.f32 %v1587_v30, %v1699_v58  ;;  %v1351_v58 = vadd.f32 %v1321_v55, %v7498_v39  ;;  %v4288_v55 = vld [vmem:[%s7411_s4 + $0x30] sm:$0xf] }
 0x28f   :  { %v1751_v49 = vadd.f32 %v6345_v5, %v1723_v20  ;;  %v1211_v20 = vpop.f32.mrf.mxu2 }
 0x290   :  { %v1240_v52 = vadd.f32 %v1211_v20, %v6296_v57  ;;  %v5127_v20 = vld [vmem:[%s7411_s4 + $0x54] sm:$0xf0] }
 0x291   :  { %v1552_v13 = vpop.f32.mrf.mxu0  ;;  %v1779_v54 = vpack.c.bf16 %v1751_v49, %v1750_v60  ;;  %v1323_v49 = vpop.f32.mrf.mxu3 }
 0x292   :  { %v1588_v12 = vadd.f32 %v1552_v13, %v7494_v43  ;;  %v1664_v27 = vpop.f32.mrf.mxu1 }
 0x293   :  { %v1700_v2 = vadd.f32 %v1664_v27, %v6243_v11  ;;  %1857 = vmatpush.bf16.msra.mxu2 %v1779_v54 }
 0x295   :  { %v1724_v0 = vmax.f32 %v1588_v12, %v1700_v2  ;;  %v1352_v2 = vadd.f32 %v1323_v49, %v6299_v18  ;;  %v4290_v49 = vld [vmem:[%s7411_s4 + $0x38] sm:$0xf0] }
 0x297   :  { %1858 = vmatpush.bf16.msra.mxu2 %v6444_v32  ;;  %v1752_v11 = vadd.f32 %v6345_v5, %v1724_v0 }
 0x299   :  { %v1554_v46 = vpop.f32.mrf.mxu0  ;;  %v1326_v57 = vpop.f32.mrf.mxu3 }
 0x29a   :  { %v1589_v25 = vadd.f32 %v1554_v46, %v1236_v56  ;;  %v1666_v15 = vpop.f32.mrf.mxu1  ;;  %v1353_v18 = vadd.f32 %v1326_v57, %v6307_v28  ;;  %v5119_v28 = vld [vmem:[%s7411_s4 + $0x14] sm:$0xf0]  ;;  %v5133_v57 = vld [vmem:[%s7412_s5 + $0x24] sm:$0xf0] }
 0x29b   :  { %v1701_v7 = vadd.f32 %v1666_v15, %v1348_v22  ;;  %1859 = vmatpush.bf16.msra.mxu2 %v6432_v14 }
 0x29d   :  { %v1725_v19 = vmax.f32 %v1589_v25, %v1701_v7 }
 0x29f   :  { %v1753_v38 = vadd.f32 %v6345_v5, %v1725_v19  ;;  %1860 = vmatpush.bf16.msra.mxu2 %v6420_v51 }
 0x2a1   :  { %v1557_v36 = vpop.f32.mrf.mxu0  ;;  %v6463_v24 = vpack.c.bf16 %v1753_v38, %v1752_v11  ;;  %v1328_v40 = vpop.f32.mrf.mxu3 }
 0x2a2   :  { %v1590_v61 = vadd.f32 %v1557_v36, %v1237_v41  ;;  %v1669_v34 = vpop.f32.mrf.mxu1 }
 0x2a3   :  { %v1702_v23 = vadd.f32 %v1669_v34, %v1349_v6  ;;  %1861 = vmatpush.bf16.msra.mxu2 %v6406_v29 }
 0x2a5   :  { %v1726_v42 = vmax.f32 %v1590_v61, %v1702_v23 }
 0x2a7   :  { %1862 = vmatpush.bf16.msra.mxu2 %v6394_v62  ;;  %v1754_v1 = vadd.f32 %v6345_v5, %v1726_v42  ;;  %v4280_v42 = vld [vmem:[%s7411_s4 + $0x20] sm:$0xf] }
 0x2a9   :  { %v1559_v16 = vpop.f32.mrf.mxu0 }
 0x2aa   :  { %v1591_v50 = vadd.f32 %v1559_v16, %v1238_v3  ;;  %v1671_v21 = vpop.f32.mrf.mxu1 }
 0x2ab   :  { %v1703_v37 = vadd.f32 %v1671_v21, %v1350_v26  ;;  %1863 = vmatpush.bf16.msra.mxu2 %v6374_v48  ;;  %v5123_v26 = vld [vmem:[%s7411_s4 + $0x34] sm:$0xf0]  ;;  %v4274_v21 = vld [vmem:[%s7411_s4 + $0x18] sm:$0xf0] }
 0x2ac   :  { %v4289_v16 = vor.u32 %v5123_v26, %v4288_v55 }
 0x2ad   :  { %v1727_v10 = vmax.f32 %v1591_v50, %v1703_v37  ;;  %v5118_v50 = vld [vmem:[%s7411_s4 + $0x14] sm:$0xf] }
 0x2ae   :  { %v4277_v37 = vor.u32 %v5118_v50, %v4274_v21  ;;  %v4352_v50 = vld [vmem:[%s7412_s5 + $0x48] sm:$0xf0] }
 0x2af   :  { %v1755_v30 = vadd.f32 %v6345_v5, %v1727_v10  ;;  %1864 = vmatpush.bf16.msra.mxu2 %v6351_v63  ;;  %v4296_v10 = vld [vmem:[%s7411_s4 + $0x40] sm:$0xf] }
 0x2b1   :  { %v1562_v53 = vpop.f32.mrf.mxu0  ;;  %v6475_v60 = vpack.c.bf16 %v1755_v30, %v1754_v1  ;;  %v5125_v1 = vld [vmem:[%s7411_s4 + $0x44] sm:$0xf0] }
 0x2b2   :  { %v1592_v13 = vadd.f32 %v1562_v53, %v1239_v44  ;;  %v1674_v43 = vpop.f32.mrf.mxu1  ;;  %v4297_v30 = vor.u32 %v5125_v1, %v4296_v10  ;;  %v5120_v44 = vld [vmem:[%s7411_s4 + $0x24] sm:$0xf] }
 0x2b3   :  { %2019 = vmatpush.bf16.msrb.mxu2 %v1779_v54  ;;  %v1704_v12 = vadd.f32 %v1674_v43, %v1351_v58  ;;  %v5117_v54 = vld [vmem:[%s7411_s4 + $0x4] sm:$0xf0]  ;;  %v4304_v58 = vld [vmem:[%s7411_s4 + $0x50] sm:$0xf]  ;;  %v4318_v43 = vld [vmem:[%s7412_s5] sm:$0xf] }
 0x2b4   :  { %v4265_v0 = vor.u32 %v5117_v54, %v4264_v45  ;;  %v4305_v53 = vor.u32 %v5127_v20, %v4304_v58  ;;  %v4298_v45 = vld [vmem:[%s7411_s4 + $0x48] sm:$0xf0] }
 0x2b5   :  { %v1728_v27 = vmax.f32 %v1592_v13, %v1704_v12  ;;  %v5129_v12 = vld [vmem:[%s7412_s5 + $0x4] sm:$0xf0] }
 0x2b6   :  { %1865 = vmatmul.bf16.vlgmr.msra.gmra.mxu2 %v4265_v0 }
 0x2b7   :  { %2020 = vmatpush.bf16.msrb.mxu2 %v6444_v32  ;;  %v1214_v32 = vpop.f32.mrf.mxu2  ;;  %v1756_v46 = vadd.f32 %v6345_v5, %v1728_v27  ;;  %v4319_v27 = vor.u32 %v5129_v12, %v4318_v43 }
 0x2b8   :  { %v1241_v15 = vadd.f32 %v1214_v32, %v6304_v17  ;;  %v4272_v17 = vld [vmem:[%s7411_s4 + $0x10] sm:$0xf] }
 0x2b9   :  { %v1564_v59 = vpop.f32.mrf.mxu0  ;;  %v4273_v6 = vor.u32 %v5119_v28, %v4272_v17  ;;  %v4350_v17 = vld [vmem:[%s7412_s5 + $0x40] sm:$0xf]  ;;  %v5137_v28 = vld [vmem:[%s7412_s5 + $0x44] sm:$0xf0] }
 0x2ba   :  { %v1593_v56 = vadd.f32 %v1564_v59, %v1240_v52  ;;  %v1676_v9 = vpop.f32.mrf.mxu1  ;;  %v5124_v52 = vld [vmem:[%s7411_s4 + $0x44] sm:$0xf]  ;;  %v5131_v59 = vld [vmem:[%s7412_s5 + $0x14] sm:$0xf0] }
 0x2bb   :  { %2021 = vmatpush.bf16.msrb.mxu2 %v6432_v14  ;;  %v1705_v22 = vadd.f32 %v1676_v9, %v1352_v2  ;;  %v4301_v54 = vor.u32 %v5124_v52, %v4298_v45  ;;  %v4326_v2 = vld [vmem:[%s7412_s5 + $0x10] sm:$0xf]  ;;  %v4306_v9 = vld [vmem:[%s7411_s4 + $0x58] sm:$0xf0] }
 0x2bc   :  { %v4327_v0 = vor.u32 %v5131_v59, %v4326_v2 }
 0x2bd   :  { %v1729_v14 = vmax.f32 %v1593_v56, %v1705_v22  ;;  %v5126_v56 = vld [vmem:[%s7411_s4 + $0x54] sm:$0xf]  ;;  %v4334_v22 = vld [vmem:[%s7412_s5 + $0x20] sm:$0xf] }
 0x2be   :  { %v4309_v32 = vor.u32 %v5126_v56, %v4306_v9 }
 0x2bf   :  { %2022 = vmatpush.bf16.msrb.mxu2 %v6420_v51  ;;  %v1757_v25 = vadd.f32 %v6345_v5, %v1729_v14  ;;  %v1216_v38 = vpop.f32.mrf.mxu2  ;;  %v4335_v14 = vor.u32 %v5133_v57, %v4334_v22 }
 0x2c0   :  { %v1242_v41 = vadd.f32 %v1216_v38, %v6318_v33  ;;  %v4328_v38 = vld [vmem:[%s7412_s5 + $0x18] sm:$0xf0] }
 0x2c1   :  { %v1567_v7 = vpop.f32.mrf.mxu0  ;;  %v1782_v31 = vpack.c.bf16 %v1757_v25, %v1756_v46  ;;  %v5128_v46 = vld [vmem:[%s7412_s5 + $0x4] sm:$0xf]  ;;  %v4320_v25 = vld [vmem:[%s7412_s5 + $0x8] sm:$0xf0] }
 0x2c2   :  { %v1594_v19 = vadd.f32 %v1567_v7, %v1241_v15  ;;  %v1679_v47 = vpop.f32.mrf.mxu1  ;;  %v4323_v15 = vor.u32 %v5128_v46, %v4320_v25 }
 0x2c3   :  { %2023 = vmatpush.bf16.msrb.mxu2 %v6406_v29  ;;  %v1706_v11 = vadd.f32 %v1679_v47, %v1353_v18  ;;  %v1354_v29 = vadd.f32 %v1328_v40, %v6321_v8  ;;  %v5121_v8 = vld [vmem:[%s7411_s4 + $0x24] sm:$0xf0] }
 0x2c4   :  { %v4281_v4 = vor.u32 %v5121_v8, %v4280_v42  ;;  %v5134_v8 = vld [vmem:[%s7412_s5 + $0x34] sm:$0xf] }
 0x2c5   :  { %v1730_v51 = vmax.f32 %v1594_v19, %v1706_v11  ;;  %v5135_v19 = vld [vmem:[%s7412_s5 + $0x34] sm:$0xf0]  ;;  %v5130_v11 = vld [vmem:[%s7412_s5 + $0x14] sm:$0xf] }
 0x2c6   :  { %1870 = vmatmul.bf16.gmra.mxu2 %v4273_v6  ;;  %v4336_v6 = vld [vmem:[%s7412_s5 + $0x28] sm:$0xf0] }
 0x2c7   :  { %2024 = vmatpush.bf16.msrb.mxu2 %v6394_v62 }
 0x2c9   :  { %v1569_v35 = vpop.f32.mrf.mxu0 }
 0x2ca   :  { %v1595_v62 = vadd.f32 %v1569_v35, %v1242_v41  ;;  %v1681_v36 = vpop.f32.mrf.mxu1  ;;  %v5132_v35 = vld [vmem:[%s7412_s5 + $0x24] sm:$0xf] }
 0x2cb   :  { %2025 = vmatpush.bf16.msrb.mxu2 %v6374_v48  ;;  %v1707_v61 = vadd.f32 %v1681_v36, %v1354_v29  ;;  %v1758_v48 = vadd.f32 %v6345_v5, %v1730_v51  ;;  %v4331_v51 = vor.u32 %v5130_v11, %v4328_v38  ;;  %v4351_v29 = vor.u32 %v5137_v28, %v4350_v17  ;;  %v4432_v11 = vld [vmem:[%s7413_s7 + $0x74] sm:$0xf] }
 0x2cd   :  { %v1731_v33 = vmax.f32 %v1595_v62, %v1707_v61  ;;  %v4339_v62 = vor.u32 %v5132_v35, %v4336_v6  ;;  %v5168_v6 = vld [vmem:[%s7413_s7 + $0x6c] sm:$0xff] }
 0x2cf   :  { %2026 = vmatpush.bf16.msrb.mxu2 %v6351_v63  ;;  %v1759_v34 = vadd.f32 %v6345_v5, %v1731_v33  ;;  %v5116_v63 = vld [vmem:[%s7411_s4 + $0x4] sm:$0xf]  ;;  %v4266_v5 = vld [vmem:[%s7411_s4 + $0x8] sm:$0xf0] }
 0x2d0   :  { %v4269_v3 = vor.u32 %v5116_v63, %v4266_v5 }
 0x2d1   :  { %v1783_v23 = vpack.c.bf16 %v1759_v34, %v1758_v48  ;;  %v4358_v48 = vld [vmem:[%s7412_s5 + $0x50] sm:$0xf]  ;;  %v5139_v34 = vld [vmem:[%s7412_s5 + $0x54] sm:$0xf0] }
 0x2d2   :  { %v4359_v42 = vor.u32 %v5139_v34, %v4358_v48 }
 0x2d3   :  { %1900 = vmatpush.bf16.msra.mxu3 %v1783_v23 }
 0x2d6   :  { %1875 = vmatmul.bf16.gmra.mxu2 %v4281_v4  ;;  %v4344_v4 = vld [vmem:[%s7412_s5 + $0x38] sm:$0xf0] }
 0x2d7   :  { %1901 = vmatpush.bf16.msra.mxu3 %v1782_v31  ;;  %v4347_v5 = vor.u32 %v5134_v8, %v4344_v4  ;;  %v5164_v8 = vld [vmem:[%s7413_s7 + $0x4c] sm:$0xff] }
 0x2db   :  { %1902 = vmatpush.bf16.msra.mxu3 %v6475_v60 }
 0x2df   :  { %1903 = vmatpush.bf16.msra.mxu3 %v6463_v24 }
 0x2e2   :  { %4310 = vmatmul.msk.bf16.vlgmr.msra.gmra.mxu3 %vm1838_vm5, %v4269_v3 }
 0x2e3   :  { %2062 = vmatpush.bf16.msrb.mxu3 %v1783_v23 }
 0x2e6   :  { %1880 = vmatmul.bf16.gmra.mxu2 %v4289_v16  ;;  %v5136_v16 = vld [vmem:[%s7412_s5 + $0x44] sm:$0xf] }
 0x2e7   :  { %2063 = vmatpush.bf16.msrb.mxu3 %v1782_v31  ;;  %v4342_v31 = vld [vmem:[%s7412_s5 + $0x30] sm:$0xf]  ;;  %v4355_v10 = vor.u32 %v5136_v16, %v4352_v50 }
 0x2e8   :  { %v4343_v47 = vor.u32 %v5135_v19, %v4342_v31 }
 0x2eb   :  { %2064 = vmatpush.bf16.msrb.mxu3 %v6475_v60  ;;  %v5122_v60 = vld [vmem:[%s7411_s4 + $0x34] sm:$0xf] }
 0x2ec   :  { %v4293_v13 = vor.u32 %v5122_v60, %v4290_v49 }
 0x2ef   :  { %2065 = vmatpush.bf16.msrb.mxu3 %v6463_v24  ;;  %v4282_v24 = vld [vmem:[%s7411_s4 + $0x28] sm:$0xf0] }
 0x2f0   :  { %v4285_v39 = vor.u32 %v5120_v44, %v4282_v24  ;;  %v5138_v24 = vld [vmem:[%s7412_s5 + $0x54] sm:$0xf] }
 0x2f2   :  { %4311 = vmatmul.msk.bf16.gmra.mxu3 %vm1838_vm5, %v4277_v37 }
 0x2f6   :  { %1885 = vmatmul.bf16.gmra.mxu2 %v4297_v30 }
 0x302   :  { %4312 = vmatmul.msk.bf16.gmra.mxu3 %vm1838_vm5, %v4285_v39  ;;  %v4360_v39 = vld [vmem:[%s7412_s5 + $0x58] sm:$0xf0] }
 0x303   :  { %v4363_v20 = vor.u32 %v5138_v24, %v4360_v39 }
 0x306   :  { %1890 = vmatmul.bf16.gmra.mxu2 %v4305_v53 }
 0x312   :  { %4313 = vmatmul.msk.bf16.gmra.mxu3 %vm1838_vm5, %v4293_v13 }
 0x316   :  { %2027 = vmatmul.bf16.vlgmr.msrb.gmra.mxu2 %v4319_v27 }
 0x322   :  { %4314 = vmatmul.msk.bf16.gmra.mxu3 %vm1838_vm5, %v4301_v54 }
 0x326   :  { %2032 = vmatmul.bf16.gmra.mxu2 %v4327_v0 }
 0x332   :  { %4315 = vmatmul.msk.bf16.gmra.mxu3 %vm1838_vm5, %v4309_v32 }
 0x336   :  { %2037 = vmatmul.bf16.gmra.mxu2 %v4335_v14 }
 0x339   :  { %v1866_v18 = vpop.f32.mrf.mxu2 }
 0x341   :  { %v6601_v7 = vpop.f32.mrf.mxu2 }
 0x342   :  { %4364 = vmatmul.msk.bf16.vlgmr.msrb.gmra.mxu3 %vm1838_vm5, %v4323_v15 }
 0x346   :  { %2042 = vmatmul.bf16.gmra.mxu2 %v4343_v47 }
 0x349   :  { %v1871_v40 = vpop.f32.mrf.mxu2 }
 0x351   :  { %v6616_v41 = vpop.f32.mrf.mxu2 }
 0x352   :  { %4365 = vmatmul.msk.bf16.gmra.mxu3 %vm1838_vm5, %v4331_v51  ;;  %v2350_v51 = vunpack.c.l.b16 %v4432_v11 }
 0x354   :  { %v2358_v17 = vpack.c.b16 %v2350_v51, %v2350_v51 }
 0x356   :  { %2047 = vmatmul.bf16.gmra.mxu2 %v4351_v29  ;;  %v2380_v29 = vsel %vm1355_vm4, %v2358_v17, 0 }
 0x357   :  { %2382 = vmatpush.bf16.msra.mxu2 %v2380_v29 }
 0x359   :  { %v1876_v36 = vpop.f32.mrf.mxu2 }
 0x35b   :  { %2383 = vmatpush.bf16.msra.mxu2 %v5168_v6 }
 0x361   :  { %v6639_v23 = vpop.f32.mrf.mxu2 }
 0x362   :  { %4366 = vmatmul.msk.bf16.gmra.mxu3 %vm1838_vm5, %v4339_v62 }
 0x365   :  { %v1905_v61 = vpop.f32.mrf.mxu3 }
 0x366   :  { %v6631_v33 = vadd.f32 %v1905_v61, %v1866_v18  ;;  %2052 = vmatmul.bf16.gmra.mxu2 %v4359_v42  ;;  %v5166_v61 = vld [vmem:[%s7413_s7 + $0x5c] sm:$0xff]  ;;  %v5165_v42 = vld [vmem:[%s7413_s7 + $0x54] sm:$0xff] }
 0x369   :  { %v1881_v3 = vpop.f32.mrf.mxu2 }
 0x36d   :  { %v6647_v63 = vpop.f32.mrf.mxu3 }
 0x371   :  { %v6660_v37 = vpop.f32.mrf.mxu2 }
 0x372   :  { %4367 = vmatmul.msk.bf16.gmra.mxu3 %vm1838_vm5, %v4347_v5 }
 0x375   :  { %v1910_v55 = vpop.f32.mrf.mxu3 }
 0x376   :  { %v6650_v26 = vadd.f32 %v1910_v55, %v1871_v40  ;;  %v5162_v55 = vld [vmem:[%s7413_s7 + $0x3c] sm:$0xff] }
 0x379   :  { %v1886_v44 = vpop.f32.mrf.mxu2 }
 0x37d   :  { %v6658_v21 = vpop.f32.mrf.mxu3 }
 0x381   :  { %v6673_v53 = vpop.f32.mrf.mxu2 }
 0x382   :  { %4368 = vmatmul.msk.bf16.gmra.mxu3 %vm1838_vm5, %v4355_v10 }
 0x385   :  { %v1915_v1 = vpop.f32.mrf.mxu3 }
 0x386   :  { %v6663_v30 = vadd.f32 %v1915_v1, %v1876_v36  ;;  %v5167_v36 = vld [vmem:[%s7413_s7 + $0x64] sm:$0xff] }
 0x387   :  { %2384 = vmatpush.bf16.msra.mxu2 %v5167_v36 }
 0x389   :  { %v1891_v13 = vpop.f32.mrf.mxu2 }
 0x38b   :  { %2385 = vmatpush.bf16.msra.mxu2 %v5166_v61 }
 0x38d   :  { %v6671_v58 = vpop.f32.mrf.mxu3 }
 0x38f   :  { %2386 = vmatpush.bf16.msra.mxu2 %v5165_v42  ;;  %v5154_v42 = vld [vmem:[%s7414_s8 + $0x18] sm:$0xff] }
 0x391   :  { %v1893_v27 = vpop.f32.mrf.mxu2 }
 0x392   :  { %4369 = vmatmul.msk.bf16.gmra.mxu3 %vm1838_vm5, %v4363_v20 }
 0x393   :  { %2387 = vmatpush.bf16.msra.mxu2 %v5164_v8  ;;  %v5159_v8 = vld [vmem:[%s7415_s6 + $0x28] sm:$0xff] }
 0x395   :  { %v1920_v60 = vpop.f32.mrf.mxu3 }
 0x396   :  { %v6676_v49 = vadd.f32 %v1920_v60, %v1881_v3  ;;  %v5163_v3 = vld [vmem:[%s7413_s7 + $0x44] sm:$0xff] }
 0x397   :  { %2388 = vmatpush.bf16.msra.mxu2 %v5163_v3  ;;  %v4511_v3 = vld [vmem:[%s7414_s8 + $0x74] sm:$0xf] }
 0x399   :  { %v2028_v54 = vpop.f32.mrf.mxu2 }
 0x39b   :  { %2389 = vmatpush.bf16.msra.mxu2 %v5162_v55  ;;  %v2545_v55 = vunpack.c.l.b16 %v4511_v3  ;;  %v5194_v3 = vld [vmem:[%s7415_s6 + $0x60] sm:$0xff] }
 0x39d   :  { %v6678_v43 = vpop.f32.mrf.mxu3 }
 0x39e   :  { %v1923_v11 = vadd.f32 %v6678_v43, %v6660_v37 }
 0x3a1   :  { %v6684_v0 = vpop.f32.mrf.mxu2 }
 0x3a5   :  { %v1925_v12 = vpop.f32.mrf.mxu3 }
 0x3a6   :  { %v6680_v52 = vadd.f32 %v1925_v12, %v1886_v44 }
 0x3a9   :  { %v2033_v9 = vpop.f32.mrf.mxu2 }
 0x3ad   :  { %v1927_v45 = vpop.f32.mrf.mxu3 }
 0x3ae   :  { %v1928_v20 = vadd.f32 %v1927_v45, %v6673_v53 }
 0x3b1   :  { %v6692_v46 = vpop.f32.mrf.mxu2 }
 0x3b5   :  { %v1930_v2 = vpop.f32.mrf.mxu3 }
 0x3b6   :  { %v6682_v59 = vadd.f32 %v1930_v2, %v1891_v13 }
 0x3b9   :  { %v2038_v18 = vpop.f32.mrf.mxu2 }
 0x3bd   :  { %v1932_v56 = vpop.f32.mrf.mxu3 }
 0x3be   :  { %v1933_v12 = vadd.f32 %v1932_v56, %v1893_v27  ;;  %v1918_v27 = vadd.f32 %v6671_v58, %v6639_v23 }
 0x3c1   :  { %v2040_v47 = vpop.f32.mrf.mxu2 }
 0x3c5   :  { %v2067_v32 = vpop.f32.mrf.mxu3 }
 0x3c6   :  { %v6686_v22 = vadd.f32 %v2067_v32, %v2028_v54 }
 0x3c8   :  { %v2097_v57 = vmax.f32 %v6631_v33, %v6686_v22  ;;  %v5157_v33 = vld [vmem:[%s7414_s8 + $0x30] sm:$0xff]  ;;  %v5156_v22 = vld [vmem:[%s7414_s8 + $0x28] sm:$0xff] }
 0x3c9   :  { %v2043_v35 = vpop.f32.mrf.mxu2 }
 0x3cd   :  { %v6690_v14 = vpop.f32.mrf.mxu3 }
 0x3ce   :  { %v2070_v58 = vadd.f32 %v6690_v14, %v6684_v0 }
 0x3d1   :  { %v2045_v34 = vpop.f32.mrf.mxu2 }
 0x3d5   :  { %v2072_v25 = vpop.f32.mrf.mxu3 }
 0x3d6   :  { %v6694_v15 = vadd.f32 %v2072_v25, %v2033_v9 }
 0x3d8   :  { %v2099_v31 = vmax.f32 %v6650_v26, %v6694_v15 }
 0x3d9   :  { %v2048_v5 = vpop.f32.mrf.mxu2 }
 0x3dd   :  { %v6698_v19 = vpop.f32.mrf.mxu3 }
 0x3de   :  { %v2075_v37 = vadd.f32 %v6698_v19, %v6692_v46  ;;  %v2230_v19 = vld [vmem:[%s7414_s8 + $0x38] sm:$0xf] }
 0x3e1   :  { %v2050_v50 = vpop.f32.mrf.mxu2 }
 0x3e5   :  { %v2077_v38 = vpop.f32.mrf.mxu3 }
 0x3e6   :  { %v6703_v40 = vadd.f32 %v2077_v38, %v2038_v18 }
 0x3e8   :  { %v2101_v28 = vmax.f32 %v6663_v30, %v6703_v40  ;;  %v2109_v40 = vmax.f32 %v2097_v57, 0.0  ;;  %v5155_v57 = vld [vmem:[%s7414_s8 + $0x20] sm:$0xff] }
 0x3e9   :  { %v2053_v1 = vpop.f32.mrf.mxu2 }
 0x3ed   :  { %v2079_v62 = vpop.f32.mrf.mxu3 }
 0x3ee   :  { %v2080_v6 = vadd.f32 %v2079_v62, %v2040_v47 }
 0x3f0   :  { %v2102_v43 = vmax.f32 %v1918_v27, %v2080_v6  ;;  %v5190_v6 = vld [vmem:[%s7414_s8 + $0x90] sm:$0xff] }
 0x3f1   :  { %v2055_v60 = vpop.f32.mrf.mxu2 }
 0x3f2   :  { %v2114_v62 = vmax.f32 %v2102_v43, 0.0  ;;  %v5148_v43 = vld [vmem:[%s7413_s7 + $0x20] sm:$0xff] }
 0x3f5   :  { %v2082_v48 = vpop.f32.mrf.mxu3 }
 0x3f6   :  { %v2083_v38 = vadd.f32 %v2082_v48, %v2043_v35  ;;  %v1913_v35 = vadd.f32 %v6658_v21, %v6616_v41  ;;  %v1908_v41 = vadd.f32 %v6647_v63, %v6601_v7  ;;  %v2113_v21 = vmax.f32 %v2101_v28, 0.0  ;;  %v5140_v28 = vld [vmem:[%s7415_s6] sm:$0xff] }
 0x3f7   :  { %v2622_v48 = vunpack.c.l.b16 %v2230_v19  ;;  %v5187_v19 = vld [vmem:[%s7414_s8 + $0x78] sm:$0xff] }
 0x3f8   :  { %v2098_v0 = vmax.f32 %v1908_v41, %v2070_v58  ;;  %v6766_v61 = vpack.c.bf16 %v2114_v62, %v2113_v21  ;;  %v5188_v58 = vld [vmem:[%s7414_s8 + $0x80] sm:$0xff] }
 0x3f9   :  { %v2630_v30 = vpack.c.b16 %v2622_v48, %v2622_v48  ;;  %v5144_v62 = vld [vmem:[%s7413_s7] sm:$0xff] }
 0x3fa   :  { %v2110_v7 = vmax.f32 %v2098_v0, 0.0 }
 0x3fb   :  { %v2639_v15 = vsel %vm1355_vm4, %v2630_v30, 0 }
 0x3fc   :  { %v6782_v26 = vpack.c.bf16 %v2110_v7, %v2109_v40 }
 0x3fd   :  { %v2084_v4 = vpop.f32.mrf.mxu3 }
 0x3fe   :  { %v2085_v32 = vadd.f32 %v2084_v4, %v2045_v34  ;;  %v2111_v34 = vmax.f32 %v2099_v31, 0.0  ;;  %v5158_v31 = vld [vmem:[%s7415_s6 + $0x20] sm:$0xff]  ;;  %v5141_v4 = vld [vmem:[%s7415_s6 + $0x8] sm:$0xff] }
 0x400   :  { %v2104_v53 = vmax.f32 %v1923_v11, %v2085_v32  ;;  %v5161_v32 = vld [vmem:[%s7415_s6 + $0x38] sm:$0xff] }
 0x401   :  { %v5169_v11 = vld [vmem:[%s7414_s8 + $0x3c] sm:$0xff] }
 0x405   :  { %v2087_v16 = vpop.f32.mrf.mxu3 }
 0x406   :  { %v2088_v54 = vadd.f32 %v2087_v16, %v2048_v5  ;;  %v5153_v5 = vld [vmem:[%s7414_s8 + $0x10] sm:$0xff]  ;;  %v5152_v16 = vld [vmem:[%s7414_s8 + $0x8] sm:$0xff] }
 0x408   :  { %v2105_v51 = vmax.f32 %v6680_v52, %v2088_v54  ;;  %v2116_v52 = vmax.f32 %v2104_v53, 0.0  ;;  %v5171_v54 = vld [vmem:[%s7414_s8 + $0x4c] sm:$0xff]  ;;  %v2211_v53 = vld [vmem:[%s7413_s7 + $0x38] sm:$0xf] }
 0x40a   :  { %v2117_v56 = vmax.f32 %v2105_v51, 0.0  ;;  %v5193_v51 = vld [vmem:[%s7414_s8 + $0xa8] sm:$0xff] }
 0x40d   :  { %v2089_v10 = vpop.f32.mrf.mxu3 }
 0x40e   :  { %v2090_v39 = vadd.f32 %v2089_v10, %v2050_v50  ;;  %v2553_v50 = vpack.c.b16 %v2545_v55, %v2545_v55  ;;  %v5177_v55 = vld [vmem:[%s7415_s6 + $0x48] sm:$0xff] }
 0x410   :  { %v2106_v25 = vmax.f32 %v1928_v20, %v2090_v39  ;;  %v2562_v10 = vsel %vm1355_vm4, %v2553_v50, 0  ;;  %v5160_v39 = vld [vmem:[%s7415_s6 + $0x30] sm:$0xff] }
 0x411   :  { %v5142_v20 = vld [vmem:[%s7415_s6 + $0x10] sm:$0xff] }
 0x412   :  { %v2118_v45 = vmax.f32 %v2106_v25, 0.0  ;;  %v5143_v25 = vld [vmem:[%s7415_s6 + $0x18] sm:$0xff]  ;;  %v5178_v50 = vld [vmem:[%s7415_s6 + $0x50] sm:$0xff] }
 0x414   :  { %v6744_v47 = vpack.c.bf16 %v2118_v45, %v2117_v56  ;;  %v2440_v45 = vunpack.c.l.b16 %v2211_v53  ;;  %v5150_v56 = vld [vmem:[%s7413_s7 + $0x30] sm:$0xff] }
 0x415   :  { %v2092_v44 = vpop.f32.mrf.mxu3 }
 0x416   :  { %v2093_v24 = vadd.f32 %v2092_v44, %v2053_v1  ;;  %v5151_v1 = vld [vmem:[%s7414_s8] sm:$0xff]  ;;  %v5175_v44 = vld [vmem:[%s7414_s8 + $0x6c] sm:$0xff]  ;;  %v2448_v27 = vpack.c.b16 %v2440_v45, %v2440_v45 }
 0x418   :  { %v2107_v2 = vmax.f32 %v6682_v59, %v2093_v24  ;;  %v2103_v59 = vmax.f32 %v6676_v49, %v2083_v38  ;;  %v2100_v49 = vmax.f32 %v1913_v35, %v2075_v37  ;;  %v5174_v24 = vld [vmem:[%s7414_s8 + $0x64] sm:$0xff]  ;;  %v5146_v35 = vld [vmem:[%s7413_s7 + $0x10] sm:$0xff] }
 0x419   :  { %v5149_v37 = vld [vmem:[%s7413_s7 + $0x28] sm:$0xff] }
 0x41a   :  { %v2119_v17 = vmax.f32 %v2107_v2, 0.0  ;;  %v2115_v23 = vmax.f32 %v2103_v59, 0.0  ;;  %v2112_v14 = vmax.f32 %v2100_v49, 0.0  ;;  %v2469_v59 = vsel %vm1355_vm4, %v2448_v27, 0  ;;  %v5145_v49 = vld [vmem:[%s7413_s7 + $0x8] sm:$0xff] }
 0x41b   :  { %2471 = vmatpush.bf16.msra.mxu3 %v2469_v59 }
 0x41c   :  { %v6753_v46 = vpack.c.bf16 %v2116_v52, %v2115_v23  ;;  %v6774_v63 = vpack.c.bf16 %v2112_v14, %v2111_v34  ;;  %v5147_v52 = vld [vmem:[%s7413_s7 + $0x18] sm:$0xff]  ;;  %v5189_v23 = vld [vmem:[%s7414_s8 + $0x88] sm:$0xff] }
 0x41d   :  { %v2094_v13 = vpop.f32.mrf.mxu3 }
 0x41e   :  { %v2095_v9 = vadd.f32 %v2094_v13, %v2055_v60  ;;  %v5173_v60 = vld [vmem:[%s7414_s8 + $0x5c] sm:$0xff]  ;;  %v5172_v13 = vld [vmem:[%s7414_s8 + $0x54] sm:$0xff] }
 0x41f   :  { %2472 = vmatpush.bf16.msra.mxu3 %v5150_v56  ;;  %v5186_v56 = vld [vmem:[%s7413_s7 + $0xa8] sm:$0xff] }
 0x420   :  { %v2108_v18 = vmax.f32 %v1933_v12, %v2095_v9  ;;  %v4665_v12 = vld [vmem:[%s7414_s8 + $0xb0] sm:$0xf]  ;;  %v5170_v9 = vld [vmem:[%s7414_s8 + $0x44] sm:$0xff] }
 0x421   :  { %v2902_v2 = vunpack.c.l.b16 %v4665_v12 }
 0x422   :  { %v2120_v29 = vmax.f32 %v2108_v18, 0.0 }
 0x423   :  { %v2910_v18 = vpack.c.b16 %v2902_v2, %v2902_v2  ;;  %2473 = vmatpush.bf16.msra.mxu3 %v5149_v37  ;;  %v5204_v37 = vld [vmem:[%s7413_s7 + $0xe4] sm:$0xff] }
 0x424   :  { %v6734_v36 = vpack.c.bf16 %v2120_v29, %v2119_v17  ;;  %v5192_v17 = vld [vmem:[%s7414_s8 + $0xa0] sm:$0xff]  ;;  %v5191_v29 = vld [vmem:[%s7414_s8 + $0x98] sm:$0xff] }
 0x425   :  { %v2919_v38 = vsel %vm1355_vm4, %v2910_v18, 0 }
 0x426   :  { %2170 = vmatpush.bf16.msrb.mxu0 %v6734_v36  ;;  %2274 = vmatpush.bf16.msrb.mxu1 %v6734_v36 }
 0x427   :  { %2713 = vmatpush.bf16.msrb.mxu2 %v6734_v36  ;;  %2474 = vmatpush.bf16.msra.mxu3 %v5148_v43  ;;  %v5185_v43 = vld [vmem:[%s7413_s7 + $0xa0] sm:$0xff] }
 0x42a   :  { %2171 = vmatpush.bf16.msrb.mxu0 %v6744_v47  ;;  %2275 = vmatpush.bf16.msrb.mxu1 %v6744_v47 }
 0x42b   :  { %2714 = vmatpush.bf16.msrb.mxu2 %v6744_v47  ;;  %2475 = vmatpush.bf16.msra.mxu3 %v5147_v52  ;;  %v5203_v52 = vld [vmem:[%s7413_s7 + $0xdc] sm:$0xff] }
 0x42e   :  { %2172 = vmatpush.bf16.msrb.mxu0 %v6753_v46  ;;  %2276 = vmatpush.bf16.msrb.mxu1 %v6753_v46 }
 0x42f   :  { %2715 = vmatpush.bf16.msrb.mxu2 %v6753_v46  ;;  %2476 = vmatpush.bf16.msra.mxu3 %v5146_v35 }
 0x432   :  { %2173 = vmatpush.bf16.msrb.mxu0 %v6766_v61  ;;  %2277 = vmatpush.bf16.msrb.mxu1 %v6766_v61 }
 0x433   :  { %2716 = vmatpush.bf16.msrb.mxu2 %v6766_v61  ;;  %2477 = vmatpush.bf16.msra.mxu3 %v5145_v49 }
 0x436   :  { %2174 = vmatpush.bf16.msrb.mxu0 %v6774_v63  ;;  %2278 = vmatpush.bf16.msrb.mxu1 %v6774_v63 }
 0x437   :  { %2717 = vmatpush.bf16.msrb.mxu2 %v6774_v63  ;;  %2478 = vmatpush.bf16.msra.mxu3 %v5144_v62 }
 0x43a   :  { %2175 = vmatpush.bf16.msrb.mxu0 %v6782_v26  ;;  %2279 = vmatpush.bf16.msrb.mxu1 %v6782_v26 }
 0x43b   :  { %2718 = vmatpush.bf16.msrb.mxu2 %v6782_v26 }
 0x43d   :  { %4414 = vmatmul.msk.bf16.vlgmr.msrb.gmra.mxu1 %vm2155_vm6, %v5158_v31  ;;  %4386 = vmatmul.msk.bf16.vlgmr.msrb.gmra.mxu0 %vm2155_vm6, %v5140_v28 }
 0x43e   :  { %2641 = vmatpush.bf16.msra.mxu1 %v2639_v15  ;;  %2564 = vmatpush.bf16.msra.mxu0 %v2562_v10  ;;  %v5196_v10 = vld [vmem:[%s7415_s6 + $0x70] sm:$0xff] }
 0x442   :  { %2642 = vmatpush.bf16.msra.mxu1 %v5157_v33  ;;  %2565 = vmatpush.bf16.msra.mxu0 %v5175_v44  ;;  %v5197_v44 = vld [vmem:[%s7415_s6 + $0x78] sm:$0xff] }
 0x446   :  { %2643 = vmatpush.bf16.msra.mxu1 %v5156_v22  ;;  %2566 = vmatpush.bf16.msra.mxu0 %v5174_v24 }
 0x44a   :  { %2644 = vmatpush.bf16.msra.mxu1 %v5155_v57  ;;  %2567 = vmatpush.bf16.msra.mxu0 %v5173_v60 }
 0x44d   :  { %4415 = vmatmul.msk.bf16.gmra.mxu1 %vm2155_vm6, %v5159_v8  ;;  %4387 = vmatmul.msk.bf16.gmra.mxu0 %vm2155_vm6, %v5141_v4 }
 0x44e   :  { %2645 = vmatpush.bf16.msra.mxu1 %v5154_v42  ;;  %2568 = vmatpush.bf16.msra.mxu0 %v5172_v13 }
 0x452   :  { %2646 = vmatpush.bf16.msra.mxu1 %v5153_v5  ;;  %2569 = vmatpush.bf16.msra.mxu0 %v5171_v54  ;;  %v5176_v5 = vld [vmem:[%s7415_s6 + $0x40] sm:$0xff] }
 0x456   :  { %2647 = vmatpush.bf16.msra.mxu1 %v5152_v16  ;;  %2570 = vmatpush.bf16.msra.mxu0 %v5170_v9  ;;  %v5195_v16 = vld [vmem:[%s7415_s6 + $0x68] sm:$0xff] }
 0x45a   :  { %2648 = vmatpush.bf16.msra.mxu1 %v5151_v1  ;;  %2571 = vmatpush.bf16.msra.mxu0 %v5169_v11  ;;  %v5179_v1 = vld [vmem:[%s7415_s6 + $0x58] sm:$0xff] }
 0x45d   :  { %4416 = vmatmul.msk.bf16.gmra.mxu1 %vm2155_vm6, %v5160_v39  ;;  %4388 = vmatmul.msk.bf16.gmra.mxu0 %vm2155_vm6, %v5142_v20 }
 0x45e   :  { %3001 = vmatpush.bf16.msrb.mxu1 %v6734_v36  ;;  %2921 = vmatpush.bf16.msrb.mxu0 %v2919_v38 }
 0x462   :  { %3002 = vmatpush.bf16.msrb.mxu1 %v6744_v47  ;;  %2922 = vmatpush.bf16.msrb.mxu0 %v5193_v51 }
 0x466   :  { %3003 = vmatpush.bf16.msrb.mxu1 %v6753_v46  ;;  %2923 = vmatpush.bf16.msrb.mxu0 %v5192_v17 }
 0x46a   :  { %3004 = vmatpush.bf16.msrb.mxu1 %v6766_v61  ;;  %2924 = vmatpush.bf16.msrb.mxu0 %v5191_v29 }
 0x46d   :  { %4417 = vmatmul.msk.bf16.gmra.mxu1 %vm2155_vm6, %v5161_v32  ;;  %4389 = vmatmul.msk.bf16.gmra.mxu0 %vm2155_vm6, %v5143_v25  ;;  %v4618_v32 = vld [vmem:[%s7413_s7 + $0xb0] sm:$0xf]  ;;  %v4740_v25 = vld [vmem:[%s7413_s7 + $0xec] sm:$0xf] }
 0x46e   :  { %3005 = vmatpush.bf16.msrb.mxu1 %v6774_v63  ;;  %2925 = vmatpush.bf16.msrb.mxu0 %v5190_v6  ;;  %v2789_v18 = vunpack.c.l.b16 %v4618_v32  ;;  %v3077_v11 = vunpack.c.l.b16 %v4740_v25 }
 0x470   :  { %v2797_v29 = vpack.c.b16 %v2789_v18, %v2789_v18  ;;  %v3085_v6 = vpack.c.b16 %v3077_v11, %v3077_v11 }
 0x472   :  { %3006 = vmatpush.bf16.msrb.mxu1 %v6782_v26  ;;  %2926 = vmatpush.bf16.msrb.mxu0 %v5189_v23  ;;  %v2818_v45 = vsel %vm1355_vm4, %v2797_v29, 0  ;;  %v3106_v27 = vsel %vm1355_vm4, %v3085_v6, 0 }
 0x473   :  { %2820 = vmatpush.bf16.msrb.mxu3 %v2818_v45 }
 0x476   :  { %2927 = vmatpush.bf16.msrb.mxu0 %v5188_v58 }
 0x477   :  { %2821 = vmatpush.bf16.msrb.mxu3 %v5186_v56 }
 0x47a   :  { %2928 = vmatpush.bf16.msrb.mxu0 %v5187_v19  ;;  %v5184_v19 = vld [vmem:[%s7413_s7 + $0x98] sm:$0xff] }
 0x47b   :  { %2822 = vmatpush.bf16.msrb.mxu3 %v5185_v43  ;;  %v5207_v43 = vld [vmem:[%s7414_s8 + $0xc4] sm:$0xff] }
 0x47f   :  { %2823 = vmatpush.bf16.msrb.mxu3 %v5184_v19 }
 0x4ba   :  { %v2281_v41 = vpop.f32.mrf.mxu1  ;;  %v2177_v21 = vpop.f32.mrf.mxu0 }
 0x4c2   :  { %v2283_v0 = vpop.f32.mrf.mxu1  ;;  %v2179_v14 = vpop.f32.mrf.mxu0 }
 0x4c3   :  { %v2317_v48 = vpack.c.bf16 %v2283_v0, %v2281_v41  ;;  %v2212_v34 = vpack.c.bf16 %v2179_v14, %v2177_v21  ;;  %v5202_v41 = vld [vmem:[%s7413_s7 + $0xd4] sm:$0xff]  ;;  %v5201_v0 = vld [vmem:[%s7413_s7 + $0xcc] sm:$0xff] }
 0x4c4   :  { %v5183_v21 = vld [vmem:[%s7413_s7 + $0x90] sm:$0xff] }
 0x4c5   :  { %4461 = vmatmul.msk.bf16.vlgmr.msra.gmra.mxu2 %vm2366_vm7, %v2317_v48  ;;  %4540 = vmatmul.msk.bf16.vlgmr.msra.gmra.mxu0 %vm2366_vm7, %v2317_v48 }
 0x4c6   :  { %3289 = vmatpush.bf16.msra.mxu0 %v6734_v36  ;;  %4572 = vmatmul.msk.bf16.vlgmr.msra.gmra.mxu1 %vm2366_vm7, %v2212_v34 }
 0x4c7   :  { %4493 = vmatmul.msk.bf16.vlgmr.msra.gmra.mxu3 %vm2366_vm7, %v2212_v34  ;;  %3108 = vmatpush.bf16.msra.mxu2 %v3106_v27  ;;  %v5209_v27 = vld [vmem:[%s7414_s8 + $0xd4] sm:$0xff] }
 0x4c8   :  { %2824 = vmatpush.bf16.msrb.mxu3 %v5183_v21  ;;  %v5205_v21 = vld [vmem:[%s7414_s8 + $0xb4] sm:$0xff] }
 0x4ca   :  { %3290 = vmatpush.bf16.msra.mxu0 %v6744_v47  ;;  %v2286_v7 = vpop.f32.mrf.mxu1  ;;  %v2182_v30 = vpop.f32.mrf.mxu0 }
 0x4cb   :  { %3109 = vmatpush.bf16.msra.mxu2 %v5204_v37  ;;  %v5208_v37 = vld [vmem:[%s7414_s8 + $0xcc] sm:$0xff] }
 0x4ce   :  { %3291 = vmatpush.bf16.msra.mxu0 %v6753_v46 }
 0x4cf   :  { %3110 = vmatpush.bf16.msra.mxu2 %v5203_v52 }
 0x4d2   :  { %3292 = vmatpush.bf16.msra.mxu0 %v6766_v61  ;;  %v2288_v40 = vpop.f32.mrf.mxu1  ;;  %v2184_v15 = vpop.f32.mrf.mxu0 }
 0x4d3   :  { %v2318_v31 = vpack.c.bf16 %v2288_v40, %v2286_v7  ;;  %v2213_v28 = vpack.c.bf16 %v2184_v15, %v2182_v30  ;;  %3111 = vmatpush.bf16.msra.mxu2 %v5202_v41  ;;  %v5182_v40 = vld [vmem:[%s7413_s7 + $0x88] sm:$0xff] }
 0x4d4   :  { %v5200_v15 = vld [vmem:[%s7413_s7 + $0xc4] sm:$0xff]  ;;  %2825 = vmatpush.bf16.msrb.mxu3 %v5182_v40 }
 0x4d5   :  { %4462 = vmatmul.msk.bf16.gmra.mxu2 %vm2366_vm7, %v2318_v31  ;;  %4541 = vmatmul.msk.bf16.gmra.mxu0 %vm2366_vm7, %v2318_v31  ;;  %v5181_v31 = vld [vmem:[%s7413_s7 + $0x80] sm:$0xff] }
 0x4d6   :  { %3293 = vmatpush.bf16.msra.mxu0 %v6774_v63  ;;  %4573 = vmatmul.msk.bf16.gmra.mxu1 %vm2366_vm7, %v2213_v28 }
 0x4d7   :  { %4494 = vmatmul.msk.bf16.gmra.mxu3 %vm2366_vm7, %v2213_v28  ;;  %3112 = vmatpush.bf16.msra.mxu2 %v5201_v0  ;;  %v5199_v28 = vld [vmem:[%s7413_s7 + $0xbc] sm:$0xff] }
 0x4d8   :  { %2826 = vmatpush.bf16.msrb.mxu3 %v5181_v31 }
 0x4da   :  { %3294 = vmatpush.bf16.msra.mxu0 %v6782_v26  ;;  %v2291_v36 = vpop.f32.mrf.mxu1  ;;  %v2187_v47 = vpop.f32.mrf.mxu0 }
 0x4db   :  { %3113 = vmatpush.bf16.msra.mxu2 %v5200_v15 }
 0x4df   :  { %3114 = vmatpush.bf16.msra.mxu2 %v5199_v28 }
 0x4e2   :  { %v2293_v46 = vpop.f32.mrf.mxu1  ;;  %v2189_v61 = vpop.f32.mrf.mxu0 }
 0x4e3   :  { %v2319_v33 = vpack.c.bf16 %v2293_v46, %v2291_v36  ;;  %v2214_v22 = vpack.c.bf16 %v2189_v61, %v2187_v47 }
 0x4e5   :  { %4463 = vmatmul.msk.bf16.gmra.mxu2 %vm2366_vm7, %v2319_v33  ;;  %4542 = vmatmul.msk.bf16.gmra.mxu0 %vm2366_vm7, %v2319_v33 }
 0x4e6   :  { %4574 = vmatmul.msk.bf16.gmra.mxu1 %vm2366_vm7, %v2214_v22 }
 0x4e7   :  { %4495 = vmatmul.msk.bf16.gmra.mxu3 %vm2366_vm7, %v2214_v22  ;;  %v5180_v22 = vld [vmem:[%s7413_s7 + $0x78] sm:$0xff] }
 0x4e8   :  { %2827 = vmatpush.bf16.msrb.mxu3 %v5180_v22  ;;  %v5213_v22 = vld [vmem:[%s7415_s6 + $0x88] sm:$0xff] }
 0x4ea   :  { %v2296_v63 = vpop.f32.mrf.mxu1  ;;  %v2192_v57 = vpop.f32.mrf.mxu0 }
 0x4f2   :  { %v2298_v42 = vpop.f32.mrf.mxu1  ;;  %v2194_v8 = vpop.f32.mrf.mxu0 }
 0x4f3   :  { %v2320_v4 = vpack.c.bf16 %v2298_v42, %v2296_v63  ;;  %v2215_v26 = vpack.c.bf16 %v2194_v8, %v2192_v57  ;;  %v5198_v63 = vld [vmem:[%s7413_s7 + $0xb4] sm:$0xff] }
 0x4f4   :  { %3115 = vmatpush.bf16.msra.mxu2 %v5198_v63  ;;  %v5214_v63 = vld [vmem:[%s7415_s6 + $0x90] sm:$0xff] }
 0x4f5   :  { %4464 = vmatmul.msk.bf16.gmra.mxu2 %vm2366_vm7, %v2320_v4  ;;  %4543 = vmatmul.msk.bf16.gmra.mxu0 %vm2366_vm7, %v2320_v4 }
 0x4f6   :  { %4575 = vmatmul.msk.bf16.gmra.mxu1 %vm2366_vm7, %v2215_v26 }
 0x4f7   :  { %4496 = vmatmul.msk.bf16.gmra.mxu3 %vm2366_vm7, %v2215_v26 }
 0x505   :  { %4600 = vmatmul.msk.bf16.vlgmr.msrb.gmra.mxu2 %vm2155_vm6, %v5176_v5 }
 0x506   :  { %4722 = vmatmul.msk.bf16.vlgmr.msrb.gmra.mxu1 %vm2155_vm6, %v5194_v3 }
 0x515   :  { %4601 = vmatmul.msk.bf16.gmra.mxu2 %vm2155_vm6, %v5177_v55 }
 0x516   :  { %4723 = vmatmul.msk.bf16.gmra.mxu1 %vm2155_vm6, %v5195_v16 }
 0x525   :  { %4602 = vmatmul.msk.bf16.gmra.mxu2 %vm2155_vm6, %v5178_v50 }
 0x526   :  { %4724 = vmatmul.msk.bf16.gmra.mxu1 %vm2155_vm6, %v5196_v10 }
 0x535   :  { %4603 = vmatmul.msk.bf16.gmra.mxu2 %vm2155_vm6, %v5179_v1 }
 0x536   :  { %4725 = vmatmul.msk.bf16.gmra.mxu1 %vm2155_vm6, %v5197_v44 }
 0x542   :  { %v2573_v24 = vpop.f32.mrf.mxu0 }
 0x543   :  { %v2650_v39 = vpop.f32.mrf.mxu1 }
 0x544   :  { %v6976_v20 = vadd.f32 %v2650_v39, %v2573_v24  ;;  %v4787_v39 = vld [vmem:[%s7414_s8 + $0xec] sm:$0xf] }
 0x548   :  { %v2391_v60 = vpop.f32.mrf.mxu2 }
 0x54a   :  { %v2480_v13 = vpop.f32.mrf.mxu3  ;;  %v6978_v12 = vpop.f32.mrf.mxu0 }
 0x54b   :  { %v6980_v54 = vpop.f32.mrf.mxu1  ;;  %v6982_v2 = vadd.f32 %v2480_v13, %v2391_v60  ;;  %v3190_v13 = vunpack.c.l.b16 %v4787_v39  ;;  %v4862_v39 = vld [vmem:[%s7413_s7 + $0x128] sm:$0xf] }
 0x54d   :  { %v3198_v25 = vpack.c.b16 %v3190_v13, %v3190_v13 }
 0x54f   :  { %v3207_v18 = vsel %vm1355_vm4, %v3198_v25, 0 }
 0x550   :  { %v6984_v9 = vpop.f32.mrf.mxu2  ;;  %3209 = vmatpush.bf16.msra.mxu3 %v3207_v18 }
 0x552   :  { %v6992_v38 = vpop.f32.mrf.mxu3  ;;  %v2578_v51 = vpop.f32.mrf.mxu0 }
 0x553   :  { %v2655_v17 = vpop.f32.mrf.mxu1 }
 0x554   :  { %v6994_v53 = vadd.f32 %v2655_v17, %v2578_v51  ;;  %v5211_v51 = vld [vmem:[%s7414_s8 + $0xe4] sm:$0xff]  ;;  %v5210_v17 = vld [vmem:[%s7414_s8 + $0xdc] sm:$0xff] }
 0x555   :  { %3210 = vmatpush.bf16.msra.mxu3 %v5211_v51 }
 0x558   :  { %v2396_v59 = vpop.f32.mrf.mxu2 }
 0x559   :  { %3211 = vmatpush.bf16.msra.mxu3 %v5210_v17 }
 0x55a   :  { %v2485_v35 = vpop.f32.mrf.mxu3  ;;  %v7010_v23 = vpop.f32.mrf.mxu0 }
 0x55b   :  { %v7012_v58 = vpop.f32.mrf.mxu1  ;;  %v7014_v49 = vadd.f32 %v2485_v35, %v2396_v59  ;;  %v5206_v35 = vld [vmem:[%s7414_s8 + $0xbc] sm:$0xff] }
 0x55d   :  { %3212 = vmatpush.bf16.msra.mxu3 %v5209_v27 }
 0x560   :  { %v7016_v62 = vpop.f32.mrf.mxu2 }
 0x561   :  { %3213 = vmatpush.bf16.msra.mxu3 %v5208_v37  ;;  %v5228_v37 = vld [vmem:[%s7414_s8 + $0x118] sm:$0xff] }
 0x562   :  { %v7030_v14 = vpop.f32.mrf.mxu3  ;;  %v2583_v48 = vpop.f32.mrf.mxu0 }
 0x563   :  { %v2660_v34 = vpop.f32.mrf.mxu1 }
 0x564   :  { %v7032_v7 = vadd.f32 %v2660_v34, %v2583_v48 }
 0x565   :  { %3214 = vmatpush.bf16.msra.mxu3 %v5207_v43 }
 0x568   :  { %v2401_v30 = vpop.f32.mrf.mxu2 }
 0x569   :  { %3215 = vmatpush.bf16.msra.mxu3 %v5206_v35 }
 0x56a   :  { %v2490_v36 = vpop.f32.mrf.mxu3  ;;  %v7046_v47 = vpop.f32.mrf.mxu0 }
 0x56b   :  { %v7048_v46 = vpop.f32.mrf.mxu1  ;;  %v7050_v61 = vadd.f32 %v2490_v36, %v2401_v30  ;;  %v5212_v36 = vld [vmem:[%s7415_s6 + $0x80] sm:$0xff] }
 0x56d   :  { %3216 = vmatpush.bf16.msra.mxu3 %v5205_v21 }
 0x570   :  { %v7052_v33 = vpop.f32.mrf.mxu2 }
 0x572   :  { %v7060_v57 = vpop.f32.mrf.mxu3  ;;  %v2588_v42 = vpop.f32.mrf.mxu0 }
 0x573   :  { %v2665_v8 = vpop.f32.mrf.mxu1 }
 0x574   :  { %v7062_v4 = vadd.f32 %v2665_v8, %v2588_v42  ;;  %v5215_v42 = vld [vmem:[%s7415_s6 + $0x98] sm:$0xff] }
 0x578   :  { %v2406_v26 = vpop.f32.mrf.mxu2 }
 0x57a   :  { %v2495_v5 = vpop.f32.mrf.mxu3  ;;  %v7127_v8 = vpop.f32.mrf.mxu0 }
 0x57b   :  { %v7064_v3 = vpop.f32.mrf.mxu1  ;;  %v7066_v55 = vadd.f32 %v2495_v5, %v2406_v26 }
 0x580   :  { %v7068_v16 = vpop.f32.mrf.mxu2 }
 0x582   :  { %v7129_v26 = vpop.f32.mrf.mxu3 }
 0x583   :  { %v3008_v50 = vpop.f32.mrf.mxu1 }
 0x588   :  { %v2720_v10 = vpop.f32.mrf.mxu2 }
 0x58b   :  { %v3010_v1 = vpop.f32.mrf.mxu1 }
 0x58c   :  { %v3044_v44 = vpack.c.bf16 %v3010_v1, %v3008_v50 }
 0x58e   :  { %4769 = vmatmul.msk.bf16.vlgmr.msra.gmra.mxu2 %vm2366_vm7, %v3044_v44 }
 0x590   :  { %v2722_v24 = vpop.f32.mrf.mxu2 }
 0x591   :  { %v2756_v60 = vpack.c.bf16 %v2722_v24, %v2720_v10 }
 0x593   :  { %4647 = vmatmul.msk.bf16.vlgmr.msrb.gmra.mxu3 %vm2366_vm7, %v2756_v60  ;;  %4694 = vmatmul.msk.bf16.vlgmr.msrb.gmra.mxu0 %vm2366_vm7, %v2756_v60  ;;  %v3013_v32 = vpop.f32.mrf.mxu1  ;;  %v4909_v60 = vld [vmem:[%s7414_s8 + $0x128] sm:$0xf] }
 0x594   :  { %v3478_v25 = vunpack.c.l.b16 %v4909_v60 }
 0x598   :  { %v2725_v11 = vpop.f32.mrf.mxu2 }
 0x59b   :  { %v3015_v29 = vpop.f32.mrf.mxu1 }
 0x59c   :  { %v3045_v6 = vpack.c.bf16 %v3015_v29, %v3013_v32 }
 0x59e   :  { %4770 = vmatmul.msk.bf16.gmra.mxu2 %vm2366_vm7, %v3045_v6 }
 0x5a0   :  { %v2727_v45 = vpop.f32.mrf.mxu2 }
 0x5a1   :  { %v2757_v59 = vpack.c.bf16 %v2727_v45, %v2725_v11  ;;  %v3486_v11 = vpack.c.b16 %v3478_v25, %v3478_v25  ;;  %v5229_v45 = vld [vmem:[%s7414_s8 + $0x120] sm:$0xff] }
 0x5a3   :  { %4648 = vmatmul.msk.bf16.gmra.mxu3 %vm2366_vm7, %v2757_v59  ;;  %4695 = vmatmul.msk.bf16.gmra.mxu0 %vm2366_vm7, %v2757_v59  ;;  %v3018_v56 = vpop.f32.mrf.mxu1  ;;  %v3495_v51 = vsel %vm1355_vm4, %v3486_v11, 0 }
 0x5a4   :  { %3497 = vmatpush.bf16.msrb.mxu2 %v3495_v51 }
 0x5a8   :  { %v2730_v52 = vpop.f32.mrf.mxu2  ;;  %3498 = vmatpush.bf16.msrb.mxu2 %v5229_v45 }
 0x5ab   :  { %v3020_v19 = vpop.f32.mrf.mxu1 }
 0x5ac   :  { %v3046_v41 = vpack.c.bf16 %v3020_v19, %v3018_v56  ;;  %v5221_v56 = vld [vmem:[%s7413_s7 + $0x118] sm:$0xff]  ;;  %3499 = vmatpush.bf16.msrb.mxu2 %v5228_v37  ;;  %v5227_v19 = vld [vmem:[%s7414_s8 + $0x110] sm:$0xff] }
 0x5ae   :  { %4771 = vmatmul.msk.bf16.gmra.mxu2 %vm2366_vm7, %v3046_v41 }
 0x5b0   :  { %v2732_v0 = vpop.f32.mrf.mxu2  ;;  %3500 = vmatpush.bf16.msrb.mxu2 %v5227_v19 }
 0x5b1   :  { %v2758_v48 = vpack.c.bf16 %v2732_v0, %v2730_v52  ;;  %v5226_v0 = vld [vmem:[%s7414_s8 + $0x108] sm:$0xff] }
 0x5b3   :  { %4649 = vmatmul.msk.bf16.gmra.mxu3 %vm2366_vm7, %v2758_v48  ;;  %4696 = vmatmul.msk.bf16.gmra.mxu0 %vm2366_vm7, %v2758_v48  ;;  %v3023_v34 = vpop.f32.mrf.mxu1 }
 0x5b4   :  { %3501 = vmatpush.bf16.msrb.mxu2 %v5226_v0 }
 0x5b8   :  { %v2735_v30 = vpop.f32.mrf.mxu2 }
 0x5bb   :  { %v3025_v40 = vpop.f32.mrf.mxu1 }
 0x5bc   :  { %v3047_v15 = vpack.c.bf16 %v3025_v40, %v3023_v34  ;;  %v5225_v40 = vld [vmem:[%s7414_s8 + $0x100] sm:$0xff] }
 0x5bd   :  { %3502 = vmatpush.bf16.msrb.mxu2 %v5225_v40 }
 0x5be   :  { %4772 = vmatmul.msk.bf16.gmra.mxu2 %vm2366_vm7, %v3047_v15 }
 0x5c0   :  { %v2737_v31 = vpop.f32.mrf.mxu2 }
 0x5c1   :  { %v2759_v28 = vpack.c.bf16 %v2737_v31, %v2735_v30  ;;  %v5218_v30 = vld [vmem:[%s7413_s7 + $0x100] sm:$0xff] }
 0x5c3   :  { %4650 = vmatmul.msk.bf16.gmra.mxu3 %vm2366_vm7, %v2759_v28  ;;  %4697 = vmatmul.msk.bf16.gmra.mxu0 %vm2366_vm7, %v2759_v28  ;;  %v5217_v28 = vld [vmem:[%s7413_s7 + $0xf8] sm:$0xff] }
 0x5d3   :  { %4816 = vmatmul.msk.bf16.vlgmr.msra.gmra.mxu3 %vm2366_vm7, %v3044_v44  ;;  %4844 = vmatmul.msk.bf16.vlgmr.msra.gmra.mxu0 %vm2155_vm6, %v5212_v36  ;;  %v5224_v36 = vld [vmem:[%s7414_s8 + $0xf8] sm:$0xff] }
 0x5d4   :  { %3503 = vmatpush.bf16.msrb.mxu2 %v5224_v36 }
 0x5e3   :  { %4817 = vmatmul.msk.bf16.gmra.mxu3 %vm2366_vm7, %v3045_v6  ;;  %4845 = vmatmul.msk.bf16.gmra.mxu0 %vm2155_vm6, %v5213_v22  ;;  %v5222_v6 = vld [vmem:[%s7413_s7 + $0x120] sm:$0xff] }
 0x5f3   :  { %4818 = vmatmul.msk.bf16.gmra.mxu3 %vm2366_vm7, %v3046_v41  ;;  %4846 = vmatmul.msk.bf16.gmra.mxu0 %vm2155_vm6, %v5214_v63  ;;  %v2663_v63 = vadd.f32 %v7048_v46, %v7046_v47  ;;  %v2493_v47 = vadd.f32 %v7060_v57, %v7052_v33 }
 0x603   :  { %4819 = vmatmul.msk.bf16.gmra.mxu3 %vm2366_vm7, %v3047_v15  ;;  %4847 = vmatmul.msk.bf16.gmra.mxu0 %vm2155_vm6, %v5215_v42 }
 0x610   :  { %v2930_v5 = vpop.f32.mrf.mxu0 }
 0x611   :  { %v7132_v50 = vadd.f32 %v2930_v5, %v6976_v20  ;;  %v3117_v10 = vpop.f32.mrf.mxu2  ;;  %v3365_v20 = vunpack.c.l.b16 %v4862_v39  ;;  %v5216_v5 = vld [vmem:[%s7413_s7 + $0xf0] sm:$0xff] }
 0x613   :  { %v3373_v18 = vpack.c.b16 %v3365_v20, %v3365_v20 }
 0x616   :  { %v2829_v1 = vpop.f32.mrf.mxu3 }
 0x617   :  { %v2849_v44 = vadd.f32 %v2829_v1, %v6982_v2  ;;  %v3394_v2 = vsel %vm1355_vm4, %v3373_v18, 0 }
 0x618   :  { %v7135_v24 = vpop.f32.mrf.mxu0  ;;  %3396 = vmatpush.bf16.msra.mxu1 %v3394_v2  ;;  %v2668_v2 = vadd.f32 %v7064_v3, %v7127_v8 }
 0x619   :  { %v7143_v13 = vadd.f32 %v3117_v10, %v2849_v44  ;;  %v7145_v32 = vpop.f32.mrf.mxu2  ;;  %v5223_v10 = vld [vmem:[%s7414_s8 + $0xf0] sm:$0xff] }
 0x61a   :  { %3504 = vmatpush.bf16.msrb.mxu2 %v5223_v10 }
 0x61c   :  { %3397 = vmatpush.bf16.msra.mxu1 %v5222_v6 }
 0x61e   :  { %v7149_v17 = vpop.f32.mrf.mxu3 }
 0x620   :  { %v2935_v29 = vpop.f32.mrf.mxu0  ;;  %3398 = vmatpush.bf16.msra.mxu1 %v5221_v56 }
 0x621   :  { %v7158_v27 = vadd.f32 %v2935_v29, %v6994_v53  ;;  %v3122_v59 = vpop.f32.mrf.mxu2  ;;  %v5220_v53 = vld [vmem:[%s7413_s7 + $0x110] sm:$0xff] }
 0x624   :  { %3399 = vmatpush.bf16.msra.mxu1 %v5220_v53 }
 0x626   :  { %v2834_v43 = vpop.f32.mrf.mxu3 }
 0x627   :  { %v2851_v52 = vadd.f32 %v2834_v43, %v7014_v49  ;;  %v5219_v49 = vld [vmem:[%s7413_s7 + $0x108] sm:$0xff] }
 0x628   :  { %v7167_v35 = vpop.f32.mrf.mxu0  ;;  %3400 = vmatpush.bf16.msra.mxu1 %v5219_v49 }
 0x629   :  { %v7175_v41 = vadd.f32 %v3122_v59, %v2851_v52  ;;  %v7177_v21 = vpop.f32.mrf.mxu2 }
 0x62c   :  { %3401 = vmatpush.bf16.msra.mxu1 %v5218_v30 }
 0x62e   :  { %v7185_v48 = vpop.f32.mrf.mxu3 }
 0x630   :  { %v2940_v34 = vpop.f32.mrf.mxu0  ;;  %3402 = vmatpush.bf16.msra.mxu1 %v5217_v28  ;;  %v2483_v28 = vadd.f32 %v6992_v38, %v6984_v9 }
 0x631   :  { %v7194_v15 = vadd.f32 %v2940_v34, %v7032_v7  ;;  %v3127_v31 = vpop.f32.mrf.mxu2 }
 0x634   :  { %3403 = vmatpush.bf16.msra.mxu1 %v5216_v5 }
 0x636   :  { %v2839_v22 = vpop.f32.mrf.mxu3 }
 0x637   :  { %v2853_v7 = vadd.f32 %v2839_v22, %v7050_v61 }
 0x638   :  { %v2942_v42 = vpop.f32.mrf.mxu0 }
 0x639   :  { %v7211_v1 = vadd.f32 %v2942_v42, %v2663_v63  ;;  %v7213_v44 = vadd.f32 %v3127_v31, %v2853_v7  ;;  %v3129_v39 = vpop.f32.mrf.mxu2  ;;  %v2653_v7 = vadd.f32 %v6980_v54, %v6978_v12  ;;  %v2850_v42 = vadd.f32 %v7149_v17, %v2483_v28 }
 0x63b   :  { %v2951_v10 = vadd.f32 %v7135_v24, %v2653_v7 }
 0x63e   :  { %v2841_v46 = vpop.f32.mrf.mxu3 }
 0x63f   :  { %v2854_v61 = vadd.f32 %v2841_v46, %v2493_v47 }
 0x640   :  { %v2945_v60 = vpop.f32.mrf.mxu0 }
 0x641   :  { %v7218_v20 = vadd.f32 %v2945_v60, %v7062_v4  ;;  %v7220_v25 = vadd.f32 %v3129_v39, %v2854_v61  ;;  %v3132_v11 = vpop.f32.mrf.mxu2  ;;  %v3138_v39 = vadd.f32 %v7145_v32, %v2850_v42  ;;  %v2498_v42 = vadd.f32 %v7129_v26, %v7068_v16 }
 0x646   :  { %v2844_v18 = vpop.f32.mrf.mxu3 }
 0x647   :  { %v2855_v51 = vadd.f32 %v2844_v18, %v7066_v55 }
 0x648   :  { %v2947_v29 = vpop.f32.mrf.mxu0 }
 0x649   :  { %v7225_v6 = vadd.f32 %v2947_v29, %v2668_v2  ;;  %v7227_v45 = vadd.f32 %v3132_v11, %v2855_v51  ;;  %v7240_v0 = vpop.f32.mrf.mxu2  ;;  %v2488_v11 = vadd.f32 %v7030_v14, %v7016_v62 }
 0x64e   :  { %v7229_v33 = vpop.f32.mrf.mxu3 }
 0x650   :  { %v3296_v57 = vpop.f32.mrf.mxu0 }
 0x656   :  { %v3218_v59 = vpop.f32.mrf.mxu3 }
 0x657   :  { %v3238_v4 = vadd.f32 %v3218_v59, %v7132_v50  ;;  %v2852_v59 = vadd.f32 %v7185_v48, %v2488_v11 }
 0x658   :  { %v3298_v56 = vpop.f32.mrf.mxu0 }
 0x659   :  { %v3332_v37 = vpack.c.bf16 %v3298_v56, %v3296_v57  ;;  %v2658_v57 = vadd.f32 %v7012_v58, %v7010_v23 }
 0x65b   :  { %4891 = vmatmul.msk.bf16.vlgmr.msra.gmra.mxu1 %vm2366_vm7, %v3332_v37  ;;  %4938 = vmatmul.msk.bf16.vlgmr.msrb.gmra.mxu2 %vm2366_vm7, %v3332_v37  ;;  %v2953_v56 = vadd.f32 %v7167_v35, %v2658_v57 }
 0x65e   :  { %v3220_v34 = vpop.f32.mrf.mxu3 }
 0x65f   :  { %v3239_v47 = vadd.f32 %v3220_v34, %v2951_v10 }
 0x660   :  { %v3301_v3 = vpop.f32.mrf.mxu0 }
 0x666   :  { %v3223_v22 = vpop.f32.mrf.mxu3 }
 0x667   :  { %v3240_v24 = vadd.f32 %v3223_v22, %v7158_v27  ;;  %v3140_v27 = vadd.f32 %v7177_v21, %v2852_v59 }
 0x668   :  { %v3303_v8 = vpop.f32.mrf.mxu0 }
 0x669   :  { %v3333_v55 = vpack.c.bf16 %v3303_v8, %v3301_v3 }
 0x66b   :  { %4892 = vmatmul.msk.bf16.gmra.mxu1 %vm2366_vm7, %v3333_v55  ;;  %4939 = vmatmul.msk.bf16.gmra.mxu2 %vm2366_vm7, %v3333_v55 }
 0x66e   :  { %v3225_v18 = vpop.f32.mrf.mxu3 }
 0x66f   :  { %v3241_v3 = vadd.f32 %v3225_v18, %v2953_v56 }
 0x670   :  { %v3306_v43 = vpop.f32.mrf.mxu0 }
 0x676   :  { %v3228_v37 = vpop.f32.mrf.mxu3 }
 0x677   :  { %v3242_v23 = vadd.f32 %v3228_v37, %v7194_v15 }
 0x678   :  { %v3308_v52 = vpop.f32.mrf.mxu0 }
 0x679   :  { %v3334_v53 = vpack.c.bf16 %v3308_v52, %v3306_v43 }
 0x67b   :  { %4893 = vmatmul.msk.bf16.gmra.mxu1 %vm2366_vm7, %v3334_v53  ;;  %4940 = vmatmul.msk.bf16.gmra.mxu2 %vm2366_vm7, %v3334_v53 }
 0x67e   :  { %v3230_v48 = vpop.f32.mrf.mxu3 }
 0x680   :  { %v3311_v50 = vpop.f32.mrf.mxu0 }
 0x688   :  { %v3313_v19 = vpop.f32.mrf.mxu0 }
 0x689   :  { %v3335_v49 = vpack.c.bf16 %v3313_v19, %v3311_v50 }
 0x68b   :  { %4894 = vmatmul.msk.bf16.gmra.mxu1 %vm2366_vm7, %v3335_v49  ;;  %4941 = vmatmul.msk.bf16.gmra.mxu2 %vm2366_vm7, %v3335_v49  ;;  %v3243_v49 = vadd.f32 %v3230_v48, %v7211_v1  ;;  %v5238_v48 = vld [vmem:[%s7419_s13 + $0x20] sm:$0xff] }
 0x6d8   :  { %v3405_v30 = vpop.f32.mrf.mxu1 }
 0x6d9   :  { %v3425_v40 = vadd.f32 %v3405_v30, %v7143_v13  ;;  %v7253_v13 = vld [vmem:[%s7416_s9] ss:$0 sm:$0xff] }
 0x6de   :  { %v3506_v31 = vpop.f32.mrf.mxu2 }
 0x6df   :  { %v3526_v36 = vadd.f32 %v3506_v31, %v3238_v4  ;;  %v3233_v31 = vpop.f32.mrf.mxu3 }
 0x6e0   :  { %v3407_v63 = vpop.f32.mrf.mxu1 }
 0x6e1   :  { %v3534_v5 = vmax.f32 %v3425_v40, %v3526_v36  ;;  %v3426_v9 = vadd.f32 %v3407_v63, %v3138_v39  ;;  %v3244_v63 = vadd.f32 %v3233_v31, %v7218_v20 }
 0x6e3   :  { %v3546_v12 = vadd.f32 %v7253_v13, %v3534_v5 }
 0x6e6   :  { %v3508_v46 = vpop.f32.mrf.mxu2 }
 0x6e7   :  { %v3527_v38 = vadd.f32 %v3508_v46, %v3239_v47  ;;  %v3235_v39 = vpop.f32.mrf.mxu3 }
 0x6e8   :  { %v3410_v61 = vpop.f32.mrf.mxu1 }
 0x6e9   :  { %v3535_v60 = vmax.f32 %v3426_v9, %v3527_v38  ;;  %v3427_v2 = vadd.f32 %v3410_v61, %v7175_v41  ;;  %v3245_v9 = vadd.f32 %v3235_v39, %v7225_v6  ;;  %v5231_v6 = vld [vmem:[%s7417_s10 + $0x8] sm:$0xff]  ;;  %v5250_v39 = vld [vmem:[%s7419_s13 + $0x80] sm:$0xff] }
 0x6eb   :  { %v3547_v54 = vadd.f32 %v7253_v13, %v3535_v60 }
 0x6ed   :  { %v7258_v17 = vpack.c.bf16 %v3547_v54, %v3546_v12  ;;  %v5243_v54 = vld [vmem:[%s7419_s13 + $0x48] sm:$0xff] }
 0x6ee   :  { %v3511_v32 = vpop.f32.mrf.mxu2  ;;  %3742 = vmatpush.bf16.msra.mxu2 %v5243_v54 }
 0x6ef   :  { %v3528_v51 = vadd.f32 %v3511_v32, %v3240_v24  ;;  %v5241_v32 = vld [vmem:[%s7419_s13 + $0x38] sm:$0xff] }
 0x6f0   :  { %v3412_v29 = vpop.f32.mrf.mxu1 }
 0x6f1   :  { %v3536_v4 = vmax.f32 %v3427_v2, %v3528_v51  ;;  %v3428_v55 = vadd.f32 %v3412_v29, %v3140_v27  ;;  %v5240_v2 = vld [vmem:[%s7419_s13 + $0x30] sm:$0xff]  ;;  %v5239_v51 = vld [vmem:[%s7419_s13 + $0x28] sm:$0xff] }
 0x6f3   :  { %v3548_v41 = vadd.f32 %v7253_v13, %v3536_v4 }
 0x6f6   :  { %v3513_v8 = vpop.f32.mrf.mxu2 }
 0x6f7   :  { %v3529_v43 = vadd.f32 %v3513_v8, %v3241_v3 }
 0x6f8   :  { %v3415_v62 = vpop.f32.mrf.mxu1 }
 0x6f9   :  { %v3537_v14 = vmax.f32 %v3428_v55, %v3529_v43  ;;  %v3429_v35 = vadd.f32 %v3415_v62, %v7213_v44 }
 0x6fb   :  { %v3549_v52 = vadd.f32 %v7253_v13, %v3537_v14 }
 0x6fd   :  { %v3559_v58 = vpack.c.bf16 %v3549_v52, %v3548_v41  ;;  %v4963_v52 = vld [vmem:[%s7420_s12 + $0x4] sm:$0xf] }
 0x6fe   :  { %v3516_v53 = vpop.f32.mrf.mxu2 }
 0x6ff   :  { %v3530_v50 = vadd.f32 %v3516_v53, %v3242_v23  ;;  %v3646_v23 = vld [vmem:[%s7420_s12] sm:$0xf]  ;;  %v5237_v53 = vld [vmem:[%s7419_s13 + $0x18] sm:$0xff] }
 0x700   :  { %v3417_v19 = vpop.f32.mrf.mxu1 }
 0x701   :  { %v3538_v21 = vmax.f32 %v3429_v35, %v3530_v50  ;;  %v3430_v30 = vadd.f32 %v3417_v19, %v7220_v25  ;;  %v2856_v25 = vadd.f32 %v7229_v33, %v2498_v42  ;;  %v5232_v33 = vld [vmem:[%s7418_s11] sm:$0xff]  ;;  %v5236_v35 = vld [vmem:[%s7419_s13 + $0x10] sm:$0xff]  ;;  %v5235_v50 = vld [vmem:[%s7419_s13 + $0x8] sm:$0xff] }
 0x702   :  { %v5234_v19 = vld [vmem:[%s7419_s13] sm:$0xff] }
 0x703   :  { %v3550_v22 = vadd.f32 %v7253_v13, %v3538_v21  ;;  %v3144_v46 = vadd.f32 %v7240_v0, %v2856_v25  ;;  %v5233_v0 = vld [vmem:[%s7418_s11 + $0x8] sm:$0xff]  ;;  %v5248_v21 = vld [vmem:[%s7419_s13 + $0x70] sm:$0xff] }
 0x704   :  { %v5252_v25 = vld [vmem:[%s7419_s13 + $0x90] sm:$0xff] }
 0x706   :  { %v3518_v34 = vpop.f32.mrf.mxu2 }
 0x707   :  { %v3531_v40 = vadd.f32 %v3518_v34, %v3243_v49  ;;  %v5247_v49 = vld [vmem:[%s7419_s13 + $0x68] sm:$0xff]  ;;  %v5246_v34 = vld [vmem:[%s7419_s13 + $0x60] sm:$0xff] }
 0x708   :  { %v3420_v36 = vpop.f32.mrf.mxu1 }
 0x709   :  { %v3539_v28 = vmax.f32 %v3430_v30, %v3531_v40  ;;  %v3431_v1 = vadd.f32 %v3420_v36, %v7227_v45  ;;  %v5230_v45 = vld [vmem:[%s7417_s10] sm:$0xff]  ;;  %v5245_v30 = vld [vmem:[%s7419_s13 + $0x58] sm:$0xff]  ;;  %v5244_v40 = vld [vmem:[%s7419_s13 + $0x50] sm:$0xff] }
 0x70b   :  { %v3551_v15 = vadd.f32 %v7253_v13, %v3539_v28 }
 0x70d   :  { %v3560_v7 = vpack.c.bf16 %v3551_v15, %v3550_v22 }
 0x70e   :  { %v3521_v44 = vpop.f32.mrf.mxu2 }
 0x70f   :  { %v3532_v5 = vadd.f32 %v3521_v44, %v3244_v63 }
 0x710   :  { %v3422_v47 = vpop.f32.mrf.mxu1 }
 0x711   :  { %v3540_v10 = vmax.f32 %v3431_v1, %v3532_v5  ;;  %v3432_v61 = vadd.f32 %v3422_v47, %v3144_v46  ;;  %v5253_v5 = vld [vmem:[%s7419_s13 + $0x98] sm:$0xff] }
 0x712   :  { %v5249_v47 = vld [vmem:[%s7419_s13 + $0x78] sm:$0xff] }
 0x713   :  { %v3552_v18 = vadd.f32 %v7253_v13, %v3540_v10  ;;  %v5251_v10 = vld [vmem:[%s7419_s13 + $0x88] sm:$0xff]  ;;  %v3964_v46 = vld [vmem:[%s7422_s15 + $0x18] sm:$0x1] }
 0x716   :  { %v3523_v38 = vpop.f32.mrf.mxu2 }
 0x717   :  { %v3533_v20 = vadd.f32 %v3523_v38, %v3245_v9  ;;  %v3983_v9 = vunpack.c.l.b16 %v3964_v46 }
 0x719   :  { %v3541_v60 = vmax.f32 %v3432_v61, %v3533_v20  ;;  %v3987_v38 = vpack.c.b16 %v3983_v9, %v3983_v9  ;;  %v5256_v20 = vld [vmem:[%s7422_s15 + $0x10] sm:$0xff] }
 0x71b   :  { %v3553_v16 = vadd.f32 %v7253_v13, %v3541_v60  ;;  %v3997_v61 = vsel %vm3995_vm10, %v3987_v38, 0 }
 0x71d   :  { %v3561_v26 = vpack.c.bf16 %v3553_v16, %v3552_v18 }
 0x71f   :  { %3582 = vmatpush.bf16.msrb.mxu3 %v3561_v26 }
 0x723   :  { %3583 = vmatpush.bf16.msrb.mxu3 %v3560_v7 }
 0x727   :  { %3584 = vmatpush.bf16.msrb.mxu3 %v3559_v58 }
 0x72b   :  { %3585 = vmatpush.bf16.msrb.mxu3 %v7258_v17 }
 0x72e   :  { %4950 = vmatmul.msk.bf16.vlgmr.msrb.gmra.mxu3 %vm1838_vm5, %v5230_v45 }
 0x72f   :  { %3621 = vmatpush.bf16.msra.mxu3 %v3561_v26 }
 0x733   :  { %3622 = vmatpush.bf16.msra.mxu3 %v3560_v7  ;;  %v5050_v7 = vld [vmem:[%s7420_s12 + $0xc] sm:$0xf] }
 0x737   :  { %3623 = vmatpush.bf16.msra.mxu3 %v3559_v58  ;;  %v5017_v58 = vld [vmem:[%s7420_s12 + $0x8] sm:$0xf] }
 0x73b   :  { %3624 = vmatpush.bf16.msra.mxu3 %v7258_v17  ;;  %v5242_v17 = vld [vmem:[%s7419_s13 + $0x40] sm:$0xff] }
 0x73c   :  { %3743 = vmatpush.bf16.msra.mxu2 %v5242_v17  ;;  %v5254_v17 = vld [vmem:[%s7422_s15] sm:$0xff] }
 0x73e   :  { %4951 = vmatmul.msk.bf16.gmra.mxu3 %vm1838_vm5, %v5231_v6 }
 0x73f   :  { %3788 = vmatpush.bf16.msrb.mxu3 %v5238_v48 }
 0x740   :  { %3744 = vmatpush.bf16.msra.mxu2 %v5241_v32  ;;  %v5259_v32 = vld [vmem:[%s7421_s14] ss:$0 sm:$0xff] }
 0x743   :  { %3789 = vmatpush.bf16.msrb.mxu3 %v5237_v53 }
 0x744   :  { %3745 = vmatpush.bf16.msra.mxu2 %v5240_v2 }
 0x747   :  { %3790 = vmatpush.bf16.msrb.mxu3 %v5236_v35 }
 0x748   :  { %3746 = vmatpush.bf16.msra.mxu2 %v5239_v51 }
 0x74b   :  { %3791 = vmatpush.bf16.msrb.mxu3 %v5235_v50 }
 0x74e   :  { %4960 = vmatmul.msk.bf16.vlgmr.msra.gmra.mxu3 %vm1838_vm5, %v5232_v33 }
 0x74f   :  { %3792 = vmatpush.bf16.msrb.mxu3 %v5234_v19 }
 0x753   :  { %3941 = vmatpush.bf16.msra.mxu3 %v5253_v5 }
 0x757   :  { %3942 = vmatpush.bf16.msra.mxu3 %v5252_v25 }
 0x75b   :  { %3943 = vmatpush.bf16.msra.mxu3 %v5251_v10 }
 0x75e   :  { %4961 = vmatmul.msk.bf16.gmra.mxu3 %vm1838_vm5, %v5233_v0 }
 0x75f   :  { %3944 = vmatpush.bf16.msra.mxu3 %v5250_v39 }
 0x763   :  { %3945 = vmatpush.bf16.msra.mxu3 %v5249_v47 }
 0x7b1   :  { %v3587_v13 = vpop.f32.mrf.mxu3 }
 0x7b9   :  { %v3589_v12 = vpop.f32.mrf.mxu3 }
 0x7c1   :  { %v3592_v24 = vpop.f32.mrf.mxu3 }
 0x7c9   :  { %v3594_v11 = vpop.f32.mrf.mxu3 }
 0x7d1   :  { %v3626_v29 = vpop.f32.mrf.mxu3 }
 0x7d2   :  { %v3636_v3 = vmax.f32 %v3587_v13, %v3626_v29 }
 0x7d4   :  { %v3640_v14 = vmax.f32 %v3636_v3, 0.0 }
 0x7d9   :  { %v3628_v57 = vpop.f32.mrf.mxu3 }
 0x7da   :  { %v3637_v37 = vmax.f32 %v3589_v12, %v3628_v57 }
 0x7dc   :  { %v3641_v43 = vmax.f32 %v3637_v37, 0.0 }
 0x7de   :  { %v3644_v41 = vpack.c.bf16 %v3641_v43, %v3640_v14 }
 0x7e1   :  { %v3631_v59 = vpop.f32.mrf.mxu3 }
 0x7e2   :  { %v3638_v4 = vmax.f32 %v3592_v24, %v3631_v59  ;;  %v5255_v24 = vld [vmem:[%s7422_s15 + $0x8] sm:$0xff] }
 0x7e4   :  { %v3642_v8 = vmax.f32 %v3638_v4, 0.0  ;;  %v5260_v4 = vld [vmem:[%s7423_s16] ss:$0 sm:$0xff] }
 0x7e9   :  { %v3633_v56 = vpop.f32.mrf.mxu3 }
 0x7ea   :  { %v3639_v27 = vmax.f32 %v3594_v11, %v3633_v56 }
 0x7ec   :  { %v3643_v55 = vmax.f32 %v3639_v27, 0.0 }
 0x7ee   :  { %v3645_v62 = vpack.c.bf16 %v3643_v55, %v3642_v8 }
 0x7f0   :  { %3686 = vmatpush.bf16.msrb.mxu1 %v3645_v62  ;;  %3657 = vmatpush.bf16.msrb.mxu0 %v3645_v62 }
 0x7f1   :  { %3886 = vmatpush.bf16.msrb.mxu2 %v3645_v62 }
 0x7f4   :  { %3687 = vmatpush.bf16.msrb.mxu1 %v3644_v41  ;;  %3658 = vmatpush.bf16.msrb.mxu0 %v3644_v41 }
 0x7f5   :  { %3887 = vmatpush.bf16.msrb.mxu2 %v3644_v41 }
 0x7f7   :  { %4964 = vmatmul.msk.bf16.vlgmr.msrb.gmra.mxu1 %vm3647_vm8, %v4963_v52  ;;  %4962 = vmatmul.msk.bf16.vlgmr.msrb.gmra.mxu0 %vm3647_vm8, %v3646_v23 }
 0x7f8   :  { %3809 = vmatpush.bf16.msra.mxu0 %v3645_v62  ;;  %3864 = vmatpush.bf16.msra.mxu1 %v5248_v21 }
 0x7fc   :  { %3810 = vmatpush.bf16.msra.mxu0 %v3644_v41  ;;  %3865 = vmatpush.bf16.msra.mxu1 %v5247_v49 }
 0x800   :  { %3866 = vmatpush.bf16.msra.mxu1 %v5246_v34  ;;  %4003 = vmatpush.bf16.msrb.mxu0 %v3997_v61 }
 0x804   :  { %3867 = vmatpush.bf16.msra.mxu1 %v5245_v30  ;;  %4004 = vmatpush.bf16.msrb.mxu0 %v5256_v20 }
 0x807   :  { %5018 = vmatmul.msk.bf16.vlgmr.msra.gmra.mxu0 %vm3647_vm8, %v5017_v58 }
 0x808   :  { %3868 = vmatpush.bf16.msra.mxu1 %v5244_v40  ;;  %4005 = vmatpush.bf16.msrb.mxu0 %v5255_v24 }
 0x80c   :  { %4006 = vmatpush.bf16.msrb.mxu0 %v5254_v17 }
 0x874   :  { %v3689_v31 = vpop.f32.mrf.mxu1  ;;  %v3660_v28 = vpop.f32.mrf.mxu0 }
 0x875   :  { %v3704_v36 = vpack.c.bf16 %v3689_v31, %v3689_v31  ;;  %v3674_v22 = vpack.c.bf16 %v3660_v28, %v3660_v28 }
 0x877   :  { %4995 = vmatmul.msk.bf16.vlgmr.msra.gmra.mxu2 %vm3735_vm9, %v3704_v36  ;;  %5016 = vmatmul.msk.bf16.vlgmr.msrb.gmra.mxu3 %vm3735_vm9, %v3674_v22 }
 0x87c   :  { %v3662_v15 = vpop.f32.mrf.mxu0  ;;  %v3691_v63 = vpop.f32.mrf.mxu1 }
 0x884   :  { %v3812_v44 = vpop.f32.mrf.mxu0 }
 0x885   :  { %v3827_v42 = vpack.c.bf16 %v3812_v44, %v3812_v44 }
 0x887   :  { %5051 = vmatmul.msk.bf16.vlgmr.msrb.gmra.mxu2 %vm3647_vm8, %v5050_v7  ;;  %5049 = vmatmul.msk.bf16.vlgmr.msra.gmra.mxu1 %vm3735_vm9, %v3827_v42 }
 0x88c   :  { %v3814_v1 = vpop.f32.mrf.mxu0 }
 0x8fa   :  { %v3748_v60 = vpop.f32.mrf.mxu2  ;;  %v3794_v18 = vpop.f32.mrf.mxu3 }
 0x8fb   :  { %v3795_v16 = vadd.f32 %v3794_v18, %v3748_v60 }
 0x902   :  { %v3750_v26 = vpop.f32.mrf.mxu2  ;;  %v3796_v45 = vpop.f32.mrf.mxu3 }
 0x904   :  { %v3870_v6 = vpop.f32.mrf.mxu1 }
 0x905   :  { %v3874_v33 = vadd.f32 %v3870_v6, %v3795_v16 }
 0x90a   :  { %v3889_v0 = vpop.f32.mrf.mxu2 }
 0x90b   :  { %v3904_v13 = vpack.c.bf16 %v3889_v0, %v3889_v0 }
 0x90c   :  { %v3872_v12 = vpop.f32.mrf.mxu1 }
 0x90d   :  { %5082 = vmatmul.msk.bf16.vlgmr.msra.gmra.mxu3 %vm3735_vm9, %v3904_v13 }
 0x912   :  { %v3891_v54 = vpop.f32.mrf.mxu2 }
 0x990   :  { %v3947_v11 = vpop.f32.mrf.mxu3 }
 0x991   :  { %v3951_v2 = vadd.f32 %v3947_v11, %v3874_v33 }
 0x993   :  { %v3956_v51 = vadd.f32 %v5259_v32, %v3951_v2 }
 0x995   :  { %v3957_v29 = vmax.f32 %v3956_v51, 0.0 }
 0x997   :  { %v3965_v57 = vpack.c.bf16 %v3957_v29, %v3957_v29 }
 0x998   :  { %v3949_v59 = vpop.f32.mrf.mxu3 }
 0x999   :  { %5095 = vmatmul.msk.bf16.vlgmr.msrb.gmra.mxu0 %vm3991_vm11, %v3965_v57 }
 0xa16   :  { %v4008_v56 = vpop.f32.mrf.mxu0 }
 0xa17   :  { %v4009_v37 = vadd.f32 %v5260_v4, %v4008_v56 }
 0xa19   :  { %v4013_v27 = vsel %vm4012_vm12, %v4009_v37, -inf }
 0xa1a   :  { %4014 = vmax.xlane.f32.xlu0 %v4013_v27 }
 0xa1e   :  { %v4010_v3 = vpop.f32.mrf.mxu0 }
 0xa8d   :  { %v4015_v8 = vpop.xlane.xlu0 %4014 }
 0xa8e   :  { %v4016_v55 = vsub.f32 %v4009_v37, %v4015_v8 }
 0xa90   :  { %v4017_v43 = vmul.f32 1.442695, %v4016_v55 }
 0xa92   :  { %5261 = vpow2.f32 %v4017_v43 }
 0xa98   :  { %v5262_v62 = vpop.eup %5261 }
 0xa99   :  { %v4019_v14 = vsel %vm4012_vm12, %v5262_v62, 0.0 }
 0xa9a   :  { %4020 = vadd.xlane.f32.xlu0 %v4019_v14 }
 0xb0d   :  { %v4021_v41 = vpop.xlane.xlu0 %4020 }
 0xb0e   :  { %5263 = vlog2.f32 %v4021_v41 }
 0xb14   :  { %v5264_v52 = vpop.eup %5263 }
 0xb15   :  { %v4023_v23 = vmul.f32 0.6931472, %v5264_v52 }
 0xb17   :  { %v4024_v58 = vsub.f32 %v4016_v55, %v4023_v23 }
 0xb19   :  { %4025 = vst.msk [vmem:[%s7424_s17] sm:$0xff] %vm4012_vm12, %v4024_v58 }

</bundles_post_ra>
